<compile_context>
chip_gen: v7x
topology: tpu7x:2x2x1
jax: 0.10.0
libtpu: 0.0.40
codegen_flags: <defaults>
</compile_context>

<pallas_src>
import functools

import jax
import jax.numpy as jnp
from jax import lax
from jax.experimental import pallas as pl
from jax.experimental.pallas import tpu as pltpu

# ----------------------------- configuration --------------------------------
IMG_SIZE = 16
PATCH = 4
IN_CHANS = 3
EMBED_DIM = 32
DEPTH = 2
NUM_HEADS = 4
HEAD_DIM = EMBED_DIM // NUM_HEADS
MLP_RATIO = 4.0
HIDDEN = int(EMBED_DIM * MLP_RATIO)
N_PATCH = (IMG_SIZE // PATCH) ** 2      # 16 patches
N_MASK = N_PATCH // 2                   # 8 masked
N_VIS = N_PATCH - N_MASK                # 8 visible
PATCH_FEATS = IN_CHANS * PATCH * PATCH  # 48
LN_EPS = 1e-5
ATTN_SCALE = HEAD_DIM ** -0.5
BATCH = 2


# ----------------------------- in-kernel helpers ----------------------------
def _erf_f32(x):
  """XLA's f32 rational approximation of erf (matches erf to f32 precision)."""
  alpha = (0.00022905065861350646, 0.0034082910107109506,
           0.050955695062380861, 0.18520832239976145, 1.128379143519084)
  beta = (-1.1791602954361697e-7, 2.3547966471313185e-5,
          0.0010179625278914885, 0.014070470171167667,
          0.11098505178285362, 0.49746925110067538, 1.0)
  x = jnp.clip(x, -3.832506856900711, 3.832506856900711)
  x2 = x * x
  num = jnp.full_like(x2, alpha[0])
  for c in alpha[1:]:
    num = num * x2 + c
  den = jnp.full_like(x2, beta[0])
  for c in beta[1:]:
    den = den * x2 + c
  return x * num / den


def _gelu_exact(x):
  # nn.GELU default (erf-based), not the tanh approximation.
  return 0.5 * x * (1.0 + _erf_f32(x * 0.7071067811865476))


def _layer_norm(x, w, b):
  # PyTorch nn.LayerNorm over the last dim, eps=1e-5, biased variance.
  mean = jnp.mean(x, axis=-1, keepdims=True)
  xc = x - mean
  var = jnp.mean(xc * xc, axis=-1, keepdims=True)
  return xc * lax.rsqrt(var + LN_EPS) * w + b


# ----------------------------- fused Pallas kernel --------------------------
def fused_encoder_kernel(patches_ref, pw_ref, pb_ref, pos_ref,
                         ln1w_ref, ln1b_ref, qkvw_ref, projw_ref, projb_ref,
                         ln2w_ref, ln2b_ref, fc1w_ref, fc1b_ref,
                         fc2w_ref, fc2b_ref, normw_ref, normb_ref,
                         out_ref, *, batch, n_vis, num_heads, head_dim, depth):
  dim = num_heads * head_dim

  # patch embedding (conv-as-matmul) + fixed sinusoid pos-embedding, visible
  # tokens of all batch items stacked along the sublane axis: (B*N_vis, D).
  x = (jnp.dot(patches_ref[...], pw_ref[...],
               preferred_element_type=jnp.float32)
       + pb_ref[...] + pos_ref[...])

  for d in range(depth):                                  # static unroll
    # ---- multi-head self-attention (pre-norm) ----
    h = _layer_norm(x, ln1w_ref[d], ln1b_ref[d])
    qkv = jnp.dot(h, qkvw_ref[d], preferred_element_type=jnp.float32)
    proj_w = projw_ref[d]                                 # (D, D)

    attn_rows = []
    for b in range(batch):                  # attention is per image (block-diag)
      r0 = b * n_vis
      qkv_b = qkv[r0:r0 + n_vis, :]
      acc = jnp.zeros((n_vis, dim), jnp.float32)
      for hd_i in range(num_heads):
        lo = hd_i * head_dim
        q = qkv_b[:, lo:lo + head_dim]      # attn scale pre-folded into qkv_w
        k = qkv_b[:, dim + lo:dim + lo + head_dim]
        v = qkv_b[:, 2 * dim + lo:2 * dim + lo + head_dim]
        s = jnp.dot(q, k.T, preferred_element_type=jnp.float32)
        s = s - jnp.max(s, axis=-1, keepdims=True)
        p = jnp.exp(s)
        p = p * pl.reciprocal(jnp.sum(p, axis=-1, keepdims=True), approx=True)
        ho = jnp.dot(p, v, preferred_element_type=jnp.float32)
        # accumulate this head's partial output projection (no lane concat)
        acc = acc + jnp.dot(ho, proj_w[lo:lo + head_dim, :],
                            preferred_element_type=jnp.float32)
      attn_rows.append(acc)
    attn = jnp.concatenate(attn_rows, axis=0) + projb_ref[d]
    x = x + attn                            # drop_path(0.0) == identity

    # ---- MLP (pre-norm) ----
    h = _layer_norm(x, ln2w_ref[d], ln2b_ref[d])
    h = jnp.dot(h, fc1w_ref[d], preferred_element_type=jnp.float32) + fc1b_ref[d]
    h = _gelu_exact(h)
    h = jnp.dot(h, fc2w_ref[d], preferred_element_type=jnp.float32) + fc2b_ref[d]
    x = x + h

  # final LayerNorm; head = nn.Identity (num_classes == 0)
  out_ref[...] = _layer_norm(x, normw_ref[...], normb_ref[...])


# ----------------------------- wrapper ---------------------------------------
def _vmem_full(arr):
  """Whole-array block mapped into VMEM, single grid step."""
  return pl.BlockSpec(arr.shape, lambda i, n=arr.ndim: (0,) * n)


def encoder_forward(x_nchw, mask, pp):
  """x_nchw: (B, C_in, H, W) f32; mask: (B, N_PATCH) bool (True = masked);
  pp: packed params from pack_params()."""
  B = x_nchw.shape[0]
  nh = IMG_SIZE // PATCH

  # glue: extract non-overlapping patches, ordered like Conv2d + flatten(2).
  patches = x_nchw.reshape(B, IN_CHANS, nh, PATCH, nh, PATCH)
  patches = patches.transpose(0, 2, 4, 1, 3, 5).reshape(B, N_PATCH, PATCH_FEATS)

  # glue: visible-token selection. The index computation for x[~mask] is
  # data-dependent so it stays in XLA; gathering the raw patch rows and pos
  # rows *before* embedding is mathematically identical to gathering embedded
  # tokens (embedding + pos-add are per token) and lets the whole encoder run
  # as ONE fused Pallas kernel with no intermediate HBM round trip.
  # TODO(synk): the data-dependent boolean gather has no static Pallas
  # equivalent; its index computation (argsort) is done in XLA.
  vis_idx = jnp.argsort(mask.astype(jnp.int32), axis=1, stable=True)[:, :N_VIS]
  patches_vis = jnp.take_along_axis(
      patches, vis_idx[:, :, None], axis=1).reshape(B * N_VIS, PATCH_FEATS)
  pos_vis = jnp.take(pp["pos"], vis_idx, axis=0).reshape(B * N_VIS, EMBED_DIM)

  args = (patches_vis, pp["patch_w"], pp["patch_b"], pos_vis,
          pp["ln1_w"], pp["ln1_b"], pp["qkv_w"], pp["proj_w"], pp["proj_b"],
          pp["ln2_w"], pp["ln2_b"], pp["fc1_w"], pp["fc1_b"],
          pp["fc2_w"], pp["fc2_b"], pp["norm_w"], pp["norm_b"])

  kern = functools.partial(
      fused_encoder_kernel, batch=B, n_vis=N_VIS, num_heads=NUM_HEADS,
      head_dim=HEAD_DIM, depth=DEPTH)

  out_flat = pl.pallas_call(
      kern,
      out_shape=jax.ShapeDtypeStruct((B * N_VIS, EMBED_DIM), jnp.float32),
      grid=(1,),
      in_specs=[_vmem_full(a) for a in args],
      out_specs=pl.BlockSpec((B * N_VIS, EMBED_DIM), lambda i: (0, 0)),
      compiler_params=pltpu.CompilerParams(
          dimension_semantics=("arbitrary",)),   # tiny kernel: keep on one TC
  )(*args)

  return out_flat.reshape(B, N_VIS, EMBED_DIM)


# ----------------------------- parameter init / packing ----------------------
def _sinusoid_table(n_pos, d_hid):
  pos = jnp.arange(n_pos, dtype=jnp.float32)[:, None]
  i = jnp.arange(d_hid)
  div = jnp.power(10000.0, 2.0 * (i // 2).astype(jnp.float32) / d_hid)
  angles = pos / div
  return jnp.where(i % 2 == 0, jnp.sin(angles), jnp.cos(angles)).astype(jnp.float32)


def _xavier_uniform(key, out_dim, in_dim):
  limit = (6.0 / (in_dim + out_dim)) ** 0.5
  # PyTorch stores (out, in); transpose to (in, out) for x @ W in the kernel.
  w = jax.random.uniform(key, (out_dim, in_dim), jnp.float32, -limit, limit)
  return w.T


def init_params(key):
  keys = jax.random.split(key, 2 + DEPTH)
  # Conv2d default-style init (kaiming-uniform bound), deterministic.
  bound = 1.0 / (PATCH_FEATS ** 0.5)
  conv_w = jax.random.uniform(
      keys[0], (EMBED_DIM, IN_CHANS, PATCH, PATCH), jnp.float32, -bound, bound)
  conv_b = jax.random.uniform(keys[1], (EMBED_DIM,), jnp.float32, -bound, bound)

  params = {
      "patch_w": conv_w.reshape(EMBED_DIM, PATCH_FEATS).T,    # (P, D)
      "patch_b": conv_b.reshape(1, EMBED_DIM),
      "pos": _sinusoid_table(N_PATCH, EMBED_DIM),              # (N, D), fixed
      "norm_w": jnp.ones((1, EMBED_DIM), jnp.float32),
      "norm_b": jnp.zeros((1, EMBED_DIM), jnp.float32),
      "blocks": [],
  }
  for d in range(DEPTH):
    bk = jax.random.split(keys[2 + d], 4)
    params["blocks"].append({
        "ln1_w": jnp.ones((1, EMBED_DIM), jnp.float32),
        "ln1_b": jnp.zeros((1, EMBED_DIM), jnp.float32),
        "qkv_w": _xavier_uniform(bk[0], 3 * EMBED_DIM, EMBED_DIM),  # (D, 3D)
        "proj_w": _xavier_uniform(bk[1], EMBED_DIM, EMBED_DIM),     # (D, D)
        "proj_b": jnp.zeros((1, EMBED_DIM), jnp.float32),
        "ln2_w": jnp.ones((1, EMBED_DIM), jnp.float32),
        "ln2_b": jnp.zeros((1, EMBED_DIM), jnp.float32),
        "fc1_w": _xavier_uniform(bk[2], HIDDEN, EMBED_DIM),         # (D, H)
        "fc1_b": jnp.zeros((1, HIDDEN), jnp.float32),
        "fc2_w": _xavier_uniform(bk[3], EMBED_DIM, HIDDEN),         # (H, D)
        "fc2_b": jnp.zeros((1, EMBED_DIM), jnp.float32),
    })
  return params


def pack_params(params):
  """Stack per-block params to (DEPTH, ...) and fold the attention scale into
  the Q output columns of qkv_w (numerically equivalent to `q = q * scale`)."""
  blocks = params["blocks"]
  stack = lambda key: jnp.stack([blk[key] for blk in blocks], axis=0)
  qkv_w = stack("qkv_w")                                    # (DEPTH, D, 3D)
  qkv_w = qkv_w.at[:, :, :EMBED_DIM].multiply(jnp.float32(ATTN_SCALE))
  return {
      "patch_w": params["patch_w"], "patch_b": params["patch_b"],
      "pos": params["pos"],
      "norm_w": params["norm_w"], "norm_b": params["norm_b"],
      "ln1_w": stack("ln1_w"), "ln1_b": stack("ln1_b"),
      "qkv_w": qkv_w,
      "proj_w": stack("proj_w"), "proj_b": stack("proj_b"),
      "ln2_w": stack("ln2_w"), "ln2_b": stack("ln2_b"),
      "fc1_w": stack("fc1_w"), "fc1_b": stack("fc1_b"),
      "fc2_w": stack("fc2_w"), "fc2_b": stack("fc2_b"),
  }


def make_mask(key, batch):
  """Boolean (B, N_PATCH) mask with exactly N_MASK True entries per row."""
  rows = []
  for b in range(batch):
    perm = jax.random.permutation(jax.random.fold_in(key, b), N_PATCH)
    row = jnp.zeros((N_PATCH,), jnp.bool_).at[perm[:N_MASK]].set(True)
    rows.append(row)
  return jnp.stack(rows)


# ----------------------------- main ------------------------------------------
if __name__ == "__main__":
  root = jax.random.PRNGKey(0)
  k_x, k_p, k_m = jax.random.split(root, 3)

  x = jax.random.normal(k_x, (BATCH, IN_CHANS, IMG_SIZE, IMG_SIZE), jnp.float32)
  mask = make_mask(k_m, BATCH)
  params = init_params(k_p)
  packed = pack_params(params)

  fwd = jax.jit(encoder_forward)
  out = jax.block_until_ready(fwd(x, mask, packed))

  assert out.shape == (BATCH, N_VIS, EMBED_DIM), out.shape
  assert jnp.all(jnp.isfinite(out))
  print("KERNEL_OK")
</pallas_src>

<mosaic_0001>
module attributes {stable_mosaic.version = 11 : i64} {
  func.func @fused_encoder_kernel(%arg0: i32, %arg1: memref<16x48xf32, #tpu.memory_space<vmem>>, %arg2: memref<48x32xf32, #tpu.memory_space<vmem>>, %arg3: memref<1x32xf32, #tpu.memory_space<vmem>>, %arg4: memref<16x32xf32, #tpu.memory_space<vmem>>, %arg5: memref<2x1x32xf32, #tpu.memory_space<vmem>>, %arg6: memref<2x1x32xf32, #tpu.memory_space<vmem>>, %arg7: memref<2x32x96xf32, #tpu.memory_space<vmem>>, %arg8: memref<2x32x32xf32, #tpu.memory_space<vmem>>, %arg9: memref<2x1x32xf32, #tpu.memory_space<vmem>>, %arg10: memref<2x1x32xf32, #tpu.memory_space<vmem>>, %arg11: memref<2x1x32xf32, #tpu.memory_space<vmem>>, %arg12: memref<2x32x128xf32, #tpu.memory_space<vmem>>, %arg13: memref<2x1x128xf32, #tpu.memory_space<vmem>>, %arg14: memref<2x128x32xf32, #tpu.memory_space<vmem>>, %arg15: memref<2x1x32xf32, #tpu.memory_space<vmem>>, %arg16: memref<1x32xf32, #tpu.memory_space<vmem>>, %arg17: memref<1x32xf32, #tpu.memory_space<vmem>>, %arg18: memref<16x32xf32, #tpu.memory_space<vmem>>) attributes {dimension_semantics = [#tpu.dimension_semantics<arbitrary>], iteration_bounds = array<i64: 1>, scalar_prefetch = 0 : i64, scratch_operands = 0 : i64, tpu.core_type = #tpu.core_type<tc>, window_params = [{pipeline_mode = #tpu.pipeline_mode<synchronous>, transform_indices = @transform_0, window_bounds = array<i64: 16, 48>}, {pipeline_mode = #tpu.pipeline_mode<synchronous>, transform_indices = @transform_1, window_bounds = array<i64: 48, 32>}, {pipeline_mode = #tpu.pipeline_mode<synchronous>, transform_indices = @transform_2, window_bounds = array<i64: 1, 32>}, {pipeline_mode = #tpu.pipeline_mode<synchronous>, transform_indices = @transform_3, window_bounds = array<i64: 16, 32>}, {pipeline_mode = #tpu.pipeline_mode<synchronous>, transform_indices = @transform_4, window_bounds = array<i64: 2, 1, 32>}, {pipeline_mode = #tpu.pipeline_mode<synchronous>, transform_indices = @transform_5, window_bounds = array<i64: 2, 1, 32>}, {pipeline_mode = #tpu.pipeline_mode<synchronous>, transform_indices = @transform_6, window_bounds = array<i64: 2, 32, 96>}, {pipeline_mode = #tpu.pipeline_mode<synchronous>, transform_indices = @transform_7, window_bounds = array<i64: 2, 32, 32>}, {pipeline_mode = #tpu.pipeline_mode<synchronous>, transform_indices = @transform_8, window_bounds = array<i64: 2, 1, 32>}, {pipeline_mode = #tpu.pipeline_mode<synchronous>, transform_indices = @transform_9, window_bounds = array<i64: 2, 1, 32>}, {pipeline_mode = #tpu.pipeline_mode<synchronous>, transform_indices = @transform_10, window_bounds = array<i64: 2, 1, 32>}, {pipeline_mode = #tpu.pipeline_mode<synchronous>, transform_indices = @transform_11, window_bounds = array<i64: 2, 32, 128>}, {pipeline_mode = #tpu.pipeline_mode<synchronous>, transform_indices = @transform_12, window_bounds = array<i64: 2, 1, 128>}, {pipeline_mode = #tpu.pipeline_mode<synchronous>, transform_indices = @transform_13, window_bounds = array<i64: 2, 128, 32>}, {pipeline_mode = #tpu.pipeline_mode<synchronous>, transform_indices = @transform_14, window_bounds = array<i64: 2, 1, 32>}, {pipeline_mode = #tpu.pipeline_mode<synchronous>, transform_indices = @transform_15, window_bounds = array<i64: 1, 32>}, {pipeline_mode = #tpu.pipeline_mode<synchronous>, transform_indices = @transform_16, window_bounds = array<i64: 1, 32>}, {pipeline_mode = #tpu.pipeline_mode<synchronous>, transform_indices = @transform_17, window_bounds = array<i64: 16, 32>}]} {
    %c0 = arith.constant 0 : index
    %c0_0 = arith.constant 0 : index
    %0 = vector.load %arg1[%c0, %c0_0] : memref<16x48xf32, #tpu.memory_space<vmem>>, vector<16x48xf32>
    %c0_1 = arith.constant 0 : index
    %c0_2 = arith.constant 0 : index
    %1 = vector.load %arg2[%c0_1, %c0_2] : memref<48x32xf32, #tpu.memory_space<vmem>>, vector<48x32xf32>
    %cst = arith.constant dense<0.000000e+00> : vector<16x32xf32>
    %2 = tpu.matmul %0, %1, %cst {dimension_numbers = #tpu.dot_dimension_numbers<[1], [0], [0], [1], [0, 0, 1, 1], [], []>} : vector<16x48xf32>, vector<48x32xf32>, vector<16x32xf32> -> vector<16x32xf32>
    %c0_3 = arith.constant 0 : index
    %c0_4 = arith.constant 0 : index
    %3 = vector.load %arg3[%c0_3, %c0_4] : memref<1x32xf32, #tpu.memory_space<vmem>>, vector<1x32xf32>
    %4 = vector.broadcast %3 : vector<1x32xf32> to vector<16x32xf32>
    %5 = arith.addf %2, %4 : vector<16x32xf32>
    %c0_5 = arith.constant 0 : index
    %c0_6 = arith.constant 0 : index
    %6 = vector.load %arg4[%c0_5, %c0_6] : memref<16x32xf32, #tpu.memory_space<vmem>>, vector<16x32xf32>
    %7 = arith.addf %5, %6 : vector<16x32xf32>
    %c0_7 = arith.constant 0 : index
    %c0_8 = arith.constant 0 : index
    %c0_9 = arith.constant 0 : index
    %8 = vector.load %arg5[%c0_7, %c0_8, %c0_9] : memref<2x1x32xf32, #tpu.memory_space<vmem>>, vector<1x1x32xf32>
    %9 = vector.shape_cast %8 : vector<1x1x32xf32> to vector<1x32xf32>
    %c0_10 = arith.constant 0 : index
    %c0_11 = arith.constant 0 : index
    %c0_12 = arith.constant 0 : index
    %10 = vector.load %arg6[%c0_10, %c0_11, %c0_12] : memref<2x1x32xf32, #tpu.memory_space<vmem>>, vector<1x1x32xf32>
    %11 = vector.shape_cast %10 : vector<1x1x32xf32> to vector<1x32xf32>
    %cst_13 = arith.constant dense<0.000000e+00> : vector<16xf32>
    %12 = vector.multi_reduction <add>, %7, %cst_13 [1] : vector<16x32xf32> to vector<16xf32>
    %13 = vector.shape_cast %12 : vector<16xf32> to vector<16x1xf32>
    %cst_14 = arith.constant 3.200000e+01 : f32
    %14 = vector.broadcast %cst_14 : f32 to vector<16x1xf32>
    %15 = arith.divf %13, %14 : vector<16x1xf32>
    %16 = vector.broadcast %15 : vector<16x1xf32> to vector<16x32xf32>
    %17 = arith.subf %7, %16 : vector<16x32xf32>
    %18 = arith.mulf %17, %17 : vector<16x32xf32>
    %cst_15 = arith.constant dense<0.000000e+00> : vector<16xf32>
    %19 = vector.multi_reduction <add>, %18, %cst_15 [1] : vector<16x32xf32> to vector<16xf32>
    %20 = vector.shape_cast %19 : vector<16xf32> to vector<16x1xf32>
    %cst_16 = arith.constant 3.200000e+01 : f32
    %21 = vector.broadcast %cst_16 : f32 to vector<16x1xf32>
    %22 = arith.divf %20, %21 : vector<16x1xf32>
    %cst_17 = arith.constant 9.99999974E-6 : f32
    %23 = vector.broadcast %cst_17 : f32 to vector<16x1xf32>
    %24 = arith.addf %22, %23 : vector<16x1xf32>
    %25 = math.rsqrt %24 : vector<16x1xf32>
    %26 = vector.broadcast %25 : vector<16x1xf32> to vector<16x32xf32>
    %27 = arith.mulf %17, %26 : vector<16x32xf32>
    %28 = vector.broadcast %9 : vector<1x32xf32> to vector<16x32xf32>
    %29 = arith.mulf %27, %28 : vector<16x32xf32>
    %30 = vector.broadcast %11 : vector<1x32xf32> to vector<16x32xf32>
    %31 = arith.addf %29, %30 : vector<16x32xf32>
    %c0_18 = arith.constant 0 : index
    %c0_19 = arith.constant 0 : index
    %c0_20 = arith.constant 0 : index
    %32 = vector.load %arg7[%c0_18, %c0_19, %c0_20] : memref<2x32x96xf32, #tpu.memory_space<vmem>>, vector<1x32x96xf32>
    %33 = vector.shape_cast %32 : vector<1x32x96xf32> to vector<32x96xf32>
    %cst_21 = arith.constant dense<0.000000e+00> : vector<16x96xf32>
    %34 = tpu.matmul %31, %33, %cst_21 {dimension_numbers = #tpu.dot_dimension_numbers<[1], [0], [0], [1], [0, 0, 1, 1], [], []>} : vector<16x32xf32>, vector<32x96xf32>, vector<16x96xf32> -> vector<16x96xf32>
    %c0_22 = arith.constant 0 : index
    %c0_23 = arith.constant 0 : index
    %c0_24 = arith.constant 0 : index
    %35 = vector.load %arg8[%c0_22, %c0_23, %c0_24] : memref<2x32x32xf32, #tpu.memory_space<vmem>>, vector<1x32x32xf32>
    %36 = vector.shape_cast %35 : vector<1x32x32xf32> to vector<32x32xf32>
    %37 = vector.extract_strided_slice %34 {offsets = [0, 0], sizes = [8, 96], strides = [1, 1]} : vector<16x96xf32> to vector<8x96xf32>
    %cst_25 = arith.constant 0.000000e+00 : f32
    %38 = vector.broadcast %cst_25 : f32 to vector<8x32xf32>
    %39 = vector.extract_strided_slice %37 {offsets = [0, 0], sizes = [8, 8], strides = [1, 1]} : vector<8x96xf32> to vector<8x8xf32>
    %40 = vector.extract_strided_slice %37 {offsets = [0, 32], sizes = [8, 8], strides = [1, 1]} : vector<8x96xf32> to vector<8x8xf32>
    %41 = vector.extract_strided_slice %37 {offsets = [0, 64], sizes = [8, 8], strides = [1, 1]} : vector<8x96xf32> to vector<8x8xf32>
    %42 = tpu.transpose %40, [1, 0] : vector<8x8xf32> -> vector<8x8xf32>
    %cst_26 = arith.constant dense<0.000000e+00> : vector<8x8xf32>
    %43 = tpu.matmul %39, %42, %cst_26 {dimension_numbers = #tpu.dot_dimension_numbers<[1], [0], [0], [1], [0, 0, 1, 1], [], []>} : vector<8x8xf32>, vector<8x8xf32>, vector<8x8xf32> -> vector<8x8xf32>
    %cst_27 = arith.constant dense<0xFF800000> : vector<8xf32>
    %44 = vector.multi_reduction <maximumf>, %43, %cst_27 [1] : vector<8x8xf32> to vector<8xf32>
    %45 = vector.shape_cast %44 : vector<8xf32> to vector<8x1xf32>
    %46 = vector.broadcast %45 : vector<8x1xf32> to vector<8x8xf32>
    %47 = arith.subf %43, %46 : vector<8x8xf32>
    %48 = math.exp %47 : vector<8x8xf32>
    %cst_28 = arith.constant dense<0.000000e+00> : vector<8xf32>
    %49 = vector.multi_reduction <add>, %48, %cst_28 [1] : vector<8x8xf32> to vector<8xf32>
    %50 = vector.shape_cast %49 : vector<8xf32> to vector<8x1xf32>
    %51 = tpu.reciprocal %50 {approx = true} : vector<8x1xf32> -> vector<8x1xf32>
    %52 = vector.broadcast %51 : vector<8x1xf32> to vector<8x8xf32>
    %53 = arith.mulf %48, %52 : vector<8x8xf32>
    %cst_29 = arith.constant dense<0.000000e+00> : vector<8x8xf32>
    %54 = tpu.matmul %53, %41, %cst_29 {dimension_numbers = #tpu.dot_dimension_numbers<[1], [0], [0], [1], [0, 0, 1, 1], [], []>} : vector<8x8xf32>, vector<8x8xf32>, vector<8x8xf32> -> vector<8x8xf32>
    %55 = vector.extract_strided_slice %36 {offsets = [0, 0], sizes = [8, 32], strides = [1, 1]} : vector<32x32xf32> to vector<8x32xf32>
    %cst_30 = arith.constant dense<0.000000e+00> : vector<8x32xf32>
    %56 = tpu.matmul %54, %55, %cst_30 {dimension_numbers = #tpu.dot_dimension_numbers<[1], [0], [0], [1], [0, 0, 1, 1], [], []>} : vector<8x8xf32>, vector<8x32xf32>, vector<8x32xf32> -> vector<8x32xf32>
    %57 = arith.addf %38, %56 : vector<8x32xf32>
    %58 = vector.extract_strided_slice %37 {offsets = [0, 8], sizes = [8, 8], strides = [1, 1]} : vector<8x96xf32> to vector<8x8xf32>
    %59 = vector.extract_strided_slice %37 {offsets = [0, 40], sizes = [8, 8], strides = [1, 1]} : vector<8x96xf32> to vector<8x8xf32>
    %60 = vector.extract_strided_slice %37 {offsets = [0, 72], sizes = [8, 8], strides = [1, 1]} : vector<8x96xf32> to vector<8x8xf32>
    %61 = tpu.transpose %59, [1, 0] : vector<8x8xf32> -> vector<8x8xf32>
    %cst_31 = arith.constant dense<0.000000e+00> : vector<8x8xf32>
    %62 = tpu.matmul %58, %61, %cst_31 {dimension_numbers = #tpu.dot_dimension_numbers<[1], [0], [0], [1], [0, 0, 1, 1], [], []>} : vector<8x8xf32>, vector<8x8xf32>, vector<8x8xf32> -> vector<8x8xf32>
    %cst_32 = arith.constant dense<0xFF800000> : vector<8xf32>
    %63 = vector.multi_reduction <maximumf>, %62, %cst_32 [1] : vector<8x8xf32> to vector<8xf32>
    %64 = vector.shape_cast %63 : vector<8xf32> to vector<8x1xf32>
    %65 = vector.broadcast %64 : vector<8x1xf32> to vector<8x8xf32>
    %66 = arith.subf %62, %65 : vector<8x8xf32>
    %67 = math.exp %66 : vector<8x8xf32>
    %cst_33 = arith.constant dense<0.000000e+00> : vector<8xf32>
    %68 = vector.multi_reduction <add>, %67, %cst_33 [1] : vector<8x8xf32> to vector<8xf32>
    %69 = vector.shape_cast %68 : vector<8xf32> to vector<8x1xf32>
    %70 = tpu.reciprocal %69 {approx = true} : vector<8x1xf32> -> vector<8x1xf32>
    %71 = vector.broadcast %70 : vector<8x1xf32> to vector<8x8xf32>
    %72 = arith.mulf %67, %71 : vector<8x8xf32>
    %cst_34 = arith.constant dense<0.000000e+00> : vector<8x8xf32>
    %73 = tpu.matmul %72, %60, %cst_34 {dimension_numbers = #tpu.dot_dimension_numbers<[1], [0], [0], [1], [0, 0, 1, 1], [], []>} : vector<8x8xf32>, vector<8x8xf32>, vector<8x8xf32> -> vector<8x8xf32>
    %74 = vector.extract_strided_slice %36 {offsets = [8, 0], sizes = [8, 32], strides = [1, 1]} : vector<32x32xf32> to vector<8x32xf32>
    %cst_35 = arith.constant dense<0.000000e+00> : vector<8x32xf32>
    %75 = tpu.matmul %73, %74, %cst_35 {dimension_numbers = #tpu.dot_dimension_numbers<[1], [0], [0], [1], [0, 0, 1, 1], [], []>} : vector<8x8xf32>, vector<8x32xf32>, vector<8x32xf32> -> vector<8x32xf32>
    %76 = arith.addf %57, %75 : vector<8x32xf32>
    %77 = vector.extract_strided_slice %37 {offsets = [0, 16], sizes = [8, 8], strides = [1, 1]} : vector<8x96xf32> to vector<8x8xf32>
    %78 = vector.extract_strided_slice %37 {offsets = [0, 48], sizes = [8, 8], strides = [1, 1]} : vector<8x96xf32> to vector<8x8xf32>
    %79 = vector.extract_strided_slice %37 {offsets = [0, 80], sizes = [8, 8], strides = [1, 1]} : vector<8x96xf32> to vector<8x8xf32>
    %80 = tpu.transpose %78, [1, 0] : vector<8x8xf32> -> vector<8x8xf32>
    %cst_36 = arith.constant dense<0.000000e+00> : vector<8x8xf32>
    %81 = tpu.matmul %77, %80, %cst_36 {dimension_numbers = #tpu.dot_dimension_numbers<[1], [0], [0], [1], [0, 0, 1, 1], [], []>} : vector<8x8xf32>, vector<8x8xf32>, vector<8x8xf32> -> vector<8x8xf32>
    %cst_37 = arith.constant dense<0xFF800000> : vector<8xf32>
    %82 = vector.multi_reduction <maximumf>, %81, %cst_37 [1] : vector<8x8xf32> to vector<8xf32>
    %83 = vector.shape_cast %82 : vector<8xf32> to vector<8x1xf32>
    %84 = vector.broadcast %83 : vector<8x1xf32> to vector<8x8xf32>
    %85 = arith.subf %81, %84 : vector<8x8xf32>
    %86 = math.exp %85 : vector<8x8xf32>
    %cst_38 = arith.constant dense<0.000000e+00> : vector<8xf32>
    %87 = vector.multi_reduction <add>, %86, %cst_38 [1] : vector<8x8xf32> to vector<8xf32>
    %88 = vector.shape_cast %87 : vector<8xf32> to vector<8x1xf32>
    %89 = tpu.reciprocal %88 {approx = true} : vector<8x1xf32> -> vector<8x1xf32>
    %90 = vector.broadcast %89 : vector<8x1xf32> to vector<8x8xf32>
    %91 = arith.mulf %86, %90 : vector<8x8xf32>
    %cst_39 = arith.constant dense<0.000000e+00> : vector<8x8xf32>
    %92 = tpu.matmul %91, %79, %cst_39 {dimension_numbers = #tpu.dot_dimension_numbers<[1], [0], [0], [1], [0, 0, 1, 1], [], []>} : vector<8x8xf32>, vector<8x8xf32>, vector<8x8xf32> -> vector<8x8xf32>
    %93 = vector.extract_strided_slice %36 {offsets = [16, 0], sizes = [8, 32], strides = [1, 1]} : vector<32x32xf32> to vector<8x32xf32>
    %cst_40 = arith.constant dense<0.000000e+00> : vector<8x32xf32>
    %94 = tpu.matmul %92, %93, %cst_40 {dimension_numbers = #tpu.dot_dimension_numbers<[1], [0], [0], [1], [0, 0, 1, 1], [], []>} : vector<8x8xf32>, vector<8x32xf32>, vector<8x32xf32> -> vector<8x32xf32>
    %95 = arith.addf %76, %94 : vector<8x32xf32>
    %96 = vector.extract_strided_slice %37 {offsets = [0, 24], sizes = [8, 8], strides = [1, 1]} : vector<8x96xf32> to vector<8x8xf32>
    %97 = vector.extract_strided_slice %37 {offsets = [0, 56], sizes = [8, 8], strides = [1, 1]} : vector<8x96xf32> to vector<8x8xf32>
    %98 = vector.extract_strided_slice %37 {offsets = [0, 88], sizes = [8, 8], strides = [1, 1]} : vector<8x96xf32> to vector<8x8xf32>
    %99 = tpu.transpose %97, [1, 0] : vector<8x8xf32> -> vector<8x8xf32>
    %cst_41 = arith.constant dense<0.000000e+00> : vector<8x8xf32>
    %100 = tpu.matmul %96, %99, %cst_41 {dimension_numbers = #tpu.dot_dimension_numbers<[1], [0], [0], [1], [0, 0, 1, 1], [], []>} : vector<8x8xf32>, vector<8x8xf32>, vector<8x8xf32> -> vector<8x8xf32>
    %cst_42 = arith.constant dense<0xFF800000> : vector<8xf32>
    %101 = vector.multi_reduction <maximumf>, %100, %cst_42 [1] : vector<8x8xf32> to vector<8xf32>
    %102 = vector.shape_cast %101 : vector<8xf32> to vector<8x1xf32>
    %103 = vector.broadcast %102 : vector<8x1xf32> to vector<8x8xf32>
    %104 = arith.subf %100, %103 : vector<8x8xf32>
    %105 = math.exp %104 : vector<8x8xf32>
    %cst_43 = arith.constant dense<0.000000e+00> : vector<8xf32>
    %106 = vector.multi_reduction <add>, %105, %cst_43 [1] : vector<8x8xf32> to vector<8xf32>
    %107 = vector.shape_cast %106 : vector<8xf32> to vector<8x1xf32>
    %108 = tpu.reciprocal %107 {approx = true} : vector<8x1xf32> -> vector<8x1xf32>
    %109 = vector.broadcast %108 : vector<8x1xf32> to vector<8x8xf32>
    %110 = arith.mulf %105, %109 : vector<8x8xf32>
    %cst_44 = arith.constant dense<0.000000e+00> : vector<8x8xf32>
    %111 = tpu.matmul %110, %98, %cst_44 {dimension_numbers = #tpu.dot_dimension_numbers<[1], [0], [0], [1], [0, 0, 1, 1], [], []>} : vector<8x8xf32>, vector<8x8xf32>, vector<8x8xf32> -> vector<8x8xf32>
    %112 = vector.extract_strided_slice %36 {offsets = [24, 0], sizes = [8, 32], strides = [1, 1]} : vector<32x32xf32> to vector<8x32xf32>
    %cst_45 = arith.constant dense<0.000000e+00> : vector<8x32xf32>
    %113 = tpu.matmul %111, %112, %cst_45 {dimension_numbers = #tpu.dot_dimension_numbers<[1], [0], [0], [1], [0, 0, 1, 1], [], []>} : vector<8x8xf32>, vector<8x32xf32>, vector<8x32xf32> -> vector<8x32xf32>
    %114 = arith.addf %95, %113 : vector<8x32xf32>
    %115 = vector.extract_strided_slice %34 {offsets = [8, 0], sizes = [8, 96], strides = [1, 1]} : vector<16x96xf32> to vector<8x96xf32>
    %cst_46 = arith.constant 0.000000e+00 : f32
    %116 = vector.broadcast %cst_46 : f32 to vector<8x32xf32>
    %117 = vector.extract_strided_slice %115 {offsets = [0, 0], sizes = [8, 8], strides = [1, 1]} : vector<8x96xf32> to vector<8x8xf32>
    %118 = vector.extract_strided_slice %115 {offsets = [0, 32], sizes = [8, 8], strides = [1, 1]} : vector<8x96xf32> to vector<8x8xf32>
    %119 = vector.extract_strided_slice %115 {offsets = [0, 64], sizes = [8, 8], strides = [1, 1]} : vector<8x96xf32> to vector<8x8xf32>
    %120 = tpu.transpose %118, [1, 0] : vector<8x8xf32> -> vector<8x8xf32>
    %cst_47 = arith.constant dense<0.000000e+00> : vector<8x8xf32>
    %121 = tpu.matmul %117, %120, %cst_47 {dimension_numbers = #tpu.dot_dimension_numbers<[1], [0], [0], [1], [0, 0, 1, 1], [], []>} : vector<8x8xf32>, vector<8x8xf32>, vector<8x8xf32> -> vector<8x8xf32>
    %cst_48 = arith.constant dense<0xFF800000> : vector<8xf32>
    %122 = vector.multi_reduction <maximumf>, %121, %cst_48 [1] : vector<8x8xf32> to vector<8xf32>
    %123 = vector.shape_cast %122 : vector<8xf32> to vector<8x1xf32>
    %124 = vector.broadcast %123 : vector<8x1xf32> to vector<8x8xf32>
    %125 = arith.subf %121, %124 : vector<8x8xf32>
    %126 = math.exp %125 : vector<8x8xf32>
    %cst_49 = arith.constant dense<0.000000e+00> : vector<8xf32>
    %127 = vector.multi_reduction <add>, %126, %cst_49 [1] : vector<8x8xf32> to vector<8xf32>
    %128 = vector.shape_cast %127 : vector<8xf32> to vector<8x1xf32>
    %129 = tpu.reciprocal %128 {approx = true} : vector<8x1xf32> -> vector<8x1xf32>
    %130 = vector.broadcast %129 : vector<8x1xf32> to vector<8x8xf32>
    %131 = arith.mulf %126, %130 : vector<8x8xf32>
    %cst_50 = arith.constant dense<0.000000e+00> : vector<8x8xf32>
    %132 = tpu.matmul %131, %119, %cst_50 {dimension_numbers = #tpu.dot_dimension_numbers<[1], [0], [0], [1], [0, 0, 1, 1], [], []>} : vector<8x8xf32>, vector<8x8xf32>, vector<8x8xf32> -> vector<8x8xf32>
    %133 = vector.extract_strided_slice %36 {offsets = [0, 0], sizes = [8, 32], strides = [1, 1]} : vector<32x32xf32> to vector<8x32xf32>
    %cst_51 = arith.constant dense<0.000000e+00> : vector<8x32xf32>
    %134 = tpu.matmul %132, %133, %cst_51 {dimension_numbers = #tpu.dot_dimension_numbers<[1], [0], [0], [1], [0, 0, 1, 1], [], []>} : vector<8x8xf32>, vector<8x32xf32>, vector<8x32xf32> -> vector<8x32xf32>
    %135 = arith.addf %116, %134 : vector<8x32xf32>
    %136 = vector.extract_strided_slice %115 {offsets = [0, 8], sizes = [8, 8], strides = [1, 1]} : vector<8x96xf32> to vector<8x8xf32>
    %137 = vector.extract_strided_slice %115 {offsets = [0, 40], sizes = [8, 8], strides = [1, 1]} : vector<8x96xf32> to vector<8x8xf32>
    %138 = vector.extract_strided_slice %115 {offsets = [0, 72], sizes = [8, 8], strides = [1, 1]} : vector<8x96xf32> to vector<8x8xf32>
    %139 = tpu.transpose %137, [1, 0] : vector<8x8xf32> -> vector<8x8xf32>
    %cst_52 = arith.constant dense<0.000000e+00> : vector<8x8xf32>
    %140 = tpu.matmul %136, %139, %cst_52 {dimension_numbers = #tpu.dot_dimension_numbers<[1], [0], [0], [1], [0, 0, 1, 1], [], []>} : vector<8x8xf32>, vector<8x8xf32>, vector<8x8xf32> -> vector<8x8xf32>
    %cst_53 = arith.constant dense<0xFF800000> : vector<8xf32>
    %141 = vector.multi_reduction <maximumf>, %140, %cst_53 [1] : vector<8x8xf32> to vector<8xf32>
    %142 = vector.shape_cast %141 : vector<8xf32> to vector<8x1xf32>
    %143 = vector.broadcast %142 : vector<8x1xf32> to vector<8x8xf32>
    %144 = arith.subf %140, %143 : vector<8x8xf32>
    %145 = math.exp %144 : vector<8x8xf32>
    %cst_54 = arith.constant dense<0.000000e+00> : vector<8xf32>
    %146 = vector.multi_reduction <add>, %145, %cst_54 [1] : vector<8x8xf32> to vector<8xf32>
    %147 = vector.shape_cast %146 : vector<8xf32> to vector<8x1xf32>
    %148 = tpu.reciprocal %147 {approx = true} : vector<8x1xf32> -> vector<8x1xf32>
    %149 = vector.broadcast %148 : vector<8x1xf32> to vector<8x8xf32>
    %150 = arith.mulf %145, %149 : vector<8x8xf32>
    %cst_55 = arith.constant dense<0.000000e+00> : vector<8x8xf32>
    %151 = tpu.matmul %150, %138, %cst_55 {dimension_numbers = #tpu.dot_dimension_numbers<[1], [0], [0], [1], [0, 0, 1, 1], [], []>} : vector<8x8xf32>, vector<8x8xf32>, vector<8x8xf32> -> vector<8x8xf32>
    %152 = vector.extract_strided_slice %36 {offsets = [8, 0], sizes = [8, 32], strides = [1, 1]} : vector<32x32xf32> to vector<8x32xf32>
    %cst_56 = arith.constant dense<0.000000e+00> : vector<8x32xf32>
    %153 = tpu.matmul %151, %152, %cst_56 {dimension_numbers = #tpu.dot_dimension_numbers<[1], [0], [0], [1], [0, 0, 1, 1], [], []>} : vector<8x8xf32>, vector<8x32xf32>, vector<8x32xf32> -> vector<8x32xf32>
    %154 = arith.addf %135, %153 : vector<8x32xf32>
    %155 = vector.extract_strided_slice %115 {offsets = [0, 16], sizes = [8, 8], strides = [1, 1]} : vector<8x96xf32> to vector<8x8xf32>
    %156 = vector.extract_strided_slice %115 {offsets = [0, 48], sizes = [8, 8], strides = [1, 1]} : vector<8x96xf32> to vector<8x8xf32>
    %157 = vector.extract_strided_slice %115 {offsets = [0, 80], sizes = [8, 8], strides = [1, 1]} : vector<8x96xf32> to vector<8x8xf32>
    %158 = tpu.transpose %156, [1, 0] : vector<8x8xf32> -> vector<8x8xf32>
    %cst_57 = arith.constant dense<0.000000e+00> : vector<8x8xf32>
    %159 = tpu.matmul %155, %158, %cst_57 {dimension_numbers = #tpu.dot_dimension_numbers<[1], [0], [0], [1], [0, 0, 1, 1], [], []>} : vector<8x8xf32>, vector<8x8xf32>, vector<8x8xf32> -> vector<8x8xf32>
    %cst_58 = arith.constant dense<0xFF800000> : vector<8xf32>
    %160 = vector.multi_reduction <maximumf>, %159, %cst_58 [1] : vector<8x8xf32> to vector<8xf32>
    %161 = vector.shape_cast %160 : vector<8xf32> to vector<8x1xf32>
    %162 = vector.broadcast %161 : vector<8x1xf32> to vector<8x8xf32>
    %163 = arith.subf %159, %162 : vector<8x8xf32>
    %164 = math.exp %163 : vector<8x8xf32>
    %cst_59 = arith.constant dense<0.000000e+00> : vector<8xf32>
    %165 = vector.multi_reduction <add>, %164, %cst_59 [1] : vector<8x8xf32> to vector<8xf32>
    %166 = vector.shape_cast %165 : vector<8xf32> to vector<8x1xf32>
    %167 = tpu.reciprocal %166 {approx = true} : vector<8x1xf32> -> vector<8x1xf32>
    %168 = vector.broadcast %167 : vector<8x1xf32> to vector<8x8xf32>
    %169 = arith.mulf %164, %168 : vector<8x8xf32>
    %cst_60 = arith.constant dense<0.000000e+00> : vector<8x8xf32>
    %170 = tpu.matmul %169, %157, %cst_60 {dimension_numbers = #tpu.dot_dimension_numbers<[1], [0], [0], [1], [0, 0, 1, 1], [], []>} : vector<8x8xf32>, vector<8x8xf32>, vector<8x8xf32> -> vector<8x8xf32>
    %171 = vector.extract_strided_slice %36 {offsets = [16, 0], sizes = [8, 32], strides = [1, 1]} : vector<32x32xf32> to vector<8x32xf32>
    %cst_61 = arith.constant dense<0.000000e+00> : vector<8x32xf32>
    %172 = tpu.matmul %170, %171, %cst_61 {dimension_numbers = #tpu.dot_dimension_numbers<[1], [0], [0], [1], [0, 0, 1, 1], [], []>} : vector<8x8xf32>, vector<8x32xf32>, vector<8x32xf32> -> vector<8x32xf32>
    %173 = arith.addf %154, %172 : vector<8x32xf32>
    %174 = vector.extract_strided_slice %115 {offsets = [0, 24], sizes = [8, 8], strides = [1, 1]} : vector<8x96xf32> to vector<8x8xf32>
    %175 = vector.extract_strided_slice %115 {offsets = [0, 56], sizes = [8, 8], strides = [1, 1]} : vector<8x96xf32> to vector<8x8xf32>
    %176 = vector.extract_strided_slice %115 {offsets = [0, 88], sizes = [8, 8], strides = [1, 1]} : vector<8x96xf32> to vector<8x8xf32>
    %177 = tpu.transpose %175, [1, 0] : vector<8x8xf32> -> vector<8x8xf32>
    %cst_62 = arith.constant dense<0.000000e+00> : vector<8x8xf32>
    %178 = tpu.matmul %174, %177, %cst_62 {dimension_numbers = #tpu.dot_dimension_numbers<[1], [0], [0], [1], [0, 0, 1, 1], [], []>} : vector<8x8xf32>, vector<8x8xf32>, vector<8x8xf32> -> vector<8x8xf32>
    %cst_63 = arith.constant dense<0xFF800000> : vector<8xf32>
    %179 = vector.multi_reduction <maximumf>, %178, %cst_63 [1] : vector<8x8xf32> to vector<8xf32>
    %180 = vector.shape_cast %179 : vector<8xf32> to vector<8x1xf32>
    %181 = vector.broadcast %180 : vector<8x1xf32> to vector<8x8xf32>
    %182 = arith.subf %178, %181 : vector<8x8xf32>
    %183 = math.exp %182 : vector<8x8xf32>
    %cst_64 = arith.constant dense<0.000000e+00> : vector<8xf32>
    %184 = vector.multi_reduction <add>, %183, %cst_64 [1] : vector<8x8xf32> to vector<8xf32>
    %185 = vector.shape_cast %184 : vector<8xf32> to vector<8x1xf32>
    %186 = tpu.reciprocal %185 {approx = true} : vector<8x1xf32> -> vector<8x1xf32>
    %187 = vector.broadcast %186 : vector<8x1xf32> to vector<8x8xf32>
    %188 = arith.mulf %183, %187 : vector<8x8xf32>
    %cst_65 = arith.constant dense<0.000000e+00> : vector<8x8xf32>
    %189 = tpu.matmul %188, %176, %cst_65 {dimension_numbers = #tpu.dot_dimension_numbers<[1], [0], [0], [1], [0, 0, 1, 1], [], []>} : vector<8x8xf32>, vector<8x8xf32>, vector<8x8xf32> -> vector<8x8xf32>
    %190 = vector.extract_strided_slice %36 {offsets = [24, 0], sizes = [8, 32], strides = [1, 1]} : vector<32x32xf32> to vector<8x32xf32>
    %cst_66 = arith.constant dense<0.000000e+00> : vector<8x32xf32>
    %191 = tpu.matmul %189, %190, %cst_66 {dimension_numbers = #tpu.dot_dimension_numbers<[1], [0], [0], [1], [0, 0, 1, 1], [], []>} : vector<8x8xf32>, vector<8x32xf32>, vector<8x32xf32> -> vector<8x32xf32>
    %192 = arith.addf %173, %191 : vector<8x32xf32>
    %193 = tpu.concatenate %114, %192 in 0 : vector<8x32xf32>, vector<8x32xf32> -> vector<16x32xf32>
    %c0_67 = arith.constant 0 : index
    %c0_68 = arith.constant 0 : index
    %c0_69 = arith.constant 0 : index
    %194 = vector.load %arg9[%c0_67, %c0_68, %c0_69] : memref<2x1x32xf32, #tpu.memory_space<vmem>>, vector<1x1x32xf32>
    %195 = vector.shape_cast %194 : vector<1x1x32xf32> to vector<1x32xf32>
    %196 = vector.broadcast %195 : vector<1x32xf32> to vector<16x32xf32>
    %197 = arith.addf %193, %196 : vector<16x32xf32>
    %198 = arith.addf %7, %197 : vector<16x32xf32>
    %c0_70 = arith.constant 0 : index
    %c0_71 = arith.constant 0 : index
    %c0_72 = arith.constant 0 : index
    %199 = vector.load %arg10[%c0_70, %c0_71, %c0_72] : memref<2x1x32xf32, #tpu.memory_space<vmem>>, vector<1x1x32xf32>
    %200 = vector.shape_cast %199 : vector<1x1x32xf32> to vector<1x32xf32>
    %c0_73 = arith.constant 0 : index
    %c0_74 = arith.constant 0 : index
    %c0_75 = arith.constant 0 : index
    %201 = vector.load %arg11[%c0_73, %c0_74, %c0_75] : memref<2x1x32xf32, #tpu.memory_space<vmem>>, vector<1x1x32xf32>
    %202 = vector.shape_cast %201 : vector<1x1x32xf32> to vector<1x32xf32>
    %cst_76 = arith.constant dense<0.000000e+00> : vector<16xf32>
    %203 = vector.multi_reduction <add>, %198, %cst_76 [1] : vector<16x32xf32> to vector<16xf32>
    %204 = vector.shape_cast %203 : vector<16xf32> to vector<16x1xf32>
    %cst_77 = arith.constant 3.200000e+01 : f32
    %205 = vector.broadcast %cst_77 : f32 to vector<16x1xf32>
    %206 = arith.divf %204, %205 : vector<16x1xf32>
    %207 = vector.broadcast %206 : vector<16x1xf32> to vector<16x32xf32>
    %208 = arith.subf %198, %207 : vector<16x32xf32>
    %209 = arith.mulf %208, %208 : vector<16x32xf32>
    %cst_78 = arith.constant dense<0.000000e+00> : vector<16xf32>
    %210 = vector.multi_reduction <add>, %209, %cst_78 [1] : vector<16x32xf32> to vector<16xf32>
    %211 = vector.shape_cast %210 : vector<16xf32> to vector<16x1xf32>
    %cst_79 = arith.constant 3.200000e+01 : f32
    %212 = vector.broadcast %cst_79 : f32 to vector<16x1xf32>
    %213 = arith.divf %211, %212 : vector<16x1xf32>
    %cst_80 = arith.constant 9.99999974E-6 : f32
    %214 = vector.broadcast %cst_80 : f32 to vector<16x1xf32>
    %215 = arith.addf %213, %214 : vector<16x1xf32>
    %216 = math.rsqrt %215 : vector<16x1xf32>
    %217 = vector.broadcast %216 : vector<16x1xf32> to vector<16x32xf32>
    %218 = arith.mulf %208, %217 : vector<16x32xf32>
    %219 = vector.broadcast %200 : vector<1x32xf32> to vector<16x32xf32>
    %220 = arith.mulf %218, %219 : vector<16x32xf32>
    %221 = vector.broadcast %202 : vector<1x32xf32> to vector<16x32xf32>
    %222 = arith.addf %220, %221 : vector<16x32xf32>
    %c0_81 = arith.constant 0 : index
    %c0_82 = arith.constant 0 : index
    %c0_83 = arith.constant 0 : index
    %223 = vector.load %arg12[%c0_81, %c0_82, %c0_83] : memref<2x32x128xf32, #tpu.memory_space<vmem>>, vector<1x32x128xf32>
    %224 = vector.shape_cast %223 : vector<1x32x128xf32> to vector<32x128xf32>
    %cst_84 = arith.constant dense<0.000000e+00> : vector<16x128xf32>
    %225 = tpu.matmul %222, %224, %cst_84 {dimension_numbers = #tpu.dot_dimension_numbers<[1], [0], [0], [1], [0, 0, 1, 1], [], []>} : vector<16x32xf32>, vector<32x128xf32>, vector<16x128xf32> -> vector<16x128xf32>
    %c0_85 = arith.constant 0 : index
    %c0_86 = arith.constant 0 : index
    %c0_87 = arith.constant 0 : index
    %226 = vector.load %arg13[%c0_85, %c0_86, %c0_87] : memref<2x1x128xf32, #tpu.memory_space<vmem>>, vector<1x1x128xf32>
    %227 = vector.shape_cast %226 : vector<1x1x128xf32> to vector<1x128xf32>
    %228 = vector.broadcast %227 : vector<1x128xf32> to vector<16x128xf32>
    %229 = arith.addf %225, %228 : vector<16x128xf32>
    %cst_88 = arith.constant 5.000000e-01 : f32
    %230 = vector.broadcast %cst_88 : f32 to vector<16x128xf32>
    %231 = arith.mulf %230, %229 : vector<16x128xf32>
    %cst_89 = arith.constant 0.707106769 : f32
    %232 = vector.broadcast %cst_89 : f32 to vector<16x128xf32>
    %233 = arith.mulf %229, %232 : vector<16x128xf32>
    %cst_90 = arith.constant -3.8325069 : f32
    %cst_91 = arith.constant 3.8325069 : f32
    %234 = vector.broadcast %cst_90 : f32 to vector<16x128xf32>
    %235 = arith.maximumf %234, %233 : vector<16x128xf32>
    %236 = vector.broadcast %cst_91 : f32 to vector<16x128xf32>
    %237 = arith.minimumf %236, %235 : vector<16x128xf32>
    %238 = arith.mulf %237, %237 : vector<16x128xf32>
    %cst_92 = arith.constant 2.29050653E-4 : f32
    %239 = vector.broadcast %cst_92 : f32 to vector<16x128xf32>
    %240 = arith.mulf %239, %238 : vector<16x128xf32>
    %cst_93 = arith.constant 0.00340829091 : f32
    %241 = vector.broadcast %cst_93 : f32 to vector<16x128xf32>
    %242 = arith.addf %240, %241 : vector<16x128xf32>
    %243 = arith.mulf %242, %238 : vector<16x128xf32>
    %cst_94 = arith.constant 0.0509556942 : f32
    %244 = vector.broadcast %cst_94 : f32 to vector<16x128xf32>
    %245 = arith.addf %243, %244 : vector<16x128xf32>
    %246 = arith.mulf %245, %238 : vector<16x128xf32>
    %cst_95 = arith.constant 0.185208321 : f32
    %247 = vector.broadcast %cst_95 : f32 to vector<16x128xf32>
    %248 = arith.addf %246, %247 : vector<16x128xf32>
    %249 = arith.mulf %248, %238 : vector<16x128xf32>
    %cst_96 = arith.constant 1.12837911 : f32
    %250 = vector.broadcast %cst_96 : f32 to vector<16x128xf32>
    %251 = arith.addf %249, %250 : vector<16x128xf32>
    %cst_97 = arith.constant -1.17916031E-7 : f32
    %252 = vector.broadcast %cst_97 : f32 to vector<16x128xf32>
    %253 = arith.mulf %252, %238 : vector<16x128xf32>
    %cst_98 = arith.constant 2.35479656E-5 : f32
    %254 = vector.broadcast %cst_98 : f32 to vector<16x128xf32>
    %255 = arith.addf %253, %254 : vector<16x128xf32>
    %256 = arith.mulf %255, %238 : vector<16x128xf32>
    %cst_99 = arith.constant 0.00101796258 : f32
    %257 = vector.broadcast %cst_99 : f32 to vector<16x128xf32>
    %258 = arith.addf %256, %257 : vector<16x128xf32>
    %259 = arith.mulf %258, %238 : vector<16x128xf32>
    %cst_100 = arith.constant 0.0140704699 : f32
    %260 = vector.broadcast %cst_100 : f32 to vector<16x128xf32>
    %261 = arith.addf %259, %260 : vector<16x128xf32>
    %262 = arith.mulf %261, %238 : vector<16x128xf32>
    %cst_101 = arith.constant 0.110985048 : f32
    %263 = vector.broadcast %cst_101 : f32 to vector<16x128xf32>
    %264 = arith.addf %262, %263 : vector<16x128xf32>
    %265 = arith.mulf %264, %238 : vector<16x128xf32>
    %cst_102 = arith.constant 0.497469246 : f32
    %266 = vector.broadcast %cst_102 : f32 to vector<16x128xf32>
    %267 = arith.addf %265, %266 : vector<16x128xf32>
    %268 = arith.mulf %267, %238 : vector<16x128xf32>
    %cst_103 = arith.constant 1.000000e+00 : f32
    %269 = vector.broadcast %cst_103 : f32 to vector<16x128xf32>
    %270 = arith.addf %268, %269 : vector<16x128xf32>
    %271 = arith.mulf %237, %251 : vector<16x128xf32>
    %272 = arith.divf %271, %270 : vector<16x128xf32>
    %cst_104 = arith.constant 1.000000e+00 : f32
    %273 = vector.broadcast %cst_104 : f32 to vector<16x128xf32>
    %274 = arith.addf %273, %272 : vector<16x128xf32>
    %275 = arith.mulf %231, %274 : vector<16x128xf32>
    %c0_105 = arith.constant 0 : index
    %c0_106 = arith.constant 0 : index
    %c0_107 = arith.constant 0 : index
    %276 = vector.load %arg14[%c0_105, %c0_106, %c0_107] : memref<2x128x32xf32, #tpu.memory_space<vmem>>, vector<1x128x32xf32>
    %277 = vector.shape_cast %276 : vector<1x128x32xf32> to vector<128x32xf32>
    %cst_108 = arith.constant dense<0.000000e+00> : vector<16x32xf32>
    %278 = tpu.matmul %275, %277, %cst_108 {dimension_numbers = #tpu.dot_dimension_numbers<[1], [0], [0], [1], [0, 0, 1, 1], [], []>} : vector<16x128xf32>, vector<128x32xf32>, vector<16x32xf32> -> vector<16x32xf32>
    %c0_109 = arith.constant 0 : index
    %c0_110 = arith.constant 0 : index
    %c0_111 = arith.constant 0 : index
    %279 = vector.load %arg15[%c0_109, %c0_110, %c0_111] : memref<2x1x32xf32, #tpu.memory_space<vmem>>, vector<1x1x32xf32>
    %280 = vector.shape_cast %279 : vector<1x1x32xf32> to vector<1x32xf32>
    %281 = vector.broadcast %280 : vector<1x32xf32> to vector<16x32xf32>
    %282 = arith.addf %278, %281 : vector<16x32xf32>
    %283 = arith.addf %198, %282 : vector<16x32xf32>
    %c1 = arith.constant 1 : index
    %c0_112 = arith.constant 0 : index
    %c0_113 = arith.constant 0 : index
    %284 = vector.load %arg5[%c1, %c0_112, %c0_113] : memref<2x1x32xf32, #tpu.memory_space<vmem>>, vector<1x1x32xf32>
    %285 = vector.shape_cast %284 : vector<1x1x32xf32> to vector<1x32xf32>
    %c1_114 = arith.constant 1 : index
    %c0_115 = arith.constant 0 : index
    %c0_116 = arith.constant 0 : index
    %286 = vector.load %arg6[%c1_114, %c0_115, %c0_116] : memref<2x1x32xf32, #tpu.memory_space<vmem>>, vector<1x1x32xf32>
    %287 = vector.shape_cast %286 : vector<1x1x32xf32> to vector<1x32xf32>
    %cst_117 = arith.constant dense<0.000000e+00> : vector<16xf32>
    %288 = vector.multi_reduction <add>, %283, %cst_117 [1] : vector<16x32xf32> to vector<16xf32>
    %289 = vector.shape_cast %288 : vector<16xf32> to vector<16x1xf32>
    %cst_118 = arith.constant 3.200000e+01 : f32
    %290 = vector.broadcast %cst_118 : f32 to vector<16x1xf32>
    %291 = arith.divf %289, %290 : vector<16x1xf32>
    %292 = vector.broadcast %291 : vector<16x1xf32> to vector<16x32xf32>
    %293 = arith.subf %283, %292 : vector<16x32xf32>
    %294 = arith.mulf %293, %293 : vector<16x32xf32>
    %cst_119 = arith.constant dense<0.000000e+00> : vector<16xf32>
    %295 = vector.multi_reduction <add>, %294, %cst_119 [1] : vector<16x32xf32> to vector<16xf32>
    %296 = vector.shape_cast %295 : vector<16xf32> to vector<16x1xf32>
    %cst_120 = arith.constant 3.200000e+01 : f32
    %297 = vector.broadcast %cst_120 : f32 to vector<16x1xf32>
    %298 = arith.divf %296, %297 : vector<16x1xf32>
    %cst_121 = arith.constant 9.99999974E-6 : f32
    %299 = vector.broadcast %cst_121 : f32 to vector<16x1xf32>
    %300 = arith.addf %298, %299 : vector<16x1xf32>
    %301 = math.rsqrt %300 : vector<16x1xf32>
    %302 = vector.broadcast %301 : vector<16x1xf32> to vector<16x32xf32>
    %303 = arith.mulf %293, %302 : vector<16x32xf32>
    %304 = vector.broadcast %285 : vector<1x32xf32> to vector<16x32xf32>
    %305 = arith.mulf %303, %304 : vector<16x32xf32>
    %306 = vector.broadcast %287 : vector<1x32xf32> to vector<16x32xf32>
    %307 = arith.addf %305, %306 : vector<16x32xf32>
    %c1_122 = arith.constant 1 : index
    %c0_123 = arith.constant 0 : index
    %c0_124 = arith.constant 0 : index
    %308 = vector.load %arg7[%c1_122, %c0_123, %c0_124] : memref<2x32x96xf32, #tpu.memory_space<vmem>>, vector<1x32x96xf32>
    %309 = vector.shape_cast %308 : vector<1x32x96xf32> to vector<32x96xf32>
    %cst_125 = arith.constant dense<0.000000e+00> : vector<16x96xf32>
    %310 = tpu.matmul %307, %309, %cst_125 {dimension_numbers = #tpu.dot_dimension_numbers<[1], [0], [0], [1], [0, 0, 1, 1], [], []>} : vector<16x32xf32>, vector<32x96xf32>, vector<16x96xf32> -> vector<16x96xf32>
    %c1_126 = arith.constant 1 : index
    %c0_127 = arith.constant 0 : index
    %c0_128 = arith.constant 0 : index
    %311 = vector.load %arg8[%c1_126, %c0_127, %c0_128] : memref<2x32x32xf32, #tpu.memory_space<vmem>>, vector<1x32x32xf32>
    %312 = vector.shape_cast %311 : vector<1x32x32xf32> to vector<32x32xf32>
    %313 = vector.extract_strided_slice %310 {offsets = [0, 0], sizes = [8, 96], strides = [1, 1]} : vector<16x96xf32> to vector<8x96xf32>
    %cst_129 = arith.constant 0.000000e+00 : f32
    %314 = vector.broadcast %cst_129 : f32 to vector<8x32xf32>
    %315 = vector.extract_strided_slice %313 {offsets = [0, 0], sizes = [8, 8], strides = [1, 1]} : vector<8x96xf32> to vector<8x8xf32>
    %316 = vector.extract_strided_slice %313 {offsets = [0, 32], sizes = [8, 8], strides = [1, 1]} : vector<8x96xf32> to vector<8x8xf32>
    %317 = vector.extract_strided_slice %313 {offsets = [0, 64], sizes = [8, 8], strides = [1, 1]} : vector<8x96xf32> to vector<8x8xf32>
    %318 = tpu.transpose %316, [1, 0] : vector<8x8xf32> -> vector<8x8xf32>
    %cst_130 = arith.constant dense<0.000000e+00> : vector<8x8xf32>
    %319 = tpu.matmul %315, %318, %cst_130 {dimension_numbers = #tpu.dot_dimension_numbers<[1], [0], [0], [1], [0, 0, 1, 1], [], []>} : vector<8x8xf32>, vector<8x8xf32>, vector<8x8xf32> -> vector<8x8xf32>
    %cst_131 = arith.constant dense<0xFF800000> : vector<8xf32>
    %320 = vector.multi_reduction <maximumf>, %319, %cst_131 [1] : vector<8x8xf32> to vector<8xf32>
    %321 = vector.shape_cast %320 : vector<8xf32> to vector<8x1xf32>
    %322 = vector.broadcast %321 : vector<8x1xf32> to vector<8x8xf32>
    %323 = arith.subf %319, %322 : vector<8x8xf32>
    %324 = math.exp %323 : vector<8x8xf32>
    %cst_132 = arith.constant dense<0.000000e+00> : vector<8xf32>
    %325 = vector.multi_reduction <add>, %324, %cst_132 [1] : vector<8x8xf32> to vector<8xf32>
    %326 = vector.shape_cast %325 : vector<8xf32> to vector<8x1xf32>
    %327 = tpu.reciprocal %326 {approx = true} : vector<8x1xf32> -> vector<8x1xf32>
    %328 = vector.broadcast %327 : vector<8x1xf32> to vector<8x8xf32>
    %329 = arith.mulf %324, %328 : vector<8x8xf32>
    %cst_133 = arith.constant dense<0.000000e+00> : vector<8x8xf32>
    %330 = tpu.matmul %329, %317, %cst_133 {dimension_numbers = #tpu.dot_dimension_numbers<[1], [0], [0], [1], [0, 0, 1, 1], [], []>} : vector<8x8xf32>, vector<8x8xf32>, vector<8x8xf32> -> vector<8x8xf32>
    %331 = vector.extract_strided_slice %312 {offsets = [0, 0], sizes = [8, 32], strides = [1, 1]} : vector<32x32xf32> to vector<8x32xf32>
    %cst_134 = arith.constant dense<0.000000e+00> : vector<8x32xf32>
    %332 = tpu.matmul %330, %331, %cst_134 {dimension_numbers = #tpu.dot_dimension_numbers<[1], [0], [0], [1], [0, 0, 1, 1], [], []>} : vector<8x8xf32>, vector<8x32xf32>, vector<8x32xf32> -> vector<8x32xf32>
    %333 = arith.addf %314, %332 : vector<8x32xf32>
    %334 = vector.extract_strided_slice %313 {offsets = [0, 8], sizes = [8, 8], strides = [1, 1]} : vector<8x96xf32> to vector<8x8xf32>
    %335 = vector.extract_strided_slice %313 {offsets = [0, 40], sizes = [8, 8], strides = [1, 1]} : vector<8x96xf32> to vector<8x8xf32>
    %336 = vector.extract_strided_slice %313 {offsets = [0, 72], sizes = [8, 8], strides = [1, 1]} : vector<8x96xf32> to vector<8x8xf32>
    %337 = tpu.transpose %335, [1, 0] : vector<8x8xf32> -> vector<8x8xf32>
    %cst_135 = arith.constant dense<0.000000e+00> : vector<8x8xf32>
    %338 = tpu.matmul %334, %337, %cst_135 {dimension_numbers = #tpu.dot_dimension_numbers<[1], [0], [0], [1], [0, 0, 1, 1], [], []>} : vector<8x8xf32>, vector<8x8xf32>, vector<8x8xf32> -> vector<8x8xf32>
    %cst_136 = arith.constant dense<0xFF800000> : vector<8xf32>
    %339 = vector.multi_reduction <maximumf>, %338, %cst_136 [1] : vector<8x8xf32> to vector<8xf32>
    %340 = vector.shape_cast %339 : vector<8xf32> to vector<8x1xf32>
    %341 = vector.broadcast %340 : vector<8x1xf32> to vector<8x8xf32>
    %342 = arith.subf %338, %341 : vector<8x8xf32>
    %343 = math.exp %342 : vector<8x8xf32>
    %cst_137 = arith.constant dense<0.000000e+00> : vector<8xf32>
    %344 = vector.multi_reduction <add>, %343, %cst_137 [1] : vector<8x8xf32> to vector<8xf32>
    %345 = vector.shape_cast %344 : vector<8xf32> to vector<8x1xf32>
    %346 = tpu.reciprocal %345 {approx = true} : vector<8x1xf32> -> vector<8x1xf32>
    %347 = vector.broadcast %346 : vector<8x1xf32> to vector<8x8xf32>
    %348 = arith.mulf %343, %347 : vector<8x8xf32>
    %cst_138 = arith.constant dense<0.000000e+00> : vector<8x8xf32>
    %349 = tpu.matmul %348, %336, %cst_138 {dimension_numbers = #tpu.dot_dimension_numbers<[1], [0], [0], [1], [0, 0, 1, 1], [], []>} : vector<8x8xf32>, vector<8x8xf32>, vector<8x8xf32> -> vector<8x8xf32>
    %350 = vector.extract_strided_slice %312 {offsets = [8, 0], sizes = [8, 32], strides = [1, 1]} : vector<32x32xf32> to vector<8x32xf32>
    %cst_139 = arith.constant dense<0.000000e+00> : vector<8x32xf32>
    %351 = tpu.matmul %349, %350, %cst_139 {dimension_numbers = #tpu.dot_dimension_numbers<[1], [0], [0], [1], [0, 0, 1, 1], [], []>} : vector<8x8xf32>, vector<8x32xf32>, vector<8x32xf32> -> vector<8x32xf32>
    %352 = arith.addf %333, %351 : vector<8x32xf32>
    %353 = vector.extract_strided_slice %313 {offsets = [0, 16], sizes = [8, 8], strides = [1, 1]} : vector<8x96xf32> to vector<8x8xf32>
    %354 = vector.extract_strided_slice %313 {offsets = [0, 48], sizes = [8, 8], strides = [1, 1]} : vector<8x96xf32> to vector<8x8xf32>
    %355 = vector.extract_strided_slice %313 {offsets = [0, 80], sizes = [8, 8], strides = [1, 1]} : vector<8x96xf32> to vector<8x8xf32>
    %356 = tpu.transpose %354, [1, 0] : vector<8x8xf32> -> vector<8x8xf32>
    %cst_140 = arith.constant dense<0.000000e+00> : vector<8x8xf32>
    %357 = tpu.matmul %353, %356, %cst_140 {dimension_numbers = #tpu.dot_dimension_numbers<[1], [0], [0], [1], [0, 0, 1, 1], [], []>} : vector<8x8xf32>, vector<8x8xf32>, vector<8x8xf32> -> vector<8x8xf32>
    %cst_141 = arith.constant dense<0xFF800000> : vector<8xf32>
    %358 = vector.multi_reduction <maximumf>, %357, %cst_141 [1] : vector<8x8xf32> to vector<8xf32>
    %359 = vector.shape_cast %358 : vector<8xf32> to vector<8x1xf32>
    %360 = vector.broadcast %359 : vector<8x1xf32> to vector<8x8xf32>
    %361 = arith.subf %357, %360 : vector<8x8xf32>
    %362 = math.exp %361 : vector<8x8xf32>
    %cst_142 = arith.constant dense<0.000000e+00> : vector<8xf32>
    %363 = vector.multi_reduction <add>, %362, %cst_142 [1] : vector<8x8xf32> to vector<8xf32>
    %364 = vector.shape_cast %363 : vector<8xf32> to vector<8x1xf32>
    %365 = tpu.reciprocal %364 {approx = true} : vector<8x1xf32> -> vector<8x1xf32>
    %366 = vector.broadcast %365 : vector<8x1xf32> to vector<8x8xf32>
    %367 = arith.mulf %362, %366 : vector<8x8xf32>
    %cst_143 = arith.constant dense<0.000000e+00> : vector<8x8xf32>
    %368 = tpu.matmul %367, %355, %cst_143 {dimension_numbers = #tpu.dot_dimension_numbers<[1], [0], [0], [1], [0, 0, 1, 1], [], []>} : vector<8x8xf32>, vector<8x8xf32>, vector<8x8xf32> -> vector<8x8xf32>
    %369 = vector.extract_strided_slice %312 {offsets = [16, 0], sizes = [8, 32], strides = [1, 1]} : vector<32x32xf32> to vector<8x32xf32>
    %cst_144 = arith.constant dense<0.000000e+00> : vector<8x32xf32>
    %370 = tpu.matmul %368, %369, %cst_144 {dimension_numbers = #tpu.dot_dimension_numbers<[1], [0], [0], [1], [0, 0, 1, 1], [], []>} : vector<8x8xf32>, vector<8x32xf32>, vector<8x32xf32> -> vector<8x32xf32>
    %371 = arith.addf %352, %370 : vector<8x32xf32>
    %372 = vector.extract_strided_slice %313 {offsets = [0, 24], sizes = [8, 8], strides = [1, 1]} : vector<8x96xf32> to vector<8x8xf32>
    %373 = vector.extract_strided_slice %313 {offsets = [0, 56], sizes = [8, 8], strides = [1, 1]} : vector<8x96xf32> to vector<8x8xf32>
    %374 = vector.extract_strided_slice %313 {offsets = [0, 88], sizes = [8, 8], strides = [1, 1]} : vector<8x96xf32> to vector<8x8xf32>
    %375 = tpu.transpose %373, [1, 0] : vector<8x8xf32> -> vector<8x8xf32>
    %cst_145 = arith.constant dense<0.000000e+00> : vector<8x8xf32>
    %376 = tpu.matmul %372, %375, %cst_145 {dimension_numbers = #tpu.dot_dimension_numbers<[1], [0], [0], [1], [0, 0, 1, 1], [], []>} : vector<8x8xf32>, vector<8x8xf32>, vector<8x8xf32> -> vector<8x8xf32>
    %cst_146 = arith.constant dense<0xFF800000> : vector<8xf32>
    %377 = vector.multi_reduction <maximumf>, %376, %cst_146 [1] : vector<8x8xf32> to vector<8xf32>
    %378 = vector.shape_cast %377 : vector<8xf32> to vector<8x1xf32>
    %379 = vector.broadcast %378 : vector<8x1xf32> to vector<8x8xf32>
    %380 = arith.subf %376, %379 : vector<8x8xf32>
    %381 = math.exp %380 : vector<8x8xf32>
    %cst_147 = arith.constant dense<0.000000e+00> : vector<8xf32>
    %382 = vector.multi_reduction <add>, %381, %cst_147 [1] : vector<8x8xf32> to vector<8xf32>
    %383 = vector.shape_cast %382 : vector<8xf32> to vector<8x1xf32>
    %384 = tpu.reciprocal %383 {approx = true} : vector<8x1xf32> -> vector<8x1xf32>
    %385 = vector.broadcast %384 : vector<8x1xf32> to vector<8x8xf32>
    %386 = arith.mulf %381, %385 : vector<8x8xf32>
    %cst_148 = arith.constant dense<0.000000e+00> : vector<8x8xf32>
    %387 = tpu.matmul %386, %374, %cst_148 {dimension_numbers = #tpu.dot_dimension_numbers<[1], [0], [0], [1], [0, 0, 1, 1], [], []>} : vector<8x8xf32>, vector<8x8xf32>, vector<8x8xf32> -> vector<8x8xf32>
    %388 = vector.extract_strided_slice %312 {offsets = [24, 0], sizes = [8, 32], strides = [1, 1]} : vector<32x32xf32> to vector<8x32xf32>
    %cst_149 = arith.constant dense<0.000000e+00> : vector<8x32xf32>
    %389 = tpu.matmul %387, %388, %cst_149 {dimension_numbers = #tpu.dot_dimension_numbers<[1], [0], [0], [1], [0, 0, 1, 1], [], []>} : vector<8x8xf32>, vector<8x32xf32>, vector<8x32xf32> -> vector<8x32xf32>
    %390 = arith.addf %371, %389 : vector<8x32xf32>
    %391 = vector.extract_strided_slice %310 {offsets = [8, 0], sizes = [8, 96], strides = [1, 1]} : vector<16x96xf32> to vector<8x96xf32>
    %cst_150 = arith.constant 0.000000e+00 : f32
    %392 = vector.broadcast %cst_150 : f32 to vector<8x32xf32>
    %393 = vector.extract_strided_slice %391 {offsets = [0, 0], sizes = [8, 8], strides = [1, 1]} : vector<8x96xf32> to vector<8x8xf32>
    %394 = vector.extract_strided_slice %391 {offsets = [0, 32], sizes = [8, 8], strides = [1, 1]} : vector<8x96xf32> to vector<8x8xf32>
    %395 = vector.extract_strided_slice %391 {offsets = [0, 64], sizes = [8, 8], strides = [1, 1]} : vector<8x96xf32> to vector<8x8xf32>
    %396 = tpu.transpose %394, [1, 0] : vector<8x8xf32> -> vector<8x8xf32>
    %cst_151 = arith.constant dense<0.000000e+00> : vector<8x8xf32>
    %397 = tpu.matmul %393, %396, %cst_151 {dimension_numbers = #tpu.dot_dimension_numbers<[1], [0], [0], [1], [0, 0, 1, 1], [], []>} : vector<8x8xf32>, vector<8x8xf32>, vector<8x8xf32> -> vector<8x8xf32>
    %cst_152 = arith.constant dense<0xFF800000> : vector<8xf32>
    %398 = vector.multi_reduction <maximumf>, %397, %cst_152 [1] : vector<8x8xf32> to vector<8xf32>
    %399 = vector.shape_cast %398 : vector<8xf32> to vector<8x1xf32>
    %400 = vector.broadcast %399 : vector<8x1xf32> to vector<8x8xf32>
    %401 = arith.subf %397, %400 : vector<8x8xf32>
    %402 = math.exp %401 : vector<8x8xf32>
    %cst_153 = arith.constant dense<0.000000e+00> : vector<8xf32>
    %403 = vector.multi_reduction <add>, %402, %cst_153 [1] : vector<8x8xf32> to vector<8xf32>
    %404 = vector.shape_cast %403 : vector<8xf32> to vector<8x1xf32>
    %405 = tpu.reciprocal %404 {approx = true} : vector<8x1xf32> -> vector<8x1xf32>
    %406 = vector.broadcast %405 : vector<8x1xf32> to vector<8x8xf32>
    %407 = arith.mulf %402, %406 : vector<8x8xf32>
    %cst_154 = arith.constant dense<0.000000e+00> : vector<8x8xf32>
    %408 = tpu.matmul %407, %395, %cst_154 {dimension_numbers = #tpu.dot_dimension_numbers<[1], [0], [0], [1], [0, 0, 1, 1], [], []>} : vector<8x8xf32>, vector<8x8xf32>, vector<8x8xf32> -> vector<8x8xf32>
    %409 = vector.extract_strided_slice %312 {offsets = [0, 0], sizes = [8, 32], strides = [1, 1]} : vector<32x32xf32> to vector<8x32xf32>
    %cst_155 = arith.constant dense<0.000000e+00> : vector<8x32xf32>
    %410 = tpu.matmul %408, %409, %cst_155 {dimension_numbers = #tpu.dot_dimension_numbers<[1], [0], [0], [1], [0, 0, 1, 1], [], []>} : vector<8x8xf32>, vector<8x32xf32>, vector<8x32xf32> -> vector<8x32xf32>
    %411 = arith.addf %392, %410 : vector<8x32xf32>
    %412 = vector.extract_strided_slice %391 {offsets = [0, 8], sizes = [8, 8], strides = [1, 1]} : vector<8x96xf32> to vector<8x8xf32>
    %413 = vector.extract_strided_slice %391 {offsets = [0, 40], sizes = [8, 8], strides = [1, 1]} : vector<8x96xf32> to vector<8x8xf32>
    %414 = vector.extract_strided_slice %391 {offsets = [0, 72], sizes = [8, 8], strides = [1, 1]} : vector<8x96xf32> to vector<8x8xf32>
    %415 = tpu.transpose %413, [1, 0] : vector<8x8xf32> -> vector<8x8xf32>
    %cst_156 = arith.constant dense<0.000000e+00> : vector<8x8xf32>
    %416 = tpu.matmul %412, %415, %cst_156 {dimension_numbers = #tpu.dot_dimension_numbers<[1], [0], [0], [1], [0, 0, 1, 1], [], []>} : vector<8x8xf32>, vector<8x8xf32>, vector<8x8xf32> -> vector<8x8xf32>
    %cst_157 = arith.constant dense<0xFF800000> : vector<8xf32>
    %417 = vector.multi_reduction <maximumf>, %416, %cst_157 [1] : vector<8x8xf32> to vector<8xf32>
    %418 = vector.shape_cast %417 : vector<8xf32> to vector<8x1xf32>
    %419 = vector.broadcast %418 : vector<8x1xf32> to vector<8x8xf32>
    %420 = arith.subf %416, %419 : vector<8x8xf32>
    %421 = math.exp %420 : vector<8x8xf32>
    %cst_158 = arith.constant dense<0.000000e+00> : vector<8xf32>
    %422 = vector.multi_reduction <add>, %421, %cst_158 [1] : vector<8x8xf32> to vector<8xf32>
    %423 = vector.shape_cast %422 : vector<8xf32> to vector<8x1xf32>
    %424 = tpu.reciprocal %423 {approx = true} : vector<8x1xf32> -> vector<8x1xf32>
    %425 = vector.broadcast %424 : vector<8x1xf32> to vector<8x8xf32>
    %426 = arith.mulf %421, %425 : vector<8x8xf32>
    %cst_159 = arith.constant dense<0.000000e+00> : vector<8x8xf32>
    %427 = tpu.matmul %426, %414, %cst_159 {dimension_numbers = #tpu.dot_dimension_numbers<[1], [0], [0], [1], [0, 0, 1, 1], [], []>} : vector<8x8xf32>, vector<8x8xf32>, vector<8x8xf32> -> vector<8x8xf32>
    %428 = vector.extract_strided_slice %312 {offsets = [8, 0], sizes = [8, 32], strides = [1, 1]} : vector<32x32xf32> to vector<8x32xf32>
    %cst_160 = arith.constant dense<0.000000e+00> : vector<8x32xf32>
    %429 = tpu.matmul %427, %428, %cst_160 {dimension_numbers = #tpu.dot_dimension_numbers<[1], [0], [0], [1], [0, 0, 1, 1], [], []>} : vector<8x8xf32>, vector<8x32xf32>, vector<8x32xf32> -> vector<8x32xf32>
    %430 = arith.addf %411, %429 : vector<8x32xf32>
    %431 = vector.extract_strided_slice %391 {offsets = [0, 16], sizes = [8, 8], strides = [1, 1]} : vector<8x96xf32> to vector<8x8xf32>
    %432 = vector.extract_strided_slice %391 {offsets = [0, 48], sizes = [8, 8], strides = [1, 1]} : vector<8x96xf32> to vector<8x8xf32>
    %433 = vector.extract_strided_slice %391 {offsets = [0, 80], sizes = [8, 8], strides = [1, 1]} : vector<8x96xf32> to vector<8x8xf32>
    %434 = tpu.transpose %432, [1, 0] : vector<8x8xf32> -> vector<8x8xf32>
    %cst_161 = arith.constant dense<0.000000e+00> : vector<8x8xf32>
    %435 = tpu.matmul %431, %434, %cst_161 {dimension_numbers = #tpu.dot_dimension_numbers<[1], [0], [0], [1], [0, 0, 1, 1], [], []>} : vector<8x8xf32>, vector<8x8xf32>, vector<8x8xf32> -> vector<8x8xf32>
    %cst_162 = arith.constant dense<0xFF800000> : vector<8xf32>
    %436 = vector.multi_reduction <maximumf>, %435, %cst_162 [1] : vector<8x8xf32> to vector<8xf32>
    %437 = vector.shape_cast %436 : vector<8xf32> to vector<8x1xf32>
    %438 = vector.broadcast %437 : vector<8x1xf32> to vector<8x8xf32>
    %439 = arith.subf %435, %438 : vector<8x8xf32>
    %440 = math.exp %439 : vector<8x8xf32>
    %cst_163 = arith.constant dense<0.000000e+00> : vector<8xf32>
    %441 = vector.multi_reduction <add>, %440, %cst_163 [1] : vector<8x8xf32> to vector<8xf32>
    %442 = vector.shape_cast %441 : vector<8xf32> to vector<8x1xf32>
    %443 = tpu.reciprocal %442 {approx = true} : vector<8x1xf32> -> vector<8x1xf32>
    %444 = vector.broadcast %443 : vector<8x1xf32> to vector<8x8xf32>
    %445 = arith.mulf %440, %444 : vector<8x8xf32>
    %cst_164 = arith.constant dense<0.000000e+00> : vector<8x8xf32>
    %446 = tpu.matmul %445, %433, %cst_164 {dimension_numbers = #tpu.dot_dimension_numbers<[1], [0], [0], [1], [0, 0, 1, 1], [], []>} : vector<8x8xf32>, vector<8x8xf32>, vector<8x8xf32> -> vector<8x8xf32>
    %447 = vector.extract_strided_slice %312 {offsets = [16, 0], sizes = [8, 32], strides = [1, 1]} : vector<32x32xf32> to vector<8x32xf32>
    %cst_165 = arith.constant dense<0.000000e+00> : vector<8x32xf32>
    %448 = tpu.matmul %446, %447, %cst_165 {dimension_numbers = #tpu.dot_dimension_numbers<[1], [0], [0], [1], [0, 0, 1, 1], [], []>} : vector<8x8xf32>, vector<8x32xf32>, vector<8x32xf32> -> vector<8x32xf32>
    %449 = arith.addf %430, %448 : vector<8x32xf32>
    %450 = vector.extract_strided_slice %391 {offsets = [0, 24], sizes = [8, 8], strides = [1, 1]} : vector<8x96xf32> to vector<8x8xf32>
    %451 = vector.extract_strided_slice %391 {offsets = [0, 56], sizes = [8, 8], strides = [1, 1]} : vector<8x96xf32> to vector<8x8xf32>
    %452 = vector.extract_strided_slice %391 {offsets = [0, 88], sizes = [8, 8], strides = [1, 1]} : vector<8x96xf32> to vector<8x8xf32>
    %453 = tpu.transpose %451, [1, 0] : vector<8x8xf32> -> vector<8x8xf32>
    %cst_166 = arith.constant dense<0.000000e+00> : vector<8x8xf32>
    %454 = tpu.matmul %450, %453, %cst_166 {dimension_numbers = #tpu.dot_dimension_numbers<[1], [0], [0], [1], [0, 0, 1, 1], [], []>} : vector<8x8xf32>, vector<8x8xf32>, vector<8x8xf32> -> vector<8x8xf32>
    %cst_167 = arith.constant dense<0xFF800000> : vector<8xf32>
    %455 = vector.multi_reduction <maximumf>, %454, %cst_167 [1] : vector<8x8xf32> to vector<8xf32>
    %456 = vector.shape_cast %455 : vector<8xf32> to vector<8x1xf32>
    %457 = vector.broadcast %456 : vector<8x1xf32> to vector<8x8xf32>
    %458 = arith.subf %454, %457 : vector<8x8xf32>
    %459 = math.exp %458 : vector<8x8xf32>
    %cst_168 = arith.constant dense<0.000000e+00> : vector<8xf32>
    %460 = vector.multi_reduction <add>, %459, %cst_168 [1] : vector<8x8xf32> to vector<8xf32>
    %461 = vector.shape_cast %460 : vector<8xf32> to vector<8x1xf32>
    %462 = tpu.reciprocal %461 {approx = true} : vector<8x1xf32> -> vector<8x1xf32>
    %463 = vector.broadcast %462 : vector<8x1xf32> to vector<8x8xf32>
    %464 = arith.mulf %459, %463 : vector<8x8xf32>
    %cst_169 = arith.constant dense<0.000000e+00> : vector<8x8xf32>
    %465 = tpu.matmul %464, %452, %cst_169 {dimension_numbers = #tpu.dot_dimension_numbers<[1], [0], [0], [1], [0, 0, 1, 1], [], []>} : vector<8x8xf32>, vector<8x8xf32>, vector<8x8xf32> -> vector<8x8xf32>
    %466 = vector.extract_strided_slice %312 {offsets = [24, 0], sizes = [8, 32], strides = [1, 1]} : vector<32x32xf32> to vector<8x32xf32>
    %cst_170 = arith.constant dense<0.000000e+00> : vector<8x32xf32>
    %467 = tpu.matmul %465, %466, %cst_170 {dimension_numbers = #tpu.dot_dimension_numbers<[1], [0], [0], [1], [0, 0, 1, 1], [], []>} : vector<8x8xf32>, vector<8x32xf32>, vector<8x32xf32> -> vector<8x32xf32>
    %468 = arith.addf %449, %467 : vector<8x32xf32>
    %469 = tpu.concatenate %390, %468 in 0 : vector<8x32xf32>, vector<8x32xf32> -> vector<16x32xf32>
    %c1_171 = arith.constant 1 : index
    %c0_172 = arith.constant 0 : index
    %c0_173 = arith.constant 0 : index
    %470 = vector.load %arg9[%c1_171, %c0_172, %c0_173] : memref<2x1x32xf32, #tpu.memory_space<vmem>>, vector<1x1x32xf32>
    %471 = vector.shape_cast %470 : vector<1x1x32xf32> to vector<1x32xf32>
    %472 = vector.broadcast %471 : vector<1x32xf32> to vector<16x32xf32>
    %473 = arith.addf %469, %472 : vector<16x32xf32>
    %474 = arith.addf %283, %473 : vector<16x32xf32>
    %c1_174 = arith.constant 1 : index
    %c0_175 = arith.constant 0 : index
    %c0_176 = arith.constant 0 : index
    %475 = vector.load %arg10[%c1_174, %c0_175, %c0_176] : memref<2x1x32xf32, #tpu.memory_space<vmem>>, vector<1x1x32xf32>
    %476 = vector.shape_cast %475 : vector<1x1x32xf32> to vector<1x32xf32>
    %c1_177 = arith.constant 1 : index
    %c0_178 = arith.constant 0 : index
    %c0_179 = arith.constant 0 : index
    %477 = vector.load %arg11[%c1_177, %c0_178, %c0_179] : memref<2x1x32xf32, #tpu.memory_space<vmem>>, vector<1x1x32xf32>
    %478 = vector.shape_cast %477 : vector<1x1x32xf32> to vector<1x32xf32>
    %cst_180 = arith.constant dense<0.000000e+00> : vector<16xf32>
    %479 = vector.multi_reduction <add>, %474, %cst_180 [1] : vector<16x32xf32> to vector<16xf32>
    %480 = vector.shape_cast %479 : vector<16xf32> to vector<16x1xf32>
    %cst_181 = arith.constant 3.200000e+01 : f32
    %481 = vector.broadcast %cst_181 : f32 to vector<16x1xf32>
    %482 = arith.divf %480, %481 : vector<16x1xf32>
    %483 = vector.broadcast %482 : vector<16x1xf32> to vector<16x32xf32>
    %484 = arith.subf %474, %483 : vector<16x32xf32>
    %485 = arith.mulf %484, %484 : vector<16x32xf32>
    %cst_182 = arith.constant dense<0.000000e+00> : vector<16xf32>
    %486 = vector.multi_reduction <add>, %485, %cst_182 [1] : vector<16x32xf32> to vector<16xf32>
    %487 = vector.shape_cast %486 : vector<16xf32> to vector<16x1xf32>
    %cst_183 = arith.constant 3.200000e+01 : f32
    %488 = vector.broadcast %cst_183 : f32 to vector<16x1xf32>
    %489 = arith.divf %487, %488 : vector<16x1xf32>
    %cst_184 = arith.constant 9.99999974E-6 : f32
    %490 = vector.broadcast %cst_184 : f32 to vector<16x1xf32>
    %491 = arith.addf %489, %490 : vector<16x1xf32>
    %492 = math.rsqrt %491 : vector<16x1xf32>
    %493 = vector.broadcast %492 : vector<16x1xf32> to vector<16x32xf32>
    %494 = arith.mulf %484, %493 : vector<16x32xf32>
    %495 = vector.broadcast %476 : vector<1x32xf32> to vector<16x32xf32>
    %496 = arith.mulf %494, %495 : vector<16x32xf32>
    %497 = vector.broadcast %478 : vector<1x32xf32> to vector<16x32xf32>
    %498 = arith.addf %496, %497 : vector<16x32xf32>
    %c1_185 = arith.constant 1 : index
    %c0_186 = arith.constant 0 : index
    %c0_187 = arith.constant 0 : index
    %499 = vector.load %arg12[%c1_185, %c0_186, %c0_187] : memref<2x32x128xf32, #tpu.memory_space<vmem>>, vector<1x32x128xf32>
    %500 = vector.shape_cast %499 : vector<1x32x128xf32> to vector<32x128xf32>
    %cst_188 = arith.constant dense<0.000000e+00> : vector<16x128xf32>
    %501 = tpu.matmul %498, %500, %cst_188 {dimension_numbers = #tpu.dot_dimension_numbers<[1], [0], [0], [1], [0, 0, 1, 1], [], []>} : vector<16x32xf32>, vector<32x128xf32>, vector<16x128xf32> -> vector<16x128xf32>
    %c1_189 = arith.constant 1 : index
    %c0_190 = arith.constant 0 : index
    %c0_191 = arith.constant 0 : index
    %502 = vector.load %arg13[%c1_189, %c0_190, %c0_191] : memref<2x1x128xf32, #tpu.memory_space<vmem>>, vector<1x1x128xf32>
    %503 = vector.shape_cast %502 : vector<1x1x128xf32> to vector<1x128xf32>
    %504 = vector.broadcast %503 : vector<1x128xf32> to vector<16x128xf32>
    %505 = arith.addf %501, %504 : vector<16x128xf32>
    %cst_192 = arith.constant 5.000000e-01 : f32
    %506 = vector.broadcast %cst_192 : f32 to vector<16x128xf32>
    %507 = arith.mulf %506, %505 : vector<16x128xf32>
    %cst_193 = arith.constant 0.707106769 : f32
    %508 = vector.broadcast %cst_193 : f32 to vector<16x128xf32>
    %509 = arith.mulf %505, %508 : vector<16x128xf32>
    %cst_194 = arith.constant -3.8325069 : f32
    %cst_195 = arith.constant 3.8325069 : f32
    %510 = vector.broadcast %cst_194 : f32 to vector<16x128xf32>
    %511 = arith.maximumf %510, %509 : vector<16x128xf32>
    %512 = vector.broadcast %cst_195 : f32 to vector<16x128xf32>
    %513 = arith.minimumf %512, %511 : vector<16x128xf32>
    %514 = arith.mulf %513, %513 : vector<16x128xf32>
    %cst_196 = arith.constant 2.29050653E-4 : f32
    %515 = vector.broadcast %cst_196 : f32 to vector<16x128xf32>
    %516 = arith.mulf %515, %514 : vector<16x128xf32>
    %cst_197 = arith.constant 0.00340829091 : f32
    %517 = vector.broadcast %cst_197 : f32 to vector<16x128xf32>
    %518 = arith.addf %516, %517 : vector<16x128xf32>
    %519 = arith.mulf %518, %514 : vector<16x128xf32>
    %cst_198 = arith.constant 0.0509556942 : f32
    %520 = vector.broadcast %cst_198 : f32 to vector<16x128xf32>
    %521 = arith.addf %519, %520 : vector<16x128xf32>
    %522 = arith.mulf %521, %514 : vector<16x128xf32>
    %cst_199 = arith.constant 0.185208321 : f32
    %523 = vector.broadcast %cst_199 : f32 to vector<16x128xf32>
    %524 = arith.addf %522, %523 : vector<16x128xf32>
    %525 = arith.mulf %524, %514 : vector<16x128xf32>
    %cst_200 = arith.constant 1.12837911 : f32
    %526 = vector.broadcast %cst_200 : f32 to vector<16x128xf32>
    %527 = arith.addf %525, %526 : vector<16x128xf32>
    %cst_201 = arith.constant -1.17916031E-7 : f32
    %528 = vector.broadcast %cst_201 : f32 to vector<16x128xf32>
    %529 = arith.mulf %528, %514 : vector<16x128xf32>
    %cst_202 = arith.constant 2.35479656E-5 : f32
    %530 = vector.broadcast %cst_202 : f32 to vector<16x128xf32>
    %531 = arith.addf %529, %530 : vector<16x128xf32>
    %532 = arith.mulf %531, %514 : vector<16x128xf32>
    %cst_203 = arith.constant 0.00101796258 : f32
    %533 = vector.broadcast %cst_203 : f32 to vector<16x128xf32>
    %534 = arith.addf %532, %533 : vector<16x128xf32>
    %535 = arith.mulf %534, %514 : vector<16x128xf32>
    %cst_204 = arith.constant 0.0140704699 : f32
    %536 = vector.broadcast %cst_204 : f32 to vector<16x128xf32>
    %537 = arith.addf %535, %536 : vector<16x128xf32>
    %538 = arith.mulf %537, %514 : vector<16x128xf32>
    %cst_205 = arith.constant 0.110985048 : f32
    %539 = vector.broadcast %cst_205 : f32 to vector<16x128xf32>
    %540 = arith.addf %538, %539 : vector<16x128xf32>
    %541 = arith.mulf %540, %514 : vector<16x128xf32>
    %cst_206 = arith.constant 0.497469246 : f32
    %542 = vector.broadcast %cst_206 : f32 to vector<16x128xf32>
    %543 = arith.addf %541, %542 : vector<16x128xf32>
    %544 = arith.mulf %543, %514 : vector<16x128xf32>
    %cst_207 = arith.constant 1.000000e+00 : f32
    %545 = vector.broadcast %cst_207 : f32 to vector<16x128xf32>
    %546 = arith.addf %544, %545 : vector<16x128xf32>
    %547 = arith.mulf %513, %527 : vector<16x128xf32>
    %548 = arith.divf %547, %546 : vector<16x128xf32>
    %cst_208 = arith.constant 1.000000e+00 : f32
    %549 = vector.broadcast %cst_208 : f32 to vector<16x128xf32>
    %550 = arith.addf %549, %548 : vector<16x128xf32>
    %551 = arith.mulf %507, %550 : vector<16x128xf32>
    %c1_209 = arith.constant 1 : index
    %c0_210 = arith.constant 0 : index
    %c0_211 = arith.constant 0 : index
    %552 = vector.load %arg14[%c1_209, %c0_210, %c0_211] : memref<2x128x32xf32, #tpu.memory_space<vmem>>, vector<1x128x32xf32>
    %553 = vector.shape_cast %552 : vector<1x128x32xf32> to vector<128x32xf32>
    %cst_212 = arith.constant dense<0.000000e+00> : vector<16x32xf32>
    %554 = tpu.matmul %551, %553, %cst_212 {dimension_numbers = #tpu.dot_dimension_numbers<[1], [0], [0], [1], [0, 0, 1, 1], [], []>} : vector<16x128xf32>, vector<128x32xf32>, vector<16x32xf32> -> vector<16x32xf32>
    %c1_213 = arith.constant 1 : index
    %c0_214 = arith.constant 0 : index
    %c0_215 = arith.constant 0 : index
    %555 = vector.load %arg15[%c1_213, %c0_214, %c0_215] : memref<2x1x32xf32, #tpu.memory_space<vmem>>, vector<1x1x32xf32>
    %556 = vector.shape_cast %555 : vector<1x1x32xf32> to vector<1x32xf32>
    %557 = vector.broadcast %556 : vector<1x32xf32> to vector<16x32xf32>
    %558 = arith.addf %554, %557 : vector<16x32xf32>
    %559 = arith.addf %474, %558 : vector<16x32xf32>
    %c0_216 = arith.constant 0 : index
    %c0_217 = arith.constant 0 : index
    %560 = vector.load %arg16[%c0_216, %c0_217] : memref<1x32xf32, #tpu.memory_space<vmem>>, vector<1x32xf32>
    %c0_218 = arith.constant 0 : index
    %c0_219 = arith.constant 0 : index
    %561 = vector.load %arg17[%c0_218, %c0_219] : memref<1x32xf32, #tpu.memory_space<vmem>>, vector<1x32xf32>
    %cst_220 = arith.constant dense<0.000000e+00> : vector<16xf32>
    %562 = vector.multi_reduction <add>, %559, %cst_220 [1] : vector<16x32xf32> to vector<16xf32>
    %563 = vector.shape_cast %562 : vector<16xf32> to vector<16x1xf32>
    %cst_221 = arith.constant 3.200000e+01 : f32
    %564 = vector.broadcast %cst_221 : f32 to vector<16x1xf32>
    %565 = arith.divf %563, %564 : vector<16x1xf32>
    %566 = vector.broadcast %565 : vector<16x1xf32> to vector<16x32xf32>
    %567 = arith.subf %559, %566 : vector<16x32xf32>
    %568 = arith.mulf %567, %567 : vector<16x32xf32>
    %cst_222 = arith.constant dense<0.000000e+00> : vector<16xf32>
    %569 = vector.multi_reduction <add>, %568, %cst_222 [1] : vector<16x32xf32> to vector<16xf32>
    %570 = vector.shape_cast %569 : vector<16xf32> to vector<16x1xf32>
    %cst_223 = arith.constant 3.200000e+01 : f32
    %571 = vector.broadcast %cst_223 : f32 to vector<16x1xf32>
    %572 = arith.divf %570, %571 : vector<16x1xf32>
    %cst_224 = arith.constant 9.99999974E-6 : f32
    %573 = vector.broadcast %cst_224 : f32 to vector<16x1xf32>
    %574 = arith.addf %572, %573 : vector<16x1xf32>
    %575 = math.rsqrt %574 : vector<16x1xf32>
    %576 = vector.broadcast %575 : vector<16x1xf32> to vector<16x32xf32>
    %577 = arith.mulf %567, %576 : vector<16x32xf32>
    %578 = vector.broadcast %560 : vector<1x32xf32> to vector<16x32xf32>
    %579 = arith.mulf %577, %578 : vector<16x32xf32>
    %580 = vector.broadcast %561 : vector<1x32xf32> to vector<16x32xf32>
    %581 = arith.addf %579, %580 : vector<16x32xf32>
    %c0_225 = arith.constant 0 : index
    %c0_226 = arith.constant 0 : index
    %582 = vector.load %arg18[%c0_225, %c0_226] : memref<16x32xf32, #tpu.memory_space<vmem>>, vector<16x32xf32>
    tpu.vector_store %arg18[%c0_225, %c0_226], %581 {strides = array<i32>} : memref<16x32xf32, #tpu.memory_space<vmem>>, vector<16x32xf32>,
    return
  }
  func.func @transform_0(%arg0: i32) -> (i32, i32) {
    %c0_i32 = arith.constant 0 : i32
    %c0_i32_0 = arith.constant 0 : i32
    %c0_i32_1 = arith.constant 0 : i32
    return %c0_i32, %c0_i32_0 : i32, i32
  }
  func.func @transform_1(%arg0: i32) -> (i32, i32) {
    %c0_i32 = arith.constant 0 : i32
    %c0_i32_0 = arith.constant 0 : i32
    %c0_i32_1 = arith.constant 0 : i32
    return %c0_i32, %c0_i32_0 : i32, i32
  }
  func.func @transform_2(%arg0: i32) -> (i32, i32) {
    %c0_i32 = arith.constant 0 : i32
    %c0_i32_0 = arith.constant 0 : i32
    %c0_i32_1 = arith.constant 0 : i32
    return %c0_i32, %c0_i32_0 : i32, i32
  }
  func.func @transform_3(%arg0: i32) -> (i32, i32) {
    %c0_i32 = arith.constant 0 : i32
    %c0_i32_0 = arith.constant 0 : i32
    %c0_i32_1 = arith.constant 0 : i32
    return %c0_i32, %c0_i32_0 : i32, i32
  }
  func.func @transform_4(%arg0: i32) -> (i32, i32, i32) {
    %c0_i32 = arith.constant 0 : i32
    %c0_i32_0 = arith.constant 0 : i32
    %c0_i32_1 = arith.constant 0 : i32
    %c0_i32_2 = arith.constant 0 : i32
    return %c0_i32, %c0_i32_0, %c0_i32_1 : i32, i32, i32
  }
  func.func @transform_5(%arg0: i32) -> (i32, i32, i32) {
    %c0_i32 = arith.constant 0 : i32
    %c0_i32_0 = arith.constant 0 : i32
    %c0_i32_1 = arith.constant 0 : i32
    %c0_i32_2 = arith.constant 0 : i32
    return %c0_i32, %c0_i32_0, %c0_i32_1 : i32, i32, i32
  }
  func.func @transform_6(%arg0: i32) -> (i32, i32, i32) {
    %c0_i32 = arith.constant 0 : i32
    %c0_i32_0 = arith.constant 0 : i32
    %c0_i32_1 = arith.constant 0 : i32
    %c0_i32_2 = arith.constant 0 : i32
    return %c0_i32, %c0_i32_0, %c0_i32_1 : i32, i32, i32
  }
  func.func @transform_7(%arg0: i32) -> (i32, i32, i32) {
    %c0_i32 = arith.constant 0 : i32
    %c0_i32_0 = arith.constant 0 : i32
    %c0_i32_1 = arith.constant 0 : i32
    %c0_i32_2 = arith.constant 0 : i32
    return %c0_i32, %c0_i32_0, %c0_i32_1 : i32, i32, i32
  }
  func.func @transform_8(%arg0: i32) -> (i32, i32, i32) {
    %c0_i32 = arith.constant 0 : i32
    %c0_i32_0 = arith.constant 0 : i32
    %c0_i32_1 = arith.constant 0 : i32
    %c0_i32_2 = arith.constant 0 : i32
    return %c0_i32, %c0_i32_0, %c0_i32_1 : i32, i32, i32
  }
  func.func @transform_9(%arg0: i32) -> (i32, i32, i32) {
    %c0_i32 = arith.constant 0 : i32
    %c0_i32_0 = arith.constant 0 : i32
    %c0_i32_1 = arith.constant 0 : i32
    %c0_i32_2 = arith.constant 0 : i32
    return %c0_i32, %c0_i32_0, %c0_i32_1 : i32, i32, i32
  }
  func.func @transform_10(%arg0: i32) -> (i32, i32, i32) {
    %c0_i32 = arith.constant 0 : i32
    %c0_i32_0 = arith.constant 0 : i32
    %c0_i32_1 = arith.constant 0 : i32
    %c0_i32_2 = arith.constant 0 : i32
    return %c0_i32, %c0_i32_0, %c0_i32_1 : i32, i32, i32
  }
  func.func @transform_11(%arg0: i32) -> (i32, i32, i32) {
    %c0_i32 = arith.constant 0 : i32
    %c0_i32_0 = arith.constant 0 : i32
    %c0_i32_1 = arith.constant 0 : i32
    %c0_i32_2 = arith.constant 0 : i32
    return %c0_i32, %c0_i32_0, %c0_i32_1 : i32, i32, i32
  }
  func.func @transform_12(%arg0: i32) -> (i32, i32, i32) {
    %c0_i32 = arith.constant 0 : i32
    %c0_i32_0 = arith.constant 0 : i32
    %c0_i32_1 = arith.constant 0 : i32
    %c0_i32_2 = arith.constant 0 : i32
    return %c0_i32, %c0_i32_0, %c0_i32_1 : i32, i32, i32
  }
  func.func @transform_13(%arg0: i32) -> (i32, i32, i32) {
    %c0_i32 = arith.constant 0 : i32
    %c0_i32_0 = arith.constant 0 : i32
    %c0_i32_1 = arith.constant 0 : i32
    %c0_i32_2 = arith.constant 0 : i32
    return %c0_i32, %c0_i32_0, %c0_i32_1 : i32, i32, i32
  }
  func.func @transform_14(%arg0: i32) -> (i32, i32, i32) {
    %c0_i32 = arith.constant 0 : i32
    %c0_i32_0 = arith.constant 0 : i32
    %c0_i32_1 = arith.constant 0 : i32
    %c0_i32_2 = arith.constant 0 : i32
    return %c0_i32, %c0_i32_0, %c0_i32_1 : i32, i32, i32
  }
  func.func @transform_15(%arg0: i32) -> (i32, i32) {
    %c0_i32 = arith.constant 0 : i32
    %c0_i32_0 = arith.constant 0 : i32
    %c0_i32_1 = arith.constant 0 : i32
    return %c0_i32, %c0_i32_0 : i32, i32
  }
  func.func @transform_16(%arg0: i32) -> (i32, i32) {
    %c0_i32 = arith.constant 0 : i32
    %c0_i32_0 = arith.constant 0 : i32
    %c0_i32_1 = arith.constant 0 : i32
    return %c0_i32, %c0_i32_0 : i32, i32
  }
  func.func @transform_17(%arg0: i32) -> (i32, i32) {
    %c0_i32 = arith.constant 0 : i32
    %c0_i32_0 = arith.constant 0 : i32
    %c0_i32_1 = arith.constant 0 : i32
    return %c0_i32, %c0_i32_0 : i32, i32
  }
}

</mosaic_0001>

<bundles_post_ra>
// kernel: encoder_forward.1
= control target key start
LH: loop header
LB: loop body
LE: loop exit
PB: predicated region body
PF: predicated region fallthrough
CT: control target
= control target key end

     0   :  { %s6646_s0 = inlined_call_operand.vmem [shape: f32[16,48], index: 0, kind: input, shape index: {}]   ;;  %s6647_s1 = inlined_call_operand.vmem [shape: f32[48,32], index: 1, kind: input, shape index: {}]   ;;  %s6648_s2 = inlined_call_operand.vmem [shape: f32[1,32], index: 2, kind: input, shape index: {}]   ;;  %s6649_s3 = inlined_call_operand.vmem [shape: f32[16,32], index: 3, kind: input, shape index: {}]   ;;  %s6650_s4 = inlined_call_operand.vmem [shape: f32[2,1,32], index: 4, kind: input, shape index: {}]   ;;  %s6651_s5 = inlined_call_operand.vmem [shape: f32[2,1,32], index: 5, kind: input, shape index: {}]   ;;  %s6652_s6 = inlined_call_operand.vmem [shape: f32[2,32,96], index: 6, kind: input, shape index: {}]   ;;  %s6653_s7 = inlined_call_operand.vmem [shape: f32[2,32,32], index: 7, kind: input, shape index: {}]   ;;  %s6654_s8 = inlined_call_operand.vmem [shape: f32[2,1,32], index: 8, kind: input, shape index: {}]   ;;  %s6655_s9 = inlined_call_operand.vmem [shape: f32[2,1,32], index: 9, kind: input, shape index: {}]   ;;  %s6656_s10 = inlined_call_operand.vmem [shape: f32[2,1,32], index: 10, kind: input, shape index: {}]   ;;  %s6657_s11 = inlined_call_operand.vmem [shape: f32[2,32,128], index: 11, kind: input, shape index: {}]   ;;  %s6658_s12 = inlined_call_operand.vmem [shape: f32[2,1,128], index: 12, kind: input, shape index: {}]   ;;  %s6659_s13 = inlined_call_operand.vmem [shape: f32[2,128,32], index: 13, kind: input, shape index: {}]   ;;  %s6660_s14 = inlined_call_operand.vmem [shape: f32[2,1,32], index: 14, kind: input, shape index: {}]   ;;  %s6661_s15 = inlined_call_operand.vmem [shape: f32[1,32], index: 15, kind: input, shape index: {}]   ;;  %s6662_s16 = inlined_call_operand.vmem [shape: f32[1,32], index: 16, kind: input, shape index: {}]   ;;  %s6663_s17 = inlined_call_operand.hbm [shape: f32[16,32], index: 17, kind: output, shape index: {}]  }
   0x1   :  { %6670 = sst [smem:[#allocation5_spill]] %s6646_s0 }
   0x2   :  { %6671 = sst [smem:[#allocation6_spill]] %s6647_s1 }
   0x3   :  { %s6672_s26 = sld [smem:[#allocation6_spill]]  ;;  %vm72_vm0 = vcmask 392192   ;;  %s6673_s24 = sld [smem:[#allocation5_spill]] }
   0x9   :  { %v59_v0 = vld [vmem:[%s6672_s26] sm:$0xff]  ;;  %v60_v1 = vld [vmem:[%s6672_s26 + $0x8] sm:$0xff]  ;;  %v61_v2 = vld [vmem:[%s6672_s26 + $0x10] sm:$0xff] }
   0xa   :  { %v5589_v3 = vpack.c.bf16 %v60_v1, %v59_v0  ;;  %v62_v4 = vld [vmem:[%s6672_s26 + $0x18] sm:$0xff]  ;;  %v63_v5 = vld [vmem:[%s6672_s26 + $0x20] sm:$0xff]  ;;  %v64_v7 = vld [vmem:[%s6672_s26 + $0x28] sm:$0xff] }
   0xb   :  { %v5593_v6 = vpack.c.bf16 %v62_v4, %v61_v2  ;;  %v57_v8 = vld [vmem:[%s6673_s24] sm:$0xff] }
   0xc   :  { %22 = vsyncpa [#allocation3], 0  ;;  %5590 = vmatprep.subr.bf16.mxu1 %v5589_v3  ;;  %5232 = vmatprep.mubr.msk.f32.mxu1 %vm72_vm0, %v57_v8  ;;  %v5597_v9 = vpack.c.bf16 %v64_v7, %v63_v5  ;;  %v58_v10 = vld [vmem:[%s6673_s24 + $0x8] sm:$0xff]  ;;  %v4926_v11 = vld [vmem:[%s6648_s2] ss:$0 sm:$0xff]  ;;  %vm160_vm1 = vcmask 261120  }
   0xd   :  { %5592 = vmatpush3.bf16.msra.mxu1 %v5589_v3  ;;  %v154_v14 = vld [vmem:[%s6649_s3] sm:$0xff]  ;;  %v155_v17 = vld [vmem:[%s6649_s3 + $0x8] sm:$0xff]  ;;  %v206_v34 = vld [vmem:[%s6652_s6 + $0x10] sm:$0xff]  ;;  %v5829_v54 = vmov 0.0   ;;  %vm5830_vm2 = vmmov 0   ;;  %s5831_s28 = smov 88  }
   0xe   :  { %5594 = vmatprep.subr.bf16.mxu1 %v5593_v6  ;;  %v204_v32 = vld [vmem:[%s6652_s6] sm:$0xff]  ;;  %v205_v33 = vld [vmem:[%s6652_s6 + $0x8] sm:$0xff]  ;;  %v207_v36 = vld [vmem:[%s6652_s6 + $0x18] sm:$0xff]  ;;  %5251 = vmatprep.subr.mxu0 %v5829_v54  ;;  %s5832_s29 = smov 96   ;;  %s5833_s0 = smov 120   ;;  %vm296_vm3 = vcmask 64512  }
   0xf   :  { %v5601_v35 = vpack.c.bf16 %v205_v33, %v204_v32  ;;  %v5605_v37 = vpack.c.bf16 %v207_v36, %v206_v34  ;;  %v4929_v45 = vld [vmem:[%s6650_s4] ss:$0 sm:$0xff]  ;;  %5253 = vmatprep.mubr.msk.f32.mxu0 %vm5830_vm2, %v5829_v54  ;;  %s5834_s30 = smov 64   ;;  %s5835_s18 = smov 80  }
  0x10   :  { %v4930_v47 = vld [vmem:[%s6651_s5] ss:$0 sm:$0xff]  ;;  %s5836_s2 = smov 112   ;;  %s5837_s3 = smov 56  }
  0x11   :  { %5596 = vmatpush3.bf16.msra.mxu1 %v5593_v6  ;;  %s5838_s22 = smov 72   ;;  %s6668_s23 = smov 104  }
  0x12   :  { %5598 = vmatprep.subr.bf16.mxu1 %v5597_v9  ;;  %s5840_s24 = smov 48   ;;  %s6666_s26 = smov 40  }
  0x13   :  { %s6675_s25 = smov 40  }
  0x15   :  { %5600 = vmatpush3.bf16.msra.mxu1 %v5597_v9 }
  0x16   :  { %5602 = vmatprep.subr.bf16.mxu1 %v5601_v35 }
  0x18   :  { %5233 = vmatmul.mubr.msk.f32.vlgmr.msra.gmra.mrb[0].mxu1 %vm72_vm0, %v58_v10 }
  0x19   :  { %5604 = vmatpush3.bf16.msra.mxu1 %v5601_v35 }
  0x1a   :  { %5606 = vmatprep.subr.bf16.mxu1 %v5605_v37 }
  0x1d   :  { %5608 = vmatpush3.bf16.msra.mxu1 %v5605_v37 }
  0x1e   :  { %5246 = vmatprep.subr.mxu1 %v5829_v54 }
  0xeb   :  { %v5234_v12 = vpop.f32.mrb[0].mxu1 }
  0xec   :  { %v145_v13 = vpop.f32.mrb[1].mxu1  ;;  %v151_v15 = vadd.f32 %v5234_v12, %v4926_v11 }
  0xed   :  { %v146_v16 = vadd.f32 %v4926_v11, %v145_v13  ;;  %v6045_v13 = vld [vmem:[%s6653_s7 + $0x8] sm:$0xff] }
  0xee   :  { %v5972_v19 = vadd.f32 %v155_v17, %v151_v15 }
  0xef   :  { %v5970_v18 = vadd.f32 %v154_v14, %v146_v16 }
  0xf0   :  { %v164_v21 = vsel %vm160_vm1, %v5972_v19, 0.0 }
  0xf1   :  { %v161_v20 = vsel %vm160_vm1, %v5970_v18, 0.0 }
  0xf2   :  { %162 = vadd.xlane.f32.xlu0 %v161_v20 }
  0xf6   :  { %165 = vadd.xlane.f32.xlu0 %v164_v21 }
 0x17f   :  { %v163_v22 = vpop.xlane.xlu0 %162 }
 0x180   :  { %v168_v23 = vmul.f32 0.03125, %v163_v22 }
 0x182   :  { %v170_v24 = vsub.f32 %v5970_v18, %v168_v23  ;;  %v6059_v23 = vld [vmem:[%s6653_s7] sm:$0xff] }
 0x183   :  { %v166_v25 = vpop.xlane.xlu0 %165 }
 0x184   :  { %v169_v26 = vmul.f32 0.03125, %v166_v25  ;;  %v172_v27 = vmul.f32 %v170_v24, %v170_v24 }
 0x186   :  { %v171_v28 = vsub.f32 %v5972_v19, %v169_v26  ;;  %v174_v29 = vsel %vm160_vm1, %v172_v27, 0.0 }
 0x187   :  { %175 = vadd.xlane.f32.xlu1 %v174_v29 }
 0x188   :  { %v173_v30 = vmul.f32 %v171_v28, %v171_v28 }
 0x18a   :  { %v177_v31 = vsel %vm160_vm1, %v173_v30, 0.0 }
 0x18b   :  { %178 = vadd.xlane.f32.xlu1 %v177_v31 }
 0x214   :  { %v176_v38 = vpop.xlane.xlu1 %175 }
 0x215   :  { %v180_v39 = vmul.f32 0.03125, %v176_v38 }
 0x217   :  { %v182_v40 = vadd.f32 1e-05, %v180_v39 }
 0x218   :  { %v179_v41 = vpop.xlane.xlu1 %178 }
 0x219   :  { %5713 = vrsqrt.f32 %v182_v40  ;;  %v181_v42 = vmul.f32 0.03125, %v179_v41 }
 0x21b   :  { %v183_v43 = vadd.f32 1e-05, %v181_v42 }
 0x21d   :  { %5715 = vrsqrt.f32 %v183_v43 }
 0x223   :  { %v5714_v44 = vpop.eup %5713 }
 0x224   :  { %v186_v46 = vmul.f32 %v5714_v44, %v170_v24 }
 0x226   :  { %v194_v48 = vmul.f32 %v4929_v45, %v186_v46 }
 0x227   :  { %v5716_v49 = vpop.eup %5715 }
 0x228   :  { %v187_v50 = vmul.f32 %v5716_v49, %v171_v28  ;;  %v202_v51 = vadd.f32 %v4930_v47, %v194_v48  ;;  %v6096_v49 = vld [vmem:[%s6653_s7 + $0x10] sm:$0xff] }
 0x22a   :  { %v195_v52 = vmul.f32 %v4929_v45, %v187_v50  ;;  %5243 = vmatprep.mubr.msk.f32.mxu1 %vm160_vm1, %v202_v51 }
 0x22c   :  { %v203_v53 = vadd.f32 %v4930_v47, %v195_v52 }
 0x22e   :  { %5244 = vmatmul.mubr.msk.f32.vlgmr.msra.gmra.mrb[2].mxu1 %vm160_vm1, %v203_v53 }
 0x22f   :  { %5248 = vmatprep.mubr.msk.f32.mxu1 %vm5830_vm2, %v5829_v54 }
 0x301   :  { %v6008_v55 = vpop.f32.mrb[2].mxu1 }
 0x302   :  { %v6010_v56 = vpop.f32.mrb[3].mxu1 }
 0x303   :  { %460 = vrot.lane.b32.xlu1 %v6010_v56, %s5831_s28  ;;  %294 = vrot.lane.b32.xlu0 %v6010_v56, %s5832_s29 }
 0x307   :  { %458 = vrot.lane.b32.xlu1 %v6010_v56, %s5833_s0 }
 0x375   :  { %v295_v57 = vpop.permute.xlu0 %294  ;;  %v461_v58 = vpop.permute.xlu1 %460 }
 0x376   :  { %5247 = vmatpush3.xpose.msk.msra.mxu1 %vm296_vm3, %v295_v57 }
 0x377   :  { %5256 = vmatprep.subr.mxu1 %v5829_v54 }
 0x379   :  { %5249 = vmatmul.mubr.msk.f32.vlgmr.msra.gmra.mrb[4].mxu1 %vm296_vm3, %v6010_v56  ;;  %v459_v59 = vpop.permute.xlu1 %458 }
 0x37a   :  { %5257 = vmatpush3.xpose.msk.msra.mxu1 %vm296_vm3, %v461_v58  ;;  %5258 = vmatprep.mubr.msk.f32.mxu1 %vm5830_vm2, %v5829_v54 }
 0x37b   :  { %5266 = vmatprep.subr.mxu1 %v5829_v54 }
 0x37d   :  { %5259 = vmatmul.mubr.msk.f32.vlgmr.msra.gmra.mrb[6].mxu1 %vm296_vm3, %v459_v59 }
 0x37e   :  { %5268 = vmatprep.mubr.msk.f32.mxu1 %vm5830_vm2, %v5829_v54  ;;  %5267 = vmatpush3.msra.mxu1 %v6045_v13 }
 0x37f   :  { %5276 = vmatprep.subr.mxu1 %v5829_v54 }
 0x44c   :  { %v367_v60 = vpop.f32.mrb[4].mxu1 }
 0x44d   :  { %v5250_v61 = vpop.f32.mrb[5].mxu1  ;;  %v371_v62 = vsel %vm296_vm3, %v367_v60, -inf }
 0x44e   :  { %372 = vmax.xlane.f32.xlu1 %v371_v62 }
 0x450   :  { %v532_v63 = vpop.f32.mrb[6].mxu1 }
 0x451   :  { %v5260_v0 = vpop.f32.mrb[7].mxu1  ;;  %v536_v1 = vsel %vm296_vm3, %v532_v63, -inf }
 0x452   :  { %537 = vmax.xlane.f32.xlu0 %v536_v1 }
 0x45f   :  { %382 = vrot.lane.b32.xlu1 %v6010_v56, %s5834_s30 }
 0x463   :  { %771 = vrot.lane.b32.xlu1 %v6010_v56, %s5835_s18 }
 0x467   :  { %769 = vrot.lane.b32.xlu1 %v6010_v56, %s5836_s2 }
 0x4db   :  { %v373_v2 = vpop.xlane.xlu1 %372 }
 0x4dc   :  { %v374_v3 = vsub.f32 %v367_v60, %v373_v2 }
 0x4de   :  { %v375_v4 = vmul.f32 1.442695, %v374_v3 }
 0x4df   :  { %v383_v5 = vpop.permute.xlu1 %382  ;;  %v538_v6 = vpop.xlane.xlu0 %537 }
 0x4e0   :  { %5717 = vpow2.f32 %v375_v4  ;;  %v539_v7 = vsub.f32 %v532_v63, %v538_v6  ;;  %5252 = vmatpush3.msra.mxu0 %v383_v5 }
 0x4e1   :  { %5261 = vmatprep.subr.mxu0 %v5829_v54 }
 0x4e2   :  { %v540_v8 = vmul.f32 1.442695, %v539_v7 }
 0x4e3   :  { %v772_v26 = vpop.permute.xlu1 %771 }
 0x4e4   :  { %5719 = vpow2.f32 %v540_v8  ;;  %v6131_v8 = vld [vmem:[%s6653_s7 + $0x18] sm:$0xff] }
 0x4e7   :  { %v770_v29 = vpop.permute.xlu1 %769 }
 0x4ea   :  { %v5718_v9 = vpop.eup %5717 }
 0x4eb   :  { %v377_v10 = vsel %vm296_vm3, %v5718_v9, 0.0 }
 0x4ec   :  { %378 = vadd.xlane.f32.xlu0 %v377_v10 }
 0x4ee   :  { %v5720_v11 = vpop.eup %5719 }
 0x4ef   :  { %v542_v12 = vsel %vm296_vm3, %v5720_v11, 0.0 }
 0x4f0   :  { %543 = vadd.xlane.f32.xlu0 %v542_v12 }
 0x506   :  { %547 = vrot.lane.b32.xlu0 %v6010_v56, %s5837_s3 }
 0x579   :  { %v379_v14 = vpop.xlane.xlu0 %378 }
 0x57a   :  { %5721 = vrcp.f32 %v379_v14 }
 0x57d   :  { %v544_v15 = vpop.xlane.xlu0 %543 }
 0x57e   :  { %5723 = vrcp.f32 %v544_v15 }
 0x581   :  { %v548_v20 = vpop.permute.xlu0 %547 }
 0x584   :  { %v5722_v16 = vpop.eup %5721 }
 0x585   :  { %v381_v17 = vmul.f32 %v5722_v16, %v5718_v9 }
 0x587   :  { %5254 = vmatmul.mubr.msk.f32.vlgmr.msra.gmra.mrb[0].mxu0 %vm296_vm3, %v381_v17 }
 0x588   :  { %v5724_v21 = vpop.eup %5723  ;;  %5262 = vmatpush3.msra.mxu0 %v548_v20  ;;  %5263 = vmatprep.mubr.msk.f32.mxu0 %vm5830_vm2, %v5829_v54 }
 0x589   :  { %v546_v22 = vmul.f32 %v5724_v21, %v5720_v11  ;;  %5271 = vmatprep.subr.mxu0 %v5829_v54 }
 0x58b   :  { %5264 = vmatmul.mubr.msk.f32.vlgmr.msra.gmra.mrb[2].mxu0 %vm296_vm3, %v546_v22 }
 0x58c   :  { %5273 = vmatprep.mubr.msk.f32.mxu0 %vm5830_vm2, %v5829_v54  ;;  %5272 = vmatpush3.msra.mxu0 %v6059_v23 }
 0x58d   :  { %5281 = vmatprep.subr.mxu0 %v5829_v54 }
 0x65a   :  { %v454_v24 = vpop.f32.mrb[0].mxu0 }
 0x65b   :  { %v5255_v25 = vpop.f32.mrb[1].mxu0  ;;  %5274 = vmatmul.mubr.msk.f32.vlgmr.msra.gmra.mrb[4].mxu0 %vm296_vm3, %v454_v24 }
 0x65c   :  { %5283 = vmatprep.mubr.msk.f32.mxu0 %vm5830_vm2, %v5829_v54 }
 0x65e   :  { %v619_v27 = vpop.f32.mrb[2].mxu0 }
 0x65f   :  { %v5265_v28 = vpop.f32.mrb[3].mxu0  ;;  %5269 = vmatmul.mubr.msk.f32.vlgmr.msra.gmra.mrb[8].mxu1 %vm296_vm3, %v619_v27 }
 0x660   :  { %5277 = vmatpush3.xpose.msk.msra.mxu1 %vm296_vm3, %v772_v26  ;;  %5278 = vmatprep.mubr.msk.f32.mxu1 %vm5830_vm2, %v5829_v54 }
 0x661   :  { %5286 = vmatprep.subr.mxu1 %v5829_v54 }
 0x663   :  { %5279 = vmatmul.mubr.msk.f32.vlgmr.msra.gmra.mrb[10].mxu1 %vm296_vm3, %v770_v29 }
 0x664   :  { %5288 = vmatprep.mubr.msk.f32.mxu1 %vm5830_vm2, %v5829_v54  ;;  %5287 = vmatpush3.msra.mxu1 %v6096_v49 }
 0x665   :  { %5296 = vmatprep.subr.mxu1 %v5829_v54 }
 0x72e   :  { %v765_v30 = vpop.f32.mrb[4].mxu0 }
 0x72f   :  { %v5275_v31 = vpop.f32.mrb[5].mxu0 }
 0x732   :  { %v692_v32 = vpop.f32.mrb[8].mxu1 }
 0x733   :  { %v766_v33 = vadd.f32 %v765_v30, %v692_v32  ;;  %v5270_v34 = vpop.f32.mrb[9].mxu1 }
 0x736   :  { %v843_v35 = vpop.f32.mrb[10].mxu1 }
 0x737   :  { %v5280_v36 = vpop.f32.mrb[11].mxu1  ;;  %v847_v37 = vsel %vm296_vm3, %v843_v35, -inf }
 0x738   :  { %848 = vmax.xlane.f32.xlu1 %v847_v37 }
 0x749   :  { %1010 = vrot.lane.b32.xlu1 %v6010_v56, %s5838_s22 }
 0x74d   :  { %1008 = vrot.lane.b32.xlu1 %v6010_v56, %s6668_s23 }
 0x751   :  { %1248 = vrot.lane.b32.xlu1 %v6008_v55, %s5832_s29 }
 0x7c5   :  { %v849_v38 = vpop.xlane.xlu1 %848 }
 0x7c6   :  { %v850_v39 = vsub.f32 %v843_v35, %v849_v38 }
 0x7c8   :  { %v851_v40 = vmul.f32 1.442695, %v850_v39 }
 0x7c9   :  { %v1011_v46 = vpop.permute.xlu1 %1010 }
 0x7ca   :  { %5725 = vpow2.f32 %v851_v40 }
 0x7cd   :  { %v1009_v48 = vpop.permute.xlu1 %1008 }
 0x7d1   :  { %v1249_v2 = vpop.permute.xlu1 %1248 }
 0x7d4   :  { %v5726_v41 = vpop.eup %5725 }
 0x7d5   :  { %v853_v42 = vsel %vm296_vm3, %v5726_v41, 0.0 }
 0x7d6   :  { %854 = vadd.xlane.f32.xlu0 %v853_v42 }
 0x7ec   :  { %858 = vrot.lane.b32.xlu0 %v6010_v56, %s5840_s24 }
 0x863   :  { %v855_v43 = vpop.xlane.xlu0 %854 }
 0x864   :  { %5727 = vrcp.f32 %v855_v43 }
 0x867   :  { %v859_v44 = vpop.permute.xlu0 %858 }
 0x868   :  { %5282 = vmatpush3.msra.mxu0 %v859_v44 }
 0x869   :  { %5291 = vmatprep.subr.mxu0 %v5829_v54 }
 0x86e   :  { %v5728_v45 = vpop.eup %5727 }
 0x86f   :  { %v857_v47 = vmul.f32 %v5728_v45, %v5726_v41 }
 0x871   :  { %5284 = vmatmul.mubr.msk.f32.vlgmr.msra.gmra.mrb[6].mxu0 %vm296_vm3, %v857_v47 }
 0x872   :  { %5292 = vmatpush3.xpose.msk.msra.mxu0 %vm296_vm3, %v1011_v46  ;;  %5293 = vmatprep.mubr.msk.f32.mxu0 %vm5830_vm2, %v5829_v54 }
 0x873   :  { %5301 = vmatprep.subr.mxu0 %v5829_v54 }
 0x875   :  { %5294 = vmatmul.mubr.msk.f32.vlgmr.msra.gmra.mrb[8].mxu0 %vm296_vm3, %v1009_v48 }
 0x876   :  { %5303 = vmatprep.mubr.msk.f32.mxu0 %vm5830_vm2, %v5829_v54  ;;  %5302 = vmatpush3.msra.mxu0 %v6131_v8 }
 0x877   :  { %5311 = vmatprep.subr.mxu0 %v5829_v54 }
 0x944   :  { %v930_v50 = vpop.f32.mrb[6].mxu0 }
 0x945   :  { %v5285_v51 = vpop.f32.mrb[7].mxu0  ;;  %5289 = vmatmul.mubr.msk.f32.vlgmr.msra.gmra.mrb[12].mxu1 %vm296_vm3, %v930_v50 }
 0x946   :  { %5298 = vmatprep.mubr.msk.f32.mxu1 %vm5830_vm2, %v5829_v54 }
 0x948   :  { %v1082_v52 = vpop.f32.mrb[8].mxu0 }
 0x949   :  { %v5295_v53 = vpop.f32.mrb[9].mxu0  ;;  %v1086_v57 = vsel %vm296_vm3, %v1082_v52, -inf }
 0x94a   :  { %1087 = vmax.xlane.f32.xlu0 %v1086_v57 }
 0x960   :  { %1097 = vrot.lane.b32.xlu0 %v6010_v56, %s6666_s26 }
 0x964   :  { %1413 = vrot.lane.b32.xlu0 %v6008_v55, %s5831_s28 }
 0x9d7   :  { %v1088_v58 = vpop.xlane.xlu0 %1087 }
 0x9d8   :  { %v1089_v59 = vsub.f32 %v1082_v52, %v1088_v58 }
 0x9da   :  { %v1090_v60 = vmul.f32 1.442695, %v1089_v59 }
 0x9db   :  { %v1098_v61 = vpop.permute.xlu0 %1097 }
 0x9dc   :  { %5729 = vpow2.f32 %v1090_v60  ;;  %5297 = vmatpush3.msra.mxu1 %v1098_v61 }
 0x9dd   :  { %5306 = vmatprep.subr.mxu1 %v5829_v54 }
 0x9df   :  { %v1414_v6 = vpop.permute.xlu0 %1413 }
 0x9e6   :  { %v5730_v62 = vpop.eup %5729 }
 0x9e7   :  { %v1092_v63 = vsel %vm296_vm3, %v5730_v62, 0.0 }
 0x9e8   :  { %1093 = vadd.xlane.f32.xlu1 %v1092_v63 }
 0x9f9   :  { %1411 = vrot.lane.b32.xlu1 %v6008_v55, %s5833_s0 }
 0xa18   :  { %v1003_v0 = vpop.f32.mrb[12].mxu1 }
 0xa19   :  { %v1007_v56 = vadd.f32 %v1003_v0, %v766_v33  ;;  %v5290_v1 = vpop.f32.mrb[13].mxu1 }
 0xa75   :  { %v1094_v3 = vpop.xlane.xlu1 %1093 }
 0xa76   :  { %5731 = vrcp.f32 %v1094_v3  ;;  %v4965_v3 = vld [vmem:[%s6654_s8] ss:$0 sm:$0xff] }
 0xa79   :  { %v1412_v7 = vpop.permute.xlu1 %1411 }
 0xa80   :  { %v5732_v4 = vpop.eup %5731 }
 0xa81   :  { %v1096_v5 = vmul.f32 %v5732_v4, %v5730_v62 }
 0xa83   :  { %5299 = vmatmul.mubr.msk.f32.vlgmr.msra.gmra.mrb[14].mxu1 %vm296_vm3, %v1096_v5 }
 0xa84   :  { %5307 = vmatpush3.xpose.msk.msra.mxu1 %vm296_vm3, %v1249_v2  ;;  %5308 = vmatprep.mubr.msk.f32.mxu1 %vm5830_vm2, %v5829_v54 }
 0xa85   :  { %5316 = vmatprep.subr.mxu1 %v5829_v54 }
 0xa87   :  { %5309 = vmatmul.mubr.msk.f32.vlgmr.msra.gmra.mrb[16].mxu1 %vm296_vm3, %v6008_v55 }
 0xa88   :  { %5317 = vmatpush3.xpose.msk.msra.mxu1 %vm296_vm3, %v1414_v6  ;;  %5318 = vmatprep.mubr.msk.f32.mxu1 %vm5830_vm2, %v5829_v54 }
 0xa89   :  { %5326 = vmatprep.subr.mxu1 %v5829_v54 }
 0xa8b   :  { %5319 = vmatmul.mubr.msk.f32.vlgmr.msra.gmra.mrb[18].mxu1 %vm296_vm3, %v1412_v7 }
 0xa8c   :  { %5327 = vmatpush3.msra.mxu1 %v6045_v13  ;;  %5328 = vmatprep.mubr.msk.f32.mxu1 %vm5830_vm2, %v5829_v54 }
 0xa8d   :  { %5336 = vmatprep.subr.mxu1 %v5829_v54 }
 0xb56   :  { %v1169_v9 = vpop.f32.mrb[14].mxu1 }
 0xb57   :  { %v5300_v10 = vpop.f32.mrb[15].mxu1  ;;  %5304 = vmatmul.mubr.msk.f32.vlgmr.msra.gmra.mrb[10].mxu0 %vm296_vm3, %v1169_v9 }
 0xb58   :  { %5313 = vmatprep.mubr.msk.f32.mxu0 %vm5830_vm2, %v5829_v54 }
 0xb5a   :  { %v1320_v11 = vpop.f32.mrb[16].mxu1 }
 0xb5b   :  { %v5310_v12 = vpop.f32.mrb[17].mxu1  ;;  %v1324_v13 = vsel %vm296_vm3, %v1320_v11, -inf }
 0xb5c   :  { %1325 = vmax.xlane.f32.xlu0 %v1324_v13 }
 0xb5e   :  { %v1485_v14 = vpop.f32.mrb[18].mxu1 }
 0xb5f   :  { %v5320_v15 = vpop.f32.mrb[19].mxu1  ;;  %v1489_v16 = vsel %vm296_vm3, %v1485_v14, -inf }
 0xb60   :  { %1490 = vmax.xlane.f32.xlu1 %v1489_v16 }
 0xb71   :  { %1500 = vrot.lane.b32.xlu1 %v6008_v55, %s5837_s3 }
 0xb75   :  { %1724 = vrot.lane.b32.xlu1 %v6008_v55, %s5835_s18 }
 0xb79   :  { %1722 = vrot.lane.b32.xlu1 %v6008_v55, %s5836_s2 }
 0xbe9   :  { %v1326_v17 = vpop.xlane.xlu0 %1325 }
 0xbea   :  { %v1327_v20 = vsub.f32 %v1320_v11, %v1326_v17 }
 0xbec   :  { %v1328_v21 = vmul.f32 1.442695, %v1327_v20 }
 0xbed   :  { %v1491_v22 = vpop.xlane.xlu1 %1490 }
 0xbee   :  { %5733 = vpow2.f32 %v1328_v21  ;;  %v1492_v24 = vsub.f32 %v1485_v14, %v1491_v22 }
 0xbf0   :  { %v1493_v25 = vmul.f32 1.442695, %v1492_v24 }
 0xbf1   :  { %v1501_v38 = vpop.permute.xlu1 %1500 }
 0xbf2   :  { %5735 = vpow2.f32 %v1493_v25 }
 0xbf5   :  { %v1725_v43 = vpop.permute.xlu1 %1724 }
 0xbf8   :  { %v5734_v26 = vpop.eup %5733 }
 0xbf9   :  { %v1330_v27 = vsel %vm296_vm3, %v5734_v26, 0.0 }
 0xbfa   :  { %1331 = vadd.xlane.f32.xlu0 %v1330_v27 }
 0xbfc   :  { %v5736_v28 = vpop.eup %5735 }
 0xbfd   :  { %v1495_v29 = vsel %vm296_vm3, %v5736_v28, 0.0 }
 0xbfe   :  { %1496 = vadd.xlane.f32.xlu0 %v1495_v29 }
 0xc14   :  { %1335 = vrot.lane.b32.xlu0 %v6008_v55, %s5834_s30 }
 0xc2a   :  { %v1242_v30 = vpop.f32.mrb[10].mxu0 }
 0xc2b   :  { %v6150_v31 = vadd.f32 %v1242_v30, %v1007_v56  ;;  %v5305_v32 = vpop.f32.mrb[11].mxu0 }
 0xc2d   :  { %v2207_v5 = vadd.f32 %v4965_v3, %v6150_v31 }
 0xc2f   :  { %v6201_v9 = vadd.f32 %v2207_v5, %v5970_v18  ;;  %v2410_v5 = vld [vmem:[%s6659_s13 + $0x18] sm:$0xff] }
 0xc31   :  { %v2213_v11 = vsel %vm160_vm1, %v6201_v9, 0.0 }
 0xc87   :  { %v1332_v33 = vpop.xlane.xlu0 %1331 }
 0xc88   :  { %5737 = vrcp.f32 %v1332_v33 }
 0xc8b   :  { %v1497_v34 = vpop.xlane.xlu0 %1496 }
 0xc8c   :  { %5739 = vrcp.f32 %v1497_v34 }
 0xc8f   :  { %v1336_v35 = vpop.permute.xlu0 %1335 }
 0xc90   :  { %5312 = vmatpush3.msra.mxu0 %v1336_v35 }
 0xc91   :  { %5321 = vmatprep.subr.mxu0 %v5829_v54 }
 0xc92   :  { %v5738_v36 = vpop.eup %5737 }
 0xc93   :  { %v1334_v37 = vmul.f32 %v5738_v36, %v5734_v26 }
 0xc95   :  { %5314 = vmatmul.mubr.msk.f32.vlgmr.msra.gmra.mrb[12].mxu0 %vm296_vm3, %v1334_v37 }
 0xc96   :  { %v5740_v39 = vpop.eup %5739  ;;  %5322 = vmatpush3.msra.mxu0 %v1501_v38  ;;  %5323 = vmatprep.mubr.msk.f32.mxu0 %vm5830_vm2, %v5829_v54 }
 0xc97   :  { %v1499_v40 = vmul.f32 %v5740_v39, %v5736_v28  ;;  %5331 = vmatprep.subr.mxu0 %v5829_v54 }
 0xc99   :  { %5324 = vmatmul.mubr.msk.f32.vlgmr.msra.gmra.mrb[14].mxu0 %vm296_vm3, %v1499_v40 }
 0xc9a   :  { %5332 = vmatpush3.msra.mxu0 %v6059_v23  ;;  %5333 = vmatprep.mubr.msk.f32.mxu0 %vm5830_vm2, %v5829_v54  ;;  %v1723_v23 = vpop.permute.xlu1 %1722 }
 0xc9b   :  { %5341 = vmatprep.subr.mxu0 %v5829_v54 }
 0xd68   :  { %v1407_v41 = vpop.f32.mrb[12].mxu0 }
 0xd69   :  { %v5315_v42 = vpop.f32.mrb[13].mxu0  ;;  %5334 = vmatmul.mubr.msk.f32.vlgmr.msra.gmra.mrb[16].mxu0 %vm296_vm3, %v1407_v41 }
 0xd6a   :  { %5343 = vmatprep.mubr.msk.f32.mxu0 %vm5830_vm2, %v5829_v54 }
 0xd6c   :  { %v1572_v44 = vpop.f32.mrb[14].mxu0 }
 0xd6d   :  { %v5325_v45 = vpop.f32.mrb[15].mxu0  ;;  %5329 = vmatmul.mubr.msk.f32.vlgmr.msra.gmra.mrb[20].mxu1 %vm296_vm3, %v1572_v44 }
 0xd6e   :  { %5337 = vmatpush3.xpose.msk.msra.mxu1 %vm296_vm3, %v1725_v43  ;;  %5338 = vmatprep.mubr.msk.f32.mxu1 %vm5830_vm2, %v5829_v54 }
 0xd6f   :  { %5346 = vmatprep.subr.mxu1 %v5829_v54 }
 0xd71   :  { %5339 = vmatmul.mubr.msk.f32.vlgmr.msra.gmra.mrb[22].mxu1 %vm296_vm3, %v1723_v23  ;;  %v4966_v23 = vld [vmem:[%s6655_s9] ss:$0 sm:$0xff] }
 0xd72   :  { %5347 = vmatpush3.msra.mxu1 %v6096_v49  ;;  %5348 = vmatprep.mubr.msk.f32.mxu1 %vm5830_vm2, %v5829_v54 }
 0xd73   :  { %5356 = vmatprep.subr.mxu1 %v5829_v54 }
 0xe3c   :  { %v1718_v46 = vpop.f32.mrb[16].mxu0 }
 0xe3d   :  { %v5335_v47 = vpop.f32.mrb[17].mxu0 }
 0xe3e   :  { %v4967_v47 = vld [vmem:[%s6656_s10] ss:$0 sm:$0xff] }
 0xe40   :  { %v1645_v48 = vpop.f32.mrb[20].mxu1 }
 0xe41   :  { %v1719_v50 = vadd.f32 %v1718_v46, %v1645_v48  ;;  %v5330_v51 = vpop.f32.mrb[21].mxu1 }
 0xe42   :  { %v2255_v51 = vld [vmem:[%s6657_s11] sm:$0xff] }
 0xe44   :  { %v1796_v52 = vpop.f32.mrb[22].mxu1 }
 0xe45   :  { %v5340_v53 = vpop.f32.mrb[23].mxu1  ;;  %v1800_v57 = vsel %vm296_vm3, %v1796_v52, -inf }
 0xe46   :  { %1801 = vmax.xlane.f32.xlu0 %v1800_v57  ;;  %v2257_v57 = vld [vmem:[%s6657_s11 + $0x10] sm:$0xff] }
 0xe5c   :  { %1811 = vrot.lane.b32.xlu0 %v6008_v55, %s5840_s24 }
 0xe60   :  { %1961 = vrot.lane.b32.xlu0 %v6008_v55, %s6668_s23 }
 0xed3   :  { %v1802_v49 = vpop.xlane.xlu0 %1801 }
 0xed4   :  { %v1803_v58 = vsub.f32 %v1796_v52, %v1802_v49  ;;  %v2256_v52 = vld [vmem:[%s6657_s11 + $0x8] sm:$0xff]  ;;  %v2258_v49 = vld [vmem:[%s6657_s11 + $0x18] sm:$0xff] }
 0xed5   :  { %v5609_v53 = vpack.c.bf16 %v2256_v52, %v2255_v51 }
 0xed6   :  { %v1804_v59 = vmul.f32 1.442695, %v1803_v58  ;;  %v5613_v58 = vpack.c.bf16 %v2258_v49, %v2257_v57 }
 0xed7   :  { %v1812_v60 = vpop.permute.xlu0 %1811 }
 0xed8   :  { %5741 = vpow2.f32 %v1804_v59  ;;  %5342 = vmatpush3.msra.mxu0 %v1812_v60 }
 0xed9   :  { %5351 = vmatprep.subr.mxu0 %v5829_v54 }
 0xedb   :  { %v1962_v2 = vpop.permute.xlu0 %1961 }
 0xee2   :  { %v5742_v61 = vpop.eup %5741 }
 0xee3   :  { %v1806_v62 = vsel %vm296_vm3, %v5742_v61, 0.0 }
 0xee4   :  { %1807 = vadd.xlane.f32.xlu1 %v1806_v62 }
 0xef5   :  { %1963 = vrot.lane.b32.xlu1 %v6008_v55, %s5838_s22 }
 0xf71   :  { %v1808_v63 = vpop.xlane.xlu1 %1807 }
 0xf72   :  { %5743 = vrcp.f32 %v1808_v63 }
 0xf75   :  { %v1964_v1 = vpop.permute.xlu1 %1963 }
 0xf7c   :  { %v5744_v0 = vpop.eup %5743 }
 0xf7d   :  { %v1810_v56 = vmul.f32 %v5744_v0, %v5742_v61 }
 0xf7f   :  { %5344 = vmatmul.mubr.msk.f32.vlgmr.msra.gmra.mrb[18].mxu0 %vm296_vm3, %v1810_v56 }
 0xf80   :  { %5352 = vmatpush3.xpose.msk.msra.mxu0 %vm296_vm3, %v1964_v1  ;;  %5353 = vmatprep.mubr.msk.f32.mxu0 %vm5830_vm2, %v5829_v54  ;;  %v2407_v1 = vld [vmem:[%s6659_s13] sm:$0xff] }
 0xf81   :  { %5361 = vmatprep.subr.mxu0 %v5829_v54 }
 0xf83   :  { %5354 = vmatmul.mubr.msk.f32.vlgmr.msra.gmra.mrb[20].mxu0 %vm296_vm3, %v1962_v2  ;;  %v2408_v2 = vld [vmem:[%s6659_s13 + $0x8] sm:$0xff] }
 0xf84   :  { %5362 = vmatpush3.msra.mxu0 %v6131_v8  ;;  %5363 = vmatprep.mubr.msk.f32.mxu0 %vm5830_vm2, %v5829_v54 }
0x1052   :  { %v1883_v4 = vpop.f32.mrb[18].mxu0 }
0x1053   :  { %v5345_v6 = vpop.f32.mrb[19].mxu0  ;;  %5349 = vmatmul.mubr.msk.f32.vlgmr.msra.gmra.mrb[24].mxu1 %vm296_vm3, %v1883_v4  ;;  %v2409_v4 = vld [vmem:[%s6659_s13 + $0x10] sm:$0xff] }
0x1054   :  { %5358 = vmatprep.mubr.msk.f32.mxu1 %vm5830_vm2, %v5829_v54  ;;  %v5621_v6 = vpack.c.bf16 %v2410_v5, %v2409_v4 }
0x1056   :  { %v2035_v7 = vpop.f32.mrb[20].mxu0 }
0x1057   :  { %v5355_v8 = vpop.f32.mrb[21].mxu0  ;;  %v2039_v10 = vsel %vm296_vm3, %v2035_v7, -inf }
0x1058   :  { %2040 = vmax.xlane.f32.xlu1 %v2039_v10  ;;  %v2412_v8 = vld [vmem:[%s6659_s13 + $0x28] sm:$0xff] }
0x105c   :  { %2214 = vadd.xlane.f32.xlu1 %v2213_v11  ;;  %v2413_v11 = vld [vmem:[%s6659_s13 + $0x30] sm:$0xff] }
0x10e5   :  { %v2041_v12 = vpop.xlane.xlu1 %2040 }
0x10e6   :  { %v2042_v13 = vsub.f32 %v2035_v7, %v2041_v12  ;;  %v2411_v7 = vld [vmem:[%s6659_s13 + $0x20] sm:$0xff]  ;;  %v2414_v12 = vld [vmem:[%s6659_s13 + $0x38] sm:$0xff] }
0x10e7   :  { %v5625_v10 = vpack.c.bf16 %v2412_v8, %v2411_v7 }
0x10e8   :  { %v2043_v14 = vmul.f32 1.442695, %v2042_v13  ;;  %v5629_v13 = vpack.c.bf16 %v2414_v12, %v2413_v11 }
0x10e9   :  { %v2215_v28 = vpop.xlane.xlu1 %2214 }
0x10ea   :  { %5745 = vpow2.f32 %v2043_v14  ;;  %v2219_v29 = vmul.f32 0.03125, %v2215_v28  ;;  %v2415_v14 = vld [vmem:[%s6659_s13 + $0x40] sm:$0xff] }
0x10eb   :  { %v4968_v28 = vld [vmem:[%s6658_s12] ss:$0 sm:$0xff] }
0x10ec   :  { %v2221_v32 = vsub.f32 %v6201_v9, %v2219_v29 }
0x10ee   :  { %v2223_v36 = vmul.f32 %v2221_v32, %v2221_v32 }
0x10f0   :  { %v2225_v37 = vsel %vm160_vm1, %v2223_v36, 0.0 }
0x10f4   :  { %v5746_v15 = vpop.eup %5745 }
0x10f5   :  { %v2045_v16 = vsel %vm296_vm3, %v5746_v15, 0.0 }
0x10f6   :  { %2046 = vadd.xlane.f32.xlu0 %v2045_v16 }
0x110c   :  { %2050 = vrot.lane.b32.xlu0 %v6008_v55, %s6666_s26  ;;  %s6674_s26 = smov 104  }
0x1126   :  { %v1956_v18 = vpop.f32.mrb[24].mxu1 }
0x1127   :  { %v1960_v17 = vadd.f32 %v1956_v18, %v1719_v50  ;;  %v5350_v20 = vpop.f32.mrb[25].mxu1  ;;  %v2417_v18 = vld [vmem:[%s6659_s13 + $0x50] sm:$0xff] }
0x1183   :  { %v2047_v21 = vpop.xlane.xlu0 %2046 }
0x1184   :  { %5747 = vrcp.f32 %v2047_v21  ;;  %v2419_v21 = vld [vmem:[%s6659_s13 + $0x60] sm:$0xff] }
0x1187   :  { %v2051_v22 = vpop.permute.xlu0 %2050 }
0x1188   :  { %5357 = vmatpush3.msra.mxu1 %v2051_v22  ;;  %v2420_v22 = vld [vmem:[%s6659_s13 + $0x68] sm:$0xff] }
0x1189   :  { %5610 = vmatprep.subr.bf16.mxu1 %v5609_v53 }
0x118e   :  { %v5748_v24 = vpop.eup %5747 }
0x118f   :  { %v2049_v25 = vmul.f32 %v5748_v24, %v5746_v15  ;;  %v2416_v15 = vld [vmem:[%s6659_s13 + $0x48] sm:$0xff]  ;;  %v5641_v24 = vpack.c.bf16 %v2420_v22, %v2419_v21 }
0x1190   :  { %v5633_v16 = vpack.c.bf16 %v2416_v15, %v2415_v14 }
0x1191   :  { %5359 = vmatmul.mubr.msk.f32.vlgmr.msra.gmra.mrb[26].mxu1 %vm296_vm3, %v2049_v25  ;;  %v2421_v25 = vld [vmem:[%s6659_s13 + $0x70] sm:$0xff] }
0x1192   :  { %5612 = vmatpush3.bf16.msra.mxu1 %v5609_v53 }
0x1193   :  { %5614 = vmatprep.subr.bf16.mxu1 %v5613_v58 }
0x1196   :  { %5616 = vmatpush3.bf16.msra.mxu1 %v5613_v58 }
0x1264   :  { %v2122_v26 = vpop.f32.mrb[26].mxu1 }
0x1265   :  { %v5360_v27 = vpop.f32.mrb[27].mxu1  ;;  %5364 = vmatmul.mubr.msk.f32.vlgmr.msra.gmra.mrb[22].mxu0 %vm296_vm3, %v2122_v26  ;;  %v2422_v26 = vld [vmem:[%s6659_s13 + $0x78] sm:$0xff] }
0x1266   :  { %v5645_v27 = vpack.c.bf16 %v2422_v26, %v2421_v25 }
0x1338   :  { %v2195_v30 = vpop.f32.mrb[22].mxu0 }
0x1339   :  { %v2199_v31 = vadd.f32 %v2195_v30, %v1960_v17  ;;  %v5365_v55 = vpop.f32.mrb[23].mxu0  ;;  %v2418_v17 = vld [vmem:[%s6659_s13 + $0x58] sm:$0xff] }
0x133a   :  { %v5637_v20 = vpack.c.bf16 %v2418_v17, %v2417_v18 }
0x133b   :  { %v2208_v33 = vadd.f32 %v4965_v3, %v2199_v31  ;;  %v5617_v3 = vpack.c.bf16 %v2408_v2, %v2407_v1 }
0x133d   :  { %v6213_v34 = vadd.f32 %v2208_v33, %v5972_v19  ;;  %5618 = vmatprep.subr.bf16.mxu0 %v5617_v3 }
0x133e   :  { %5620 = vmatpush3.bf16.msra.mxu0 %v5617_v3 }
0x133f   :  { %v2216_v35 = vsel %vm160_vm1, %v6213_v34, 0.0  ;;  %5622 = vmatprep.subr.bf16.mxu0 %v5621_v6 }
0x1340   :  { %2217 = vadd.xlane.f32.xlu1 %v2216_v35 }
0x1342   :  { %5624 = vmatpush3.bf16.msra.mxu0 %v5621_v6 }
0x1343   :  { %5626 = vmatprep.subr.bf16.mxu0 %v5625_v10 }
0x1344   :  { %2226 = vadd.xlane.f32.xlu1 %v2225_v37 }
0x1346   :  { %5628 = vmatpush3.bf16.msra.mxu0 %v5625_v10 }
0x1347   :  { %5630 = vmatprep.subr.bf16.mxu0 %v5629_v13 }
0x134a   :  { %5632 = vmatpush3.bf16.msra.mxu0 %v5629_v13 }
0x134b   :  { %5634 = vmatprep.subr.bf16.mxu0 %v5633_v16 }
0x134e   :  { %5636 = vmatpush3.bf16.msra.mxu0 %v5633_v16 }
0x134f   :  { %5638 = vmatprep.subr.bf16.mxu0 %v5637_v20 }
0x1352   :  { %5640 = vmatpush3.bf16.msra.mxu0 %v5637_v20 }
0x1353   :  { %5642 = vmatprep.subr.bf16.mxu0 %v5641_v24 }
0x1356   :  { %5644 = vmatpush3.bf16.msra.mxu0 %v5641_v24 }
0x1357   :  { %5646 = vmatprep.subr.bf16.mxu0 %v5645_v27 }
0x135a   :  { %5648 = vmatpush3.bf16.msra.mxu0 %v5645_v27 }
0x135b   :  { %5448 = vmatprep.subr.mxu0 %v5829_v54 }
0x13cd   :  { %v2218_v38 = vpop.xlane.xlu1 %2217 }
0x13ce   :  { %v2220_v39 = vmul.f32 0.03125, %v2218_v38 }
0x13d0   :  { %v2222_v40 = vsub.f32 %v6213_v34, %v2220_v39 }
0x13d1   :  { %v2227_v41 = vpop.xlane.xlu1 %2226 }
0x13d2   :  { %v2231_v42 = vmul.f32 0.03125, %v2227_v41  ;;  %v2224_v43 = vmul.f32 %v2222_v40, %v2222_v40 }
0x13d4   :  { %v2233_v44 = vadd.f32 1e-05, %v2231_v42  ;;  %v2228_v45 = vsel %vm160_vm1, %v2224_v43, 0.0 }
0x13d5   :  { %2229 = vadd.xlane.f32.xlu1 %v2228_v45 }
0x13d6   :  { %5749 = vrsqrt.f32 %v2233_v44 }
0x13e0   :  { %v5750_v19 = vpop.eup %5749 }
0x13e1   :  { %v2237_v46 = vmul.f32 %v5750_v19, %v2221_v32 }
0x13e3   :  { %v2245_v48 = vmul.f32 %v4966_v23, %v2237_v46 }
0x13e5   :  { %v2253_v50 = vadd.f32 %v4967_v47, %v2245_v48 }
0x13e7   :  { %5374 = vmatprep.mubr.msk.f32.mxu1 %vm160_vm1, %v2253_v50 }
0x1462   :  { %v2230_v59 = vpop.xlane.xlu1 %2229 }
0x1463   :  { %v2232_v60 = vmul.f32 0.03125, %v2230_v59 }
0x1465   :  { %v2234_v61 = vadd.f32 1e-05, %v2232_v60 }
0x1467   :  { %5751 = vrsqrt.f32 %v2234_v61 }
0x1471   :  { %v5752_v62 = vpop.eup %5751 }
0x1472   :  { %v2238_v63 = vmul.f32 %v5752_v62, %v2222_v40 }
0x1474   :  { %v2246_v0 = vmul.f32 %v4966_v23, %v2238_v63 }
0x1476   :  { %v2254_v56 = vadd.f32 %v4967_v47, %v2246_v0 }
0x1478   :  { %5375 = vmatmul.mubr.msk.f32.vlgmr.msra.gmra.mrb[28].mxu1 %vm160_vm1, %v2254_v56 }
0x154b   :  { %v5376_v29 = vpop.f32.mrb[28].mxu1 }
0x154c   :  { %v2344_v30 = vadd.f32 %v5376_v29, %v4968_v28  ;;  %v2338_v31 = vpop.f32.mrb[29].mxu1 }
0x154d   :  { %v2339_v55 = vadd.f32 %v4968_v28, %v2338_v31  ;;  %v4973_v31 = vld [vmem:[%s6660_s14] ss:$0 sm:$0xff] }
0x154e   :  { %v2350_v32 = vmul.f32 0.70710677, %v2344_v30  ;;  %v2348_v27 = vmul.f32 0.5, %v2344_v30 }
0x154f   :  { %v2349_v33 = vmul.f32 0.70710677, %v2339_v55  ;;  %v2347_v25 = vmul.f32 0.5, %v2339_v55 }
0x1550   :  { %v4972_v35 = vclamps-f32 %v2350_v32, 3.832507 }
0x1551   :  { %v4971_v36 = vclamps-f32 %v2349_v33, 3.832507 }
0x1552   :  { %v2356_v37 = vmul.f32 %v4972_v35, %v4972_v35 }
0x1553   :  { %v2355_v38 = vmul.f32 %v4971_v36, %v4971_v36 }
0x1554   :  { %v2374_v39 = vmul.f32 -1.1791603e-07, %v2356_v37  ;;  %v2358_v40 = vmul.f32 0.00022905065, %v2356_v37 }
0x1555   :  { %v2373_v41 = vmul.f32 -1.1791603e-07, %v2355_v38  ;;  %v2357_v43 = vmul.f32 0.00022905065, %v2355_v38 }
0x1556   :  { %v2376_v42 = vadd.f32 2.3547966e-05, %v2374_v39  ;;  %v2360_v19 = vadd.f32 0.003408291, %v2358_v40 }
0x1557   :  { %v2375_v44 = vadd.f32 2.3547966e-05, %v2373_v41  ;;  %v2359_v47 = vadd.f32 0.003408291, %v2357_v43 }
0x1558   :  { %v2378_v45 = vmul.f32 %v2376_v42, %v2356_v37  ;;  %v2362_v51 = vmul.f32 %v2360_v19, %v2356_v37 }
0x1559   :  { %v2377_v23 = vmul.f32 %v2375_v44, %v2355_v38  ;;  %v2361_v57 = vmul.f32 %v2359_v47, %v2355_v38 }
0x155a   :  { %v2380_v46 = vadd.f32 0.0010179626, %v2378_v45  ;;  %v2364_v59 = vadd.f32 0.050955694, %v2362_v51 }
0x155b   :  { %v2379_v48 = vadd.f32 0.0010179626, %v2377_v23  ;;  %v2363_v62 = vadd.f32 0.050955694, %v2361_v57  ;;  %v4978_v23 = vld [vmem:[%s6652_s6 + $0x20] sm:$0xff] }
0x155c   :  { %v2382_v50 = vmul.f32 %v2380_v46, %v2356_v37  ;;  %v2366_v56 = vmul.f32 %v2364_v59, %v2356_v37  ;;  %v4979_v46 = vld [vmem:[%s6652_s6 + $0x28] sm:$0xff] }
0x155d   :  { %v2381_v52 = vmul.f32 %v2379_v48, %v2355_v38  ;;  %v2365_v3 = vmul.f32 %v2363_v62, %v2355_v38  ;;  %v5649_v47 = vpack.c.bf16 %v4979_v46, %v4978_v23  ;;  %v4980_v48 = vld [vmem:[%s6652_s6 + $0x30] sm:$0xff] }
0x155e   :  { %v2384_v53 = vadd.f32 0.01407047, %v2382_v50  ;;  %v2368_v6 = vadd.f32 0.18520832, %v2366_v56  ;;  %v4981_v50 = vld [vmem:[%s6652_s6 + $0x38] sm:$0xff] }
0x155f   :  { %v2383_v49 = vadd.f32 0.01407047, %v2381_v52  ;;  %v2367_v10 = vadd.f32 0.18520832, %v2365_v3  ;;  %5650 = vmatprep.subr.bf16.mxu1 %v5649_v47  ;;  %v5653_v51 = vpack.c.bf16 %v4981_v50, %v4980_v48 }
0x1560   :  { %v2386_v58 = vmul.f32 %v2384_v53, %v2356_v37  ;;  %v2370_v12 = vmul.f32 %v2368_v6, %v2356_v37  ;;  %5652 = vmatpush3.bf16.msra.mxu1 %v5649_v47 }
0x1561   :  { %v2385_v60 = vmul.f32 %v2383_v49, %v2355_v38  ;;  %v2369_v13 = vmul.f32 %v2367_v10, %v2355_v38  ;;  %5654 = vmatprep.subr.bf16.mxu1 %v5653_v51 }
0x1562   :  { %v2388_v61 = vadd.f32 0.11098505, %v2386_v58  ;;  %v2372_v14 = vadd.f32 1.1283791, %v2370_v12 }
0x1563   :  { %v2387_v63 = vadd.f32 0.11098505, %v2385_v60  ;;  %v2371_v15 = vadd.f32 1.1283791, %v2369_v13 }
0x1564   :  { %v2390_v0 = vmul.f32 %v2388_v61, %v2356_v37  ;;  %v2398_v16 = vmul.f32 %v4972_v35, %v2372_v14  ;;  %5656 = vmatpush3.bf16.msra.mxu1 %v5653_v51  ;;  %v4976_v61 = vld [vmem:[%s6650_s4 + $0x1] ss:$0 sm:$0xff] }
0x1565   :  { %v2389_v1 = vmul.f32 %v2387_v63, %v2355_v38  ;;  %v2397_v17 = vmul.f32 %v4971_v36, %v2371_v15  ;;  %5423 = vmatprep.subr.mxu1 %v5829_v54  ;;  %v4977_v63 = vld [vmem:[%s6651_s5 + $0x1] ss:$0 sm:$0xff] }
0x1566   :  { %v2392_v2 = vadd.f32 0.49746925, %v2390_v0 }
0x1567   :  { %v2391_v4 = vadd.f32 0.49746925, %v2389_v1 }
0x1568   :  { %v2394_v5 = vmul.f32 %v2392_v2, %v2356_v37 }
0x1569   :  { %v2393_v7 = vmul.f32 %v2391_v4, %v2355_v38 }
0x156a   :  { %v2396_v8 = vadd.f32 1.0, %v2394_v5 }
0x156b   :  { %v2395_v11 = vadd.f32 1.0, %v2393_v7 }
0x156c   :  { %5753 = vrcp.f32 %v2396_v8 }
0x156d   :  { %5755 = vrcp.f32 %v2395_v11 }
0x1576   :  { %v5754_v18 = vpop.eup %5753 }
0x1577   :  { %v5756_v20 = vpop.eup %5755  ;;  %v2402_v21 = vmul.f32 %v5754_v18, %v2398_v16 }
0x1578   :  { %v2400_v22 = vmul.f32 %v5756_v20, %v2397_v17 }
0x1579   :  { %v2404_v24 = vadd.f32 1.0, %v2402_v21 }
0x157a   :  { %v2403_v26 = vadd.f32 1.0, %v2400_v22 }
0x157b   :  { %v2406_v29 = vmul.f32 %v2404_v24, %v2348_v27 }
0x157c   :  { %v2405_v28 = vmul.f32 %v2403_v26, %v2347_v25  ;;  %v6366_v25 = vld [vmem:[%s6653_s7 + $0x20] sm:$0xff] }
0x157e   :  { %5409 = vmatprep.mubr.f32.mxu0 %v2405_v28 }
0x157f   :  { %5410 = vmatmul.mubr.f32.vlgmr.msra.gmra.mrb[24].mxu0 %v2406_v29 }
0x1580   :  { %5450 = vmatprep.mubr.msk.f32.mxu0 %vm5830_vm2, %v5829_v54  ;;  %5449 = vmatpush3.msra.mxu0 %v6366_v25 }
0x1581   :  { %5458 = vmatprep.subr.mxu0 %v5829_v54 }
0x1652   :  { %v5411_v32 = vpop.f32.mrb[24].mxu0 }
0x1653   :  { %v2502_v33 = vadd.f32 %v5411_v32, %v4973_v31  ;;  %v2496_v35 = vpop.f32.mrb[25].mxu0 }
0x1654   :  { %v2497_v36 = vadd.f32 %v4973_v31, %v2496_v35 }
0x1655   :  { %v6298_v37 = vadd.f32 %v2502_v33, %v6213_v34 }
0x1656   :  { %v6301_v30 = vadd.f32 %v2497_v36, %v6201_v9 }
0x1657   :  { %v2514_v55 = vsel %vm160_vm1, %v6298_v37, 0.0 }
0x1658   :  { %2515 = vadd.xlane.f32.xlu0 %v2514_v55  ;;  %v2511_v38 = vsel %vm160_vm1, %v6301_v30, 0.0 }
0x1659   :  { %2512 = vadd.xlane.f32.xlu1 %v2511_v38 }
0x16e5   :  { %v2516_v39 = vpop.xlane.xlu0 %2515 }
0x16e6   :  { %v2518_v40 = vmul.f32 0.03125, %v2516_v39  ;;  %v2513_v41 = vpop.xlane.xlu1 %2512 }
0x16e7   :  { %v2517_v42 = vmul.f32 0.03125, %v2513_v41 }
0x16e8   :  { %v2520_v43 = vsub.f32 %v6298_v37, %v2518_v40 }
0x16e9   :  { %v2519_v34 = vsub.f32 %v6301_v30, %v2517_v42 }
0x16ea   :  { %v2522_v45 = vmul.f32 %v2520_v43, %v2520_v43 }
0x16eb   :  { %v2521_v44 = vmul.f32 %v2519_v34, %v2519_v34 }
0x16ec   :  { %v2526_v19 = vsel %vm160_vm1, %v2522_v45, 0.0 }
0x16ed   :  { %v2523_v9 = vsel %vm160_vm1, %v2521_v44, 0.0  ;;  %v6390_v44 = vld [vmem:[%s6653_s7 + $0x28] sm:$0xff] }
0x16ee   :  { %2524 = vadd.xlane.f32.xlu1 %v2523_v9 }
0x16f2   :  { %2527 = vadd.xlane.f32.xlu1 %v2526_v19 }
0x177b   :  { %v2525_v52 = vpop.xlane.xlu1 %2524 }
0x177c   :  { %v2529_v53 = vmul.f32 0.03125, %v2525_v52 }
0x177e   :  { %v2531_v57 = vadd.f32 1e-05, %v2529_v53 }
0x177f   :  { %v2528_v49 = vpop.xlane.xlu1 %2527 }
0x1780   :  { %5757 = vrsqrt.f32 %v2531_v57  ;;  %v2530_v58 = vmul.f32 0.03125, %v2528_v49 }
0x1782   :  { %v2532_v59 = vadd.f32 1e-05, %v2530_v58 }
0x1784   :  { %5759 = vrsqrt.f32 %v2532_v59 }
0x178a   :  { %v5758_v60 = vpop.eup %5757 }
0x178b   :  { %v2535_v62 = vmul.f32 %v5758_v60, %v2519_v34 }
0x178d   :  { %v2543_v0 = vmul.f32 %v4976_v61, %v2535_v62 }
0x178e   :  { %v5760_v56 = vpop.eup %5759 }
0x178f   :  { %v2536_v1 = vmul.f32 %v5760_v56, %v2520_v43  ;;  %v2551_v2 = vadd.f32 %v4977_v63, %v2543_v0  ;;  %v6420_v56 = vld [vmem:[%s6653_s7 + $0x30] sm:$0xff] }
0x1791   :  { %v2544_v3 = vmul.f32 %v4976_v61, %v2536_v1  ;;  %5420 = vmatprep.mubr.msk.f32.mxu1 %vm160_vm1, %v2551_v2 }
0x1793   :  { %v2552_v4 = vadd.f32 %v4977_v63, %v2544_v3 }
0x1795   :  { %5421 = vmatmul.mubr.msk.f32.vlgmr.msra.gmra.mrb[30].mxu1 %vm160_vm1, %v2552_v4 }
0x1796   :  { %5425 = vmatprep.mubr.msk.f32.mxu1 %vm5830_vm2, %v5829_v54 }
0x1868   :  { %v6334_v5 = vpop.f32.mrb[30].mxu1 }
0x1869   :  { %v6336_v6 = vpop.f32.mrb[31].mxu1 }
0x186a   :  { %2732 = vrot.lane.b32.xlu0 %v6336_v6, %s5834_s30  ;;  %2645 = vrot.lane.b32.xlu1 %v6336_v6, %s5832_s29 }
0x186e   :  { %2810 = vrot.lane.b32.xlu0 %v6336_v6, %s5831_s28 }
0x18dc   :  { %v2646_v7 = vpop.permute.xlu1 %2645  ;;  %v2733_v8 = vpop.permute.xlu0 %2732 }
0x18dd   :  { %5424 = vmatpush3.xpose.msk.msra.mxu1 %vm296_vm3, %v2646_v7 }
0x18de   :  { %5428 = vmatprep.subr.mxu1 %v5829_v54 }
0x18e0   :  { %5426 = vmatmul.mubr.msk.f32.vlgmr.msra.gmra.mrb[32].mxu1 %vm296_vm3, %v6336_v6  ;;  %v2811_v17 = vpop.permute.xlu0 %2810 }
0x18e1   :  { %5429 = vmatpush3.msra.mxu1 %v2733_v8  ;;  %5430 = vmatprep.mubr.msk.f32.mxu1 %vm5830_vm2, %v5829_v54 }
0x18e2   :  { %5433 = vmatprep.subr.mxu1 %v5829_v54 }
0x19b3   :  { %v2717_v10 = vpop.f32.mrb[32].mxu1 }
0x19b4   :  { %v5427_v11 = vpop.f32.mrb[33].mxu1  ;;  %v2721_v12 = vsel %vm296_vm3, %v2717_v10, -inf }
0x19b5   :  { %2722 = vmax.xlane.f32.xlu1 %v2721_v12 }
0x1a42   :  { %v2723_v13 = vpop.xlane.xlu1 %2722 }
0x1a43   :  { %v2724_v14 = vsub.f32 %v2717_v10, %v2723_v13 }
0x1a45   :  { %v2725_v15 = vmul.f32 1.442695, %v2724_v14 }
0x1a47   :  { %5761 = vpow2.f32 %v2725_v15 }
0x1a51   :  { %v5762_v16 = vpop.eup %5761 }
0x1a52   :  { %v2727_v18 = vsel %vm296_vm3, %v5762_v16, 0.0 }
0x1a53   :  { %2728 = vadd.xlane.f32.xlu0 %v2727_v18 }
0x1a69   :  { %2808 = vrot.lane.b32.xlu0 %v6336_v6, %s5833_s0 }
0x1ae0   :  { %v2729_v20 = vpop.xlane.xlu0 %2728 }
0x1ae1   :  { %5763 = vrcp.f32 %v2729_v20 }
0x1ae4   :  { %v2809_v24 = vpop.permute.xlu0 %2808 }
0x1aeb   :  { %v5764_v21 = vpop.eup %5763 }
0x1aec   :  { %v2731_v22 = vmul.f32 %v5764_v21, %v5762_v16 }
0x1aee   :  { %5431 = vmatmul.mubr.msk.f32.vlgmr.msra.gmra.mrb[34].mxu1 %vm296_vm3, %v2731_v22 }
0x1aef   :  { %5434 = vmatpush3.xpose.msk.msra.mxu1 %vm296_vm3, %v2811_v17  ;;  %5435 = vmatprep.mubr.msk.f32.mxu1 %vm5830_vm2, %v5829_v54 }
0x1af0   :  { %5438 = vmatprep.subr.mxu1 %v5829_v54 }
0x1af2   :  { %5436 = vmatmul.mubr.msk.f32.vlgmr.msra.gmra.mrb[36].mxu1 %vm296_vm3, %v2809_v24 }
0x1af3   :  { %5440 = vmatprep.mubr.msk.f32.mxu1 %vm5830_vm2, %v5829_v54 }
0x1bc1   :  { %v2804_v26 = vpop.f32.mrb[34].mxu1 }
0x1bc2   :  { %v5432_v27 = vpop.f32.mrb[35].mxu1  ;;  %5451 = vmatmul.mubr.msk.f32.vlgmr.msra.gmra.mrb[26].mxu0 %vm296_vm3, %v2804_v26  ;;  %v6457_v26 = vld [vmem:[%s6653_s7 + $0x38] sm:$0xff] }
0x1bc3   :  { %5460 = vmatprep.mubr.msk.f32.mxu0 %vm5830_vm2, %v5829_v54 }
0x1bc5   :  { %v2882_v28 = vpop.f32.mrb[36].mxu1 }
0x1bc6   :  { %v5437_v29 = vpop.f32.mrb[37].mxu1  ;;  %v2886_v31 = vsel %vm296_vm3, %v2882_v28, -inf }
0x1bc7   :  { %2887 = vmax.xlane.f32.xlu1 %v2886_v31 }
0x1bd8   :  { %2897 = vrot.lane.b32.xlu1 %v6336_v6, %s5837_s3 }
0x1bdc   :  { %3121 = vrot.lane.b32.xlu1 %v6336_v6, %s5835_s18 }
0x1be0   :  { %3119 = vrot.lane.b32.xlu1 %v6336_v6, %s5836_s2 }
0x1c54   :  { %v2888_v32 = vpop.xlane.xlu1 %2887 }
0x1c55   :  { %v2889_v33 = vsub.f32 %v2882_v28, %v2888_v32 }
0x1c57   :  { %v2890_v35 = vmul.f32 1.442695, %v2889_v33 }
0x1c58   :  { %v2898_v36 = vpop.permute.xlu1 %2897 }
0x1c59   :  { %5765 = vpow2.f32 %v2890_v35  ;;  %5439 = vmatpush3.msra.mxu1 %v2898_v36 }
0x1c5a   :  { %5443 = vmatprep.subr.mxu1 %v5829_v54 }
0x1c5c   :  { %v3122_v9 = vpop.permute.xlu1 %3121 }
0x1c60   :  { %v3120_v23 = vpop.permute.xlu1 %3119 }
0x1c63   :  { %v5766_v55 = vpop.eup %5765 }
0x1c64   :  { %v2892_v38 = vsel %vm296_vm3, %v5766_v55, 0.0 }
0x1c65   :  { %2893 = vadd.xlane.f32.xlu0 %v2892_v38 }
0x1c7b   :  { %3208 = vrot.lane.b32.xlu0 %v6336_v6, %s5840_s24 }
0x1c7f   :  { %3360 = vrot.lane.b32.xlu0 %v6336_v6, %s5838_s22 }
0x1c95   :  { %v3115_v39 = vpop.f32.mrb[26].mxu0 }
0x1c96   :  { %v5452_v40 = vpop.f32.mrb[27].mxu0 }
0x1cf2   :  { %v2894_v41 = vpop.xlane.xlu0 %2893 }
0x1cf3   :  { %5767 = vrcp.f32 %v2894_v41 }
0x1cf6   :  { %v3209_v42 = vpop.permute.xlu0 %3208 }
0x1cf7   :  { %5459 = vmatpush3.msra.mxu0 %v3209_v42 }
0x1cf8   :  { %5468 = vmatprep.subr.mxu0 %v5829_v54 }
0x1cfa   :  { %v3361_v60 = vpop.permute.xlu0 %3360 }
0x1cfd   :  { %v5768_v43 = vpop.eup %5767 }
0x1cfe   :  { %v2896_v34 = vmul.f32 %v5768_v43, %v5766_v55 }
0x1d00   :  { %5441 = vmatmul.mubr.msk.f32.vlgmr.msra.gmra.mrb[38].mxu1 %vm296_vm3, %v2896_v34 }
0x1d01   :  { %5444 = vmatpush3.msra.mxu1 %v6390_v44  ;;  %5445 = vmatprep.mubr.msk.f32.mxu1 %vm5830_vm2, %v5829_v54 }
0x1d02   :  { %5453 = vmatprep.subr.mxu1 %v5829_v54 }
0x1dd3   :  { %v2969_v45 = vpop.f32.mrb[38].mxu1 }
0x1dd4   :  { %v5442_v19 = vpop.f32.mrb[39].mxu1  ;;  %5446 = vmatmul.mubr.msk.f32.vlgmr.msra.gmra.mrb[40].mxu1 %vm296_vm3, %v2969_v45 }
0x1dd5   :  { %5454 = vmatpush3.xpose.msk.msra.mxu1 %vm296_vm3, %v3122_v9  ;;  %5455 = vmatprep.mubr.msk.f32.mxu1 %vm5830_vm2, %v5829_v54 }
0x1dd6   :  { %5463 = vmatprep.subr.mxu1 %v5829_v54 }
0x1dd8   :  { %5456 = vmatmul.mubr.msk.f32.vlgmr.msra.gmra.mrb[42].mxu1 %vm296_vm3, %v3120_v23 }
0x1dd9   :  { %5465 = vmatprep.mubr.msk.f32.mxu1 %vm5830_vm2, %v5829_v54  ;;  %5464 = vmatpush3.msra.mxu1 %v6420_v56 }
0x1dda   :  { %5473 = vmatprep.subr.mxu1 %v5829_v54 }
0x1ea7   :  { %v3042_v46 = vpop.f32.mrb[40].mxu1 }
0x1ea8   :  { %v3116_v47 = vadd.f32 %v3115_v39, %v3042_v46  ;;  %v5447_v48 = vpop.f32.mrb[41].mxu1 }
0x1eab   :  { %v3193_v50 = vpop.f32.mrb[42].mxu1 }
0x1eac   :  { %v5457_v51 = vpop.f32.mrb[43].mxu1  ;;  %v3197_v52 = vsel %vm296_vm3, %v3193_v50, -inf }
0x1ead   :  { %3198 = vmax.xlane.f32.xlu1 %v3197_v52 }
0x1f3a   :  { %v3199_v53 = vpop.xlane.xlu1 %3198 }
0x1f3b   :  { %v3200_v57 = vsub.f32 %v3193_v50, %v3199_v53 }
0x1f3d   :  { %v3201_v49 = vmul.f32 1.442695, %v3200_v57 }
0x1f3f   :  { %5769 = vpow2.f32 %v3201_v49 }
0x1f49   :  { %v5770_v58 = vpop.eup %5769 }
0x1f4a   :  { %v3203_v59 = vsel %vm296_vm3, %v5770_v58, 0.0 }
0x1f4b   :  { %3204 = vadd.xlane.f32.xlu0 %v3203_v59 }
0x1f61   :  { %3358 = vrot.lane.b32.xlu0 %v6336_v6, %s6674_s26 }
0x1fd8   :  { %v3205_v61 = vpop.xlane.xlu0 %3204 }
0x1fd9   :  { %5771 = vrcp.f32 %v3205_v61 }
0x1fdc   :  { %v3359_v0 = vpop.permute.xlu0 %3358 }
0x1fe3   :  { %v5772_v62 = vpop.eup %5771 }
0x1fe4   :  { %v3207_v63 = vmul.f32 %v5772_v62, %v5770_v58 }
0x1fe6   :  { %5461 = vmatmul.mubr.msk.f32.vlgmr.msra.gmra.mrb[28].mxu0 %vm296_vm3, %v3207_v63 }
0x1fe7   :  { %5469 = vmatpush3.xpose.msk.msra.mxu0 %vm296_vm3, %v3361_v60  ;;  %5470 = vmatprep.mubr.msk.f32.mxu0 %vm5830_vm2, %v5829_v54 }
0x1fe8   :  { %5478 = vmatprep.subr.mxu0 %v5829_v54 }
0x1fea   :  { %5471 = vmatmul.mubr.msk.f32.vlgmr.msra.gmra.mrb[30].mxu0 %vm296_vm3, %v3359_v0 }
0x1feb   :  { %5480 = vmatprep.mubr.msk.f32.mxu0 %vm5830_vm2, %v5829_v54  ;;  %5479 = vmatpush3.msra.mxu0 %v6457_v26 }
0x1fec   :  { %5488 = vmatprep.subr.mxu0 %v5829_v54 }
0x20b9   :  { %v3280_v1 = vpop.f32.mrb[28].mxu0 }
0x20ba   :  { %v5462_v2 = vpop.f32.mrb[29].mxu0  ;;  %5466 = vmatmul.mubr.msk.f32.vlgmr.msra.gmra.mrb[44].mxu1 %vm296_vm3, %v3280_v1 }
0x20bb   :  { %5475 = vmatprep.mubr.msk.f32.mxu1 %vm5830_vm2, %v5829_v54 }
0x20bd   :  { %v3432_v3 = vpop.f32.mrb[30].mxu0 }
0x20be   :  { %v5472_v4 = vpop.f32.mrb[31].mxu0  ;;  %v3436_v7 = vsel %vm296_vm3, %v3432_v3, -inf }
0x20bf   :  { %3437 = vmax.xlane.f32.xlu1 %v3436_v7 }
0x20d0   :  { %3447 = vrot.lane.b32.xlu1 %v6336_v6, %s6675_s25 }
0x20d4   :  { %3598 = vrot.lane.b32.xlu1 %v6334_v5, %s5832_s29 }
0x20d8   :  { %3763 = vrot.lane.b32.xlu1 %v6334_v5, %s5831_s28 }
0x20dc   :  { %3761 = vrot.lane.b32.xlu1 %v6334_v5, %s5833_s0  ;;  %s5842_s0 = smov [#allocation2]  }
0x214c   :  { %v3438_v8 = vpop.xlane.xlu1 %3437 }
0x214d   :  { %v3439_v10 = vsub.f32 %v3432_v3, %v3438_v8 }
0x214f   :  { %v3440_v11 = vmul.f32 1.442695, %v3439_v10 }
0x2150   :  { %v3448_v12 = vpop.permute.xlu1 %3447 }
0x2151   :  { %5773 = vpow2.f32 %v3440_v11  ;;  %5474 = vmatpush3.msra.mxu1 %v3448_v12 }
0x2152   :  { %5483 = vmatprep.subr.mxu1 %v5829_v54 }
0x2154   :  { %v3599_v17 = vpop.permute.xlu1 %3598 }
0x2158   :  { %v3764_v22 = vpop.permute.xlu1 %3763 }
0x215b   :  { %v5774_v13 = vpop.eup %5773 }
0x215c   :  { %v3442_v6 = vsel %vm296_vm3, %v5774_v13, 0.0  ;;  %v3762_v24 = vpop.permute.xlu1 %3761 }
0x215d   :  { %3443 = vadd.xlane.f32.xlu0 %v3442_v6 }
0x218d   :  { %v3353_v14 = vpop.f32.mrb[44].mxu1 }
0x218e   :  { %v3357_v15 = vadd.f32 %v3353_v14, %v3116_v47  ;;  %v5467_v16 = vpop.f32.mrb[45].mxu1 }
0x21ea   :  { %v3444_v18 = vpop.xlane.xlu0 %3443 }
0x21eb   :  { %5775 = vrcp.f32 %v3444_v18 }
0x21f5   :  { %v5776_v20 = vpop.eup %5775 }
0x21f6   :  { %v3446_v21 = vmul.f32 %v5776_v20, %v5774_v13 }
0x21f8   :  { %5476 = vmatmul.mubr.msk.f32.vlgmr.msra.gmra.mrb[46].mxu1 %vm296_vm3, %v3446_v21 }
0x21f9   :  { %5484 = vmatpush3.xpose.msk.msra.mxu1 %vm296_vm3, %v3599_v17  ;;  %5485 = vmatprep.mubr.msk.f32.mxu1 %vm5830_vm2, %v5829_v54 }
0x21fa   :  { %5493 = vmatprep.subr.mxu1 %v5829_v54 }
0x21fc   :  { %5486 = vmatmul.mubr.msk.f32.vlgmr.msra.gmra.mrb[48].mxu1 %vm296_vm3, %v6334_v5 }
0x21fd   :  { %5494 = vmatpush3.xpose.msk.msra.mxu1 %vm296_vm3, %v3764_v22  ;;  %5495 = vmatprep.mubr.msk.f32.mxu1 %vm5830_vm2, %v5829_v54 }
0x21fe   :  { %5503 = vmatprep.subr.mxu1 %v5829_v54 }
0x2200   :  { %5496 = vmatmul.mubr.msk.f32.vlgmr.msra.gmra.mrb[50].mxu1 %vm296_vm3, %v3762_v24 }
0x2201   :  { %5504 = vmatpush3.msra.mxu1 %v6390_v44  ;;  %5505 = vmatprep.mubr.msk.f32.mxu1 %vm5830_vm2, %v5829_v54 }
0x2202   :  { %5513 = vmatprep.subr.mxu1 %v5829_v54 }
0x22cb   :  { %v3519_v27 = vpop.f32.mrb[46].mxu1 }
0x22cc   :  { %v5477_v28 = vpop.f32.mrb[47].mxu1  ;;  %5481 = vmatmul.mubr.msk.f32.vlgmr.msra.gmra.mrb[32].mxu0 %vm296_vm3, %v3519_v27 }
0x22cd   :  { %5490 = vmatprep.mubr.msk.f32.mxu0 %vm5830_vm2, %v5829_v54 }
0x22cf   :  { %v3670_v29 = vpop.f32.mrb[48].mxu1 }
0x22d0   :  { %v5487_v31 = vpop.f32.mrb[49].mxu1  ;;  %v3674_v32 = vsel %vm296_vm3, %v3670_v29, -inf }
0x22d1   :  { %3675 = vmax.xlane.f32.xlu0 %v3674_v32  ;;  %v5021_v31 = vld [vmem:[%s6654_s8 + $0x1] ss:$0 sm:$0xff]  ;;  %s4915_s8 = sshll.u32 %s5842_s0, 4  ;;  %s4916_s8 = int_to_ptr.vmem [resolvable:$true] %s4915_s8 }
0x22d2   :  { %p5810_p1 = scmp.lt.s32.totalorder %s4916_s8, %s4916_s8 }
0x22d3   :  { %v3835_v33 = vpop.f32.mrb[50].mxu1 }
0x22d4   :  { %v5497_v35 = vpop.f32.mrb[51].mxu1  ;;  %v3839_v36 = vsel %vm296_vm3, %v3835_v33, -inf }
0x22d5   :  { %3840 = vmax.xlane.f32.xlu1 %v3839_v36 }
0x22e6   :  { %4074 = vrot.lane.b32.xlu1 %v6334_v5, %s5835_s18 }
0x22e7   :  { %3685 = vrot.lane.b32.xlu0 %v6334_v5, %s5834_s30  ;;  %s5805_s30 = scalar_lea.vmem %s4916_s8, 256 }
0x22e8   :  { %p5806_p0 = scmp.ne.s32.totalorder %s4916_s8, %s5805_s30  ;;  %p5811_p2 = scmp.lt.s32.totalorder %s5805_s30, %s5805_s30 }
0x22ea   :  { %p5812_p3 = por %p5811_p2, %p5810_p1 }
0x22ec   :  { %p5813_p4 = pnand %p5812_p3, %p5806_p0 }
0x235e   :  { %v3676_v55 = vpop.xlane.xlu0 %3675 }
0x235f   :  { %v3677_v38 = vsub.f32 %v3670_v29, %v3676_v55 }
0x2361   :  { %v3678_v39 = vmul.f32 1.442695, %v3677_v38 }
0x2362   :  { %v3686_v40 = vpop.permute.xlu0 %3685  ;;  %v3841_v41 = vpop.xlane.xlu1 %3840 }
0x2363   :  { %5777 = vpow2.f32 %v3678_v39  ;;  %v3842_v42 = vsub.f32 %v3835_v33, %v3841_v41  ;;  %5489 = vmatpush3.msra.mxu0 %v3686_v40 }
0x2364   :  { %5498 = vmatprep.subr.mxu0 %v5829_v54 }
0x2365   :  { %v3843_v43 = vmul.f32 1.442695, %v3842_v42 }
0x2366   :  { %v4075_v60 = vpop.permute.xlu1 %4074 }
0x2367   :  { %5779 = vpow2.f32 %v3843_v43 }
0x236d   :  { %v5778_v34 = vpop.eup %5777 }
0x236e   :  { %v3680_v44 = vsel %vm296_vm3, %v5778_v34, 0.0 }
0x236f   :  { %3681 = vadd.xlane.f32.xlu0 %v3680_v44 }
0x2371   :  { %v5780_v9 = vpop.eup %5779 }
0x2372   :  { %v3845_v45 = vsel %vm296_vm3, %v5780_v9, 0.0 }
0x2373   :  { %3846 = vadd.xlane.f32.xlu0 %v3845_v45 }
0x2389   :  { %3850 = vrot.lane.b32.xlu0 %v6334_v5, %s5837_s3 }
0x238d   :  { %4072 = vrot.lane.b32.xlu0 %v6334_v5, %s5836_s2 }
0x239f   :  { %v3592_v19 = vpop.f32.mrb[32].mxu0 }
0x23a0   :  { %v6477_v23 = vadd.f32 %v3592_v19, %v3357_v15  ;;  %v5482_v46 = vpop.f32.mrb[33].mxu0 }
0x23fc   :  { %v3682_v47 = vpop.xlane.xlu0 %3681 }
0x23fd   :  { %5781 = vrcp.f32 %v3682_v47 }
0x2400   :  { %v3847_v48 = vpop.xlane.xlu0 %3846 }
0x2401   :  { %5783 = vrcp.f32 %v3847_v48 }
0x2404   :  { %v3851_v52 = vpop.permute.xlu0 %3850 }
0x2407   :  { %v5782_v50 = vpop.eup %5781 }
0x2408   :  { %v3684_v51 = vmul.f32 %v5782_v50, %v5778_v34 }
0x240a   :  { %5491 = vmatmul.mubr.msk.f32.vlgmr.msra.gmra.mrb[34].mxu0 %vm296_vm3, %v3684_v51 }
0x240b   :  { %v5784_v53 = vpop.eup %5783  ;;  %5499 = vmatpush3.msra.mxu0 %v3851_v52  ;;  %5500 = vmatprep.mubr.msk.f32.mxu0 %vm5830_vm2, %v5829_v54 }
0x240c   :  { %v3849_v57 = vmul.f32 %v5784_v53, %v5780_v9  ;;  %5508 = vmatprep.subr.mxu0 %v5829_v54 }
0x240e   :  { %5501 = vmatmul.mubr.msk.f32.vlgmr.msra.gmra.mrb[36].mxu0 %vm296_vm3, %v3849_v57 }
0x240f   :  { %5509 = vmatpush3.msra.mxu0 %v6366_v25  ;;  %5510 = vmatprep.mubr.msk.f32.mxu0 %vm5830_vm2, %v5829_v54  ;;  %v4073_v25 = vpop.permute.xlu0 %4072 }
0x2410   :  { %5518 = vmatprep.subr.mxu0 %v5829_v54 }
0x24dd   :  { %v3757_v49 = vpop.f32.mrb[34].mxu0 }
0x24de   :  { %v5492_v58 = vpop.f32.mrb[35].mxu0  ;;  %5511 = vmatmul.mubr.msk.f32.vlgmr.msra.gmra.mrb[38].mxu0 %vm296_vm3, %v3757_v49 }
0x24df   :  { %5520 = vmatprep.mubr.msk.f32.mxu0 %vm5830_vm2, %v5829_v54 }
0x24e1   :  { %v3922_v59 = vpop.f32.mrb[36].mxu0 }
0x24e2   :  { %v5502_v61 = vpop.f32.mrb[37].mxu0  ;;  %5506 = vmatmul.mubr.msk.f32.vlgmr.msra.gmra.mrb[52].mxu1 %vm296_vm3, %v3922_v59 }
0x24e3   :  { %5514 = vmatpush3.xpose.msk.msra.mxu1 %vm296_vm3, %v4075_v60  ;;  %5515 = vmatprep.mubr.msk.f32.mxu1 %vm5830_vm2, %v5829_v54  ;;  %v5024_v61 = vld [vmem:[%s6655_s9 + $0x1] ss:$0 sm:$0xff] }
0x24e4   :  { %5523 = vmatprep.subr.mxu1 %v5829_v54 }
0x24e6   :  { %5516 = vmatmul.mubr.msk.f32.vlgmr.msra.gmra.mrb[54].mxu1 %vm296_vm3, %v4073_v25 }
0x24e7   :  { %5524 = vmatpush3.msra.mxu1 %v6420_v56  ;;  %5525 = vmatprep.mubr.msk.f32.mxu1 %vm5830_vm2, %v5829_v54 }
0x24e8   :  { %5533 = vmatprep.subr.mxu1 %v5829_v54 }
0x25b1   :  { %v4068_v62 = vpop.f32.mrb[38].mxu0 }
0x25b2   :  { %v5512_v63 = vpop.f32.mrb[39].mxu0 }
0x25b5   :  { %v3995_v0 = vpop.f32.mrb[52].mxu1 }
0x25b6   :  { %v4069_v1 = vadd.f32 %v4068_v62, %v3995_v0  ;;  %v5507_v2 = vpop.f32.mrb[53].mxu1  ;;  %v5025_v62 = vld [vmem:[%s6656_s10 + $0x1] ss:$0 sm:$0xff] }
0x25b7   :  { %v5027_v2 = vld [vmem:[%s6657_s11 + $0x28] sm:$0xff] }
0x25b9   :  { %v4146_v3 = vpop.f32.mrb[54].mxu1 }
0x25ba   :  { %v5517_v4 = vpop.f32.mrb[55].mxu1  ;;  %v4150_v7 = vsel %vm296_vm3, %v4146_v3, -inf }
0x25bb   :  { %4151 = vmax.xlane.f32.xlu0 %v4150_v7  ;;  %v5028_v4 = vld [vmem:[%s6657_s11 + $0x30] sm:$0xff]  ;;  %v5029_v7 = vld [vmem:[%s6657_s11 + $0x38] sm:$0xff] }
0x25d1   :  { %4161 = vrot.lane.b32.xlu0 %v6334_v5, %s5840_s24 }
0x25d5   :  { %4311 = vrot.lane.b32.xlu0 %v6334_v5, %s6674_s26 }
0x2648   :  { %v4152_v56 = vpop.xlane.xlu0 %4151 }
0x2649   :  { %v4153_v8 = vsub.f32 %v4146_v3, %v4152_v56  ;;  %v5661_v56 = vpack.c.bf16 %v5029_v7, %v5028_v4 }
0x264b   :  { %v4154_v10 = vmul.f32 1.442695, %v4153_v8 }
0x264c   :  { %v4162_v11 = vpop.permute.xlu0 %4161 }
0x264d   :  { %5785 = vpow2.f32 %v4154_v10  ;;  %5519 = vmatpush3.msra.mxu0 %v4162_v11 }
0x264e   :  { %5528 = vmatprep.subr.mxu0 %v5829_v54 }
0x2650   :  { %v4312_v18 = vpop.permute.xlu0 %4311 }
0x2657   :  { %v5786_v12 = vpop.eup %5785 }
0x2658   :  { %v4156_v13 = vsel %vm296_vm3, %v5786_v12, 0.0 }
0x2659   :  { %4157 = vadd.xlane.f32.xlu1 %v4156_v13 }
0x266a   :  { %4313 = vrot.lane.b32.xlu1 %v6334_v5, %s5838_s22 }
0x26e6   :  { %v4158_v6 = vpop.xlane.xlu1 %4157 }
0x26e7   :  { %5787 = vrcp.f32 %v4158_v6 }
0x26ea   :  { %v4314_v16 = vpop.permute.xlu1 %4313 }
0x26f1   :  { %v5788_v14 = vpop.eup %5787 }
0x26f2   :  { %v4160_v15 = vmul.f32 %v5788_v14, %v5786_v12 }
0x26f4   :  { %5521 = vmatmul.mubr.msk.f32.vlgmr.msra.gmra.mrb[40].mxu0 %vm296_vm3, %v4160_v15  ;;  %v5036_v15 = vld [vmem:[%s6659_s13 + $0x80] sm:$0xff] }
0x26f5   :  { %5529 = vmatpush3.xpose.msk.msra.mxu0 %vm296_vm3, %v4314_v16  ;;  %5530 = vmatprep.mubr.msk.f32.mxu0 %vm5830_vm2, %v5829_v54  ;;  %v5037_v16 = vld [vmem:[%s6659_s13 + $0x88] sm:$0xff] }
0x26f6   :  { %5538 = vmatprep.subr.mxu0 %v5829_v54 }
0x26f8   :  { %5531 = vmatmul.mubr.msk.f32.vlgmr.msra.gmra.mrb[42].mxu0 %vm296_vm3, %v4312_v18  ;;  %v5665_v18 = vpack.c.bf16 %v5037_v16, %v5036_v15 }
0x26f9   :  { %5539 = vmatpush3.msra.mxu0 %v6457_v26  ;;  %5540 = vmatprep.mubr.msk.f32.mxu0 %vm5830_vm2, %v5829_v54 }
0x26fa   :  { %5666 = vmatprep.subr.bf16.mxu0 %v5665_v18 }
0x27c7   :  { %v4233_v17 = vpop.f32.mrb[40].mxu0 }
0x27c8   :  { %v5522_v20 = vpop.f32.mrb[41].mxu0  ;;  %5526 = vmatmul.mubr.msk.f32.vlgmr.msra.gmra.mrb[56].mxu1 %vm296_vm3, %v4233_v17  ;;  %v5038_v17 = vld [vmem:[%s6659_s13 + $0x90] sm:$0xff] }
0x27c9   :  { %5535 = vmatprep.mubr.msk.f32.mxu1 %vm5830_vm2, %v5829_v54  ;;  %v4558_v54 = vadd.f32 %v5021_v31, %v6477_v23  ;;  %v5039_v20 = vld [vmem:[%s6659_s13 + $0x98] sm:$0xff] }
0x27cb   :  { %v4385_v21 = vpop.f32.mrb[42].mxu0  ;;  %v6530_v33 = vadd.f32 %v4558_v54, %v6301_v30  ;;  %v5045_v54 = vld [vmem:[%s6659_s13 + $0xc8] sm:$0xff] }
0x27cc   :  { %v5532_v22 = vpop.f32.mrb[43].mxu0  ;;  %v4389_v24 = vsel %vm296_vm3, %v4385_v21, -inf }
0x27cd   :  { %4390 = vmax.xlane.f32.xlu0 %v4389_v24  ;;  %v5040_v22 = vld [vmem:[%s6659_s13 + $0xa0] sm:$0xff]  ;;  %v5041_v24 = vld [vmem:[%s6659_s13 + $0xa8] sm:$0xff] }
0x27e3   :  { %4400 = vrot.lane.b32.xlu0 %v6334_v5, %s6675_s25  ;;  %v4566_v5 = vsel %vm160_vm1, %v6530_v33, 0.0 }
0x285a   :  { %v4391_v27 = vpop.xlane.xlu0 %4390 }
0x285b   :  { %v4392_v26 = vsub.f32 %v4385_v21, %v4391_v27  ;;  %v5669_v21 = vpack.c.bf16 %v5039_v20, %v5038_v17  ;;  %v5673_v27 = vpack.c.bf16 %v5041_v24, %v5040_v22 }
0x285d   :  { %v4393_v28 = vmul.f32 1.442695, %v4392_v26  ;;  %v5042_v26 = vld [vmem:[%s6659_s13 + $0xb0] sm:$0xff] }
0x285e   :  { %v4401_v29 = vpop.permute.xlu0 %4400 }
0x285f   :  { %5789 = vpow2.f32 %v4393_v28  ;;  %5534 = vmatpush3.msra.mxu1 %v4401_v29  ;;  %v5043_v28 = vld [vmem:[%s6659_s13 + $0xb8] sm:$0xff] }
0x2860   :  { %v5677_v29 = vpack.c.bf16 %v5043_v28, %v5042_v26 }
0x2869   :  { %v5790_v32 = vpop.eup %5789 }
0x286a   :  { %v4395_v35 = vsel %vm296_vm3, %v5790_v32, 0.0 }
0x286b   :  { %4396 = vadd.xlane.f32.xlu1 %v4395_v35  ;;  %v5046_v35 = vld [vmem:[%s6659_s13 + $0xd0] sm:$0xff] }
0x286f   :  { %4567 = vadd.xlane.f32.xlu1 %v4566_v5  ;;  %v5047_v5 = vld [vmem:[%s6659_s13 + $0xd8] sm:$0xff] }
0x289b   :  { %v4306_v36 = vpop.f32.mrb[56].mxu1 }
0x289c   :  { %v4310_v55 = vadd.f32 %v4306_v36, %v4069_v1  ;;  %v5527_v38 = vpop.f32.mrb[57].mxu1  ;;  %v5026_v1 = vld [vmem:[%s6657_s11 + $0x20] sm:$0xff]  ;;  %v5685_v36 = vpack.c.bf16 %v5047_v5, %v5046_v35 }
0x289d   :  { %v5657_v3 = vpack.c.bf16 %v5027_v2, %v5026_v1  ;;  %v5049_v38 = vld [vmem:[%s6659_s13 + $0xe8] sm:$0xff] }
0x289f   :  { %5658 = vmatprep.subr.bf16.mxu1 %v5657_v3 }
0x28f8   :  { %v4397_v39 = vpop.xlane.xlu1 %4396 }
0x28f9   :  { %5791 = vrcp.f32 %v4397_v39 }
0x28fc   :  { %v4568_v30 = vpop.xlane.xlu1 %4567 }
0x28fd   :  { %v4572_v34 = vmul.f32 0.03125, %v4568_v30 }
0x28ff   :  { %v4574_v19 = vsub.f32 %v6530_v33, %v4572_v34 }
0x2901   :  { %v4576_v48 = vmul.f32 %v4574_v19, %v4574_v19 }
0x2903   :  { %v5792_v40 = vpop.eup %5791  ;;  %v4578_v50 = vsel %vm160_vm1, %v4576_v48, 0.0 }
0x2904   :  { %v4399_v41 = vmul.f32 %v5792_v40, %v5790_v32  ;;  %v5050_v40 = vld [vmem:[%s6659_s13 + $0xf0] sm:$0xff] }
0x2906   :  { %5536 = vmatmul.mubr.msk.f32.vlgmr.msra.gmra.mrb[58].mxu1 %vm296_vm3, %v4399_v41  ;;  %v5051_v41 = vld [vmem:[%s6659_s13 + $0xf8] sm:$0xff] }
0x2907   :  { %5660 = vmatpush3.bf16.msra.mxu1 %v5657_v3 }
0x2908   :  { %5662 = vmatprep.subr.bf16.mxu1 %v5661_v56 }
0x290b   :  { %5664 = vmatpush3.bf16.msra.mxu1 %v5661_v56 }
0x29d9   :  { %v4472_v42 = vpop.f32.mrb[58].mxu1 }
0x29da   :  { %v5537_v43 = vpop.f32.mrb[59].mxu1  ;;  %5541 = vmatmul.mubr.msk.f32.vlgmr.msra.gmra.mrb[44].mxu0 %vm296_vm3, %v4472_v42  ;;  %v5693_v42 = vpack.c.bf16 %v5051_v41, %v5050_v40 }
0x29db   :  { %5668 = vmatpush3.bf16.msra.mxu0 %v5665_v18  ;;  %v5031_v43 = vld [vmem:[%s6658_s12 + $0x1] ss:$0 sm:$0xff] }
0x29dc   :  { %5670 = vmatprep.subr.bf16.mxu0 %v5669_v21 }
0x29df   :  { %5672 = vmatpush3.bf16.msra.mxu0 %v5669_v21 }
0x29e0   :  { %5674 = vmatprep.subr.bf16.mxu0 %v5673_v27 }
0x29e3   :  { %5676 = vmatpush3.bf16.msra.mxu0 %v5673_v27 }
0x29e4   :  { %5678 = vmatprep.subr.bf16.mxu0 %v5677_v29 }
0x29e7   :  { %5680 = vmatpush3.bf16.msra.mxu0 %v5677_v29 }
0x2aad   :  { %v4545_v44 = vpop.f32.mrb[44].mxu0 }
0x2aae   :  { %v4549_v9 = vadd.f32 %v4545_v44, %v4310_v55  ;;  %v5542_v45 = vpop.f32.mrb[45].mxu0  ;;  %v5048_v55 = vld [vmem:[%s6659_s13 + $0xe0] sm:$0xff] }
0x2aaf   :  { %v5689_v39 = vpack.c.bf16 %v5049_v38, %v5048_v55 }
0x2ab0   :  { %v4559_v23 = vadd.f32 %v5021_v31, %v4549_v9  ;;  %v5044_v31 = vld [vmem:[%s6659_s13 + $0xc0] sm:$0xff] }
0x2ab1   :  { %v5681_v32 = vpack.c.bf16 %v5045_v54, %v5044_v31 }
0x2ab2   :  { %v6539_v46 = vadd.f32 %v4559_v23, %v6298_v37 }
0x2ab3   :  { %5682 = vmatprep.subr.bf16.mxu0 %v5681_v32 }
0x2ab4   :  { %v4569_v47 = vsel %vm160_vm1, %v6539_v46, 0.0  ;;  %5684 = vmatpush3.bf16.msra.mxu0 %v5681_v32 }
0x2ab5   :  { %4570 = vadd.xlane.f32.xlu1 %v4569_v47  ;;  %5686 = vmatprep.subr.bf16.mxu0 %v5685_v36 }
0x2ab8   :  { %5688 = vmatpush3.bf16.msra.mxu0 %v5685_v36 }
0x2ab9   :  { %4579 = vadd.xlane.f32.xlu1 %v4578_v50  ;;  %5690 = vmatprep.subr.bf16.mxu0 %v5689_v39 }
0x2abc   :  { %5692 = vmatpush3.bf16.msra.mxu0 %v5689_v39 }
0x2abd   :  { %5694 = vmatprep.subr.bf16.mxu0 %v5693_v42 }
0x2ac0   :  { %5696 = vmatpush3.bf16.msra.mxu0 %v5693_v42 }
0x2b42   :  { %v4571_v51 = vpop.xlane.xlu1 %4570 }
0x2b43   :  { %v4573_v52 = vmul.f32 0.03125, %v4571_v51 }
0x2b45   :  { %v4575_v53 = vsub.f32 %v6539_v46, %v4573_v52 }
0x2b46   :  { %v4580_v57 = vpop.xlane.xlu1 %4579 }
0x2b47   :  { %v4584_v49 = vmul.f32 0.03125, %v4580_v57  ;;  %v4577_v58 = vmul.f32 %v4575_v53, %v4575_v53 }
0x2b49   :  { %v4586_v59 = vadd.f32 1e-05, %v4584_v49  ;;  %v4581_v60 = vsel %vm160_vm1, %v4577_v58, 0.0 }
0x2b4a   :  { %4582 = vadd.xlane.f32.xlu0 %v4581_v60 }
0x2b4b   :  { %5793 = vrsqrt.f32 %v4586_v59 }
0x2b55   :  { %v5794_v37 = vpop.eup %5793 }
0x2b56   :  { %v4590_v25 = vmul.f32 %v5794_v37, %v4574_v19 }
0x2b58   :  { %v4598_v63 = vmul.f32 %v5024_v61, %v4590_v25 }
0x2b5a   :  { %v4606_v0 = vadd.f32 %v5025_v62, %v4598_v63 }
0x2b5c   :  { %5551 = vmatprep.mubr.msk.f32.mxu1 %vm160_vm1, %v4606_v0 }
0x2bd7   :  { %v4583_v8 = vpop.xlane.xlu0 %4582 }
0x2bd8   :  { %v4585_v10 = vmul.f32 0.03125, %v4583_v8 }
0x2bda   :  { %v4587_v11 = vadd.f32 1e-05, %v4585_v10 }
0x2bdc   :  { %5795 = vrsqrt.f32 %v4587_v11 }
0x2be6   :  { %v5796_v12 = vpop.eup %5795 }
0x2be7   :  { %v4591_v13 = vmul.f32 %v5796_v12, %v4575_v53 }
0x2be9   :  { %v4599_v6 = vmul.f32 %v5024_v61, %v4591_v13 }
0x2beb   :  { %v4607_v14 = vadd.f32 %v5025_v62, %v4599_v6 }
0x2bed   :  { %5552 = vmatmul.mubr.msk.f32.vlgmr.msra.gmra.mrb[60].mxu1 %vm160_vm1, %v4607_v14 }
0x2cc0   :  { %v5553_v30 = vpop.f32.mrb[60].mxu1 }
0x2cc1   :  { %v4699_v34 = vadd.f32 %v5553_v30, %v5031_v43  ;;  %v4693_v44 = vpop.f32.mrb[61].mxu1  ;;  %v5053_v30 = vld [vmem:[%s6660_s14 + $0x1] ss:$0 sm:$0xff] }
0x2cc2   :  { %v4694_v9 = vadd.f32 %v5031_v43, %v4693_v44 }
0x2cc3   :  { %v4705_v45 = vmul.f32 0.70710677, %v4699_v34  ;;  %v4703_v41 = vmul.f32 0.5, %v4699_v34 }
0x2cc4   :  { %v4704_v19 = vmul.f32 0.70710677, %v4694_v9  ;;  %v4702_v39 = vmul.f32 0.5, %v4694_v9 }
0x2cc5   :  { %v5035_v23 = vclamps-f32 %v4705_v45, 3.832507 }
0x2cc6   :  { %v5034_v47 = vclamps-f32 %v4704_v19, 3.832507 }
0x2cc7   :  { %v4711_v48 = vmul.f32 %v5035_v23, %v5035_v23 }
0x2cc8   :  { %v4710_v50 = vmul.f32 %v5034_v47, %v5034_v47 }
0x2cc9   :  { %v4729_v51 = vmul.f32 -1.1791603e-07, %v4711_v48  ;;  %v4713_v52 = vmul.f32 0.00022905065, %v4711_v48 }
0x2cca   :  { %v4728_v53 = vmul.f32 -1.1791603e-07, %v4710_v50  ;;  %v4712_v49 = vmul.f32 0.00022905065, %v4710_v50 }
0x2ccb   :  { %v4731_v57 = vadd.f32 2.3547966e-05, %v4729_v51  ;;  %v4715_v60 = vadd.f32 0.003408291, %v4713_v52 }
0x2ccc   :  { %v4730_v58 = vadd.f32 2.3547966e-05, %v4728_v53  ;;  %v4714_v25 = vadd.f32 0.003408291, %v4712_v49 }
0x2ccd   :  { %v4733_v59 = vmul.f32 %v4731_v57, %v4711_v48  ;;  %v4717_v0 = vmul.f32 %v4715_v60, %v4711_v48 }
0x2cce   :  { %v4732_v37 = vmul.f32 %v4730_v58, %v4710_v50  ;;  %v4716_v3 = vmul.f32 %v4714_v25, %v4710_v50 }
0x2ccf   :  { %v4735_v61 = vadd.f32 0.0010179626, %v4733_v59  ;;  %v4719_v56 = vadd.f32 0.050955694, %v4717_v0 }
0x2cd0   :  { %v4734_v62 = vadd.f32 0.0010179626, %v4732_v37  ;;  %v4718_v11 = vadd.f32 0.050955694, %v4716_v3  ;;  %v5055_v3 = vld [vmem:[%s6662_s16] ss:$0 sm:$0xff] }
0x2cd1   :  { %v4737_v63 = vmul.f32 %v4735_v61, %v4711_v48  ;;  %v4721_v6 = vmul.f32 %v4719_v56, %v4711_v48 }
0x2cd2   :  { %v4736_v1 = vmul.f32 %v4734_v62, %v4710_v50  ;;  %v4720_v16 = vmul.f32 %v4718_v11, %v4710_v50 }
0x2cd3   :  { %v4739_v2 = vadd.f32 0.01407047, %v4737_v63  ;;  %v4723_v20 = vadd.f32 0.18520832, %v4721_v6 }
0x2cd4   :  { %v4738_v4 = vadd.f32 0.01407047, %v4736_v1  ;;  %v4722_v24 = vadd.f32 0.18520832, %v4720_v16  ;;  %v5054_v1 = vld [vmem:[%s6661_s15] ss:$0 sm:$0xff] }
0x2cd5   :  { %v4741_v7 = vmul.f32 %v4739_v2, %v4711_v48  ;;  %v4725_v26 = vmul.f32 %v4723_v20, %v4711_v48 }
0x2cd6   :  { %v4740_v8 = vmul.f32 %v4738_v4, %v4710_v50  ;;  %v4724_v28 = vmul.f32 %v4722_v24, %v4710_v50 }
0x2cd7   :  { %v4743_v10 = vadd.f32 0.11098505, %v4741_v7  ;;  %v4727_v29 = vadd.f32 1.1283791, %v4725_v26 }
0x2cd8   :  { %v4742_v12 = vadd.f32 0.11098505, %v4740_v8  ;;  %v4726_v31 = vadd.f32 1.1283791, %v4724_v28 }
0x2cd9   :  { %v4745_v13 = vmul.f32 %v4743_v10, %v4711_v48  ;;  %v4753_v54 = vmul.f32 %v5035_v23, %v4727_v29 }
0x2cda   :  { %v4744_v14 = vmul.f32 %v4742_v12, %v4710_v50  ;;  %v4752_v35 = vmul.f32 %v5034_v47, %v4726_v31 }
0x2cdb   :  { %v4747_v15 = vadd.f32 0.49746925, %v4745_v13 }
0x2cdc   :  { %v4746_v18 = vadd.f32 0.49746925, %v4744_v14 }
0x2cdd   :  { %v4749_v17 = vmul.f32 %v4747_v15, %v4711_v48 }
0x2cde   :  { %v4748_v21 = vmul.f32 %v4746_v18, %v4710_v50 }
0x2cdf   :  { %v4751_v22 = vadd.f32 1.0, %v4749_v17 }
0x2ce0   :  { %v4750_v27 = vadd.f32 1.0, %v4748_v21 }
0x2ce1   :  { %5797 = vrcp.f32 %v4751_v22 }
0x2ce2   :  { %5799 = vrcp.f32 %v4750_v27 }
0x2ceb   :  { %v5798_v32 = vpop.eup %5797 }
0x2cec   :  { %v5800_v5 = vpop.eup %5799  ;;  %v4757_v36 = vmul.f32 %v5798_v32, %v4753_v54 }
0x2ced   :  { %v4755_v55 = vmul.f32 %v5800_v5, %v4752_v35 }
0x2cee   :  { %v4759_v38 = vadd.f32 1.0, %v4757_v36 }
0x2cef   :  { %v4758_v40 = vadd.f32 1.0, %v4755_v55 }
0x2cf0   :  { %v4761_v43 = vmul.f32 %v4759_v38, %v4703_v41 }
0x2cf1   :  { %v4760_v42 = vmul.f32 %v4758_v40, %v4702_v39 }
0x2cf3   :  { %5586 = vmatprep.mubr.f32.mxu0 %v4760_v42 }
0x2cf4   :  { %5587 = vmatmul.mubr.f32.vlgmr.msra.gmra.mrb[46].mxu0 %v4761_v43 }
0x2dc7   :  { %v5588_v44 = vpop.f32.mrb[46].mxu0 }
0x2dc8   :  { %v4853_v45 = vpop.f32.mrb[47].mxu0  ;;  %v4859_v19 = vadd.f32 %v5588_v44, %v5053_v30 }
0x2dc9   :  { %v4854_v23 = vadd.f32 %v5053_v30, %v4853_v45 }
0x2dca   :  { %v4863_v48 = vadd.f32 %v4859_v19, %v6539_v46 }
0x2dcb   :  { %v4862_v47 = vadd.f32 %v4854_v23, %v6530_v33 }
0x2dcc   :  { %v4869_v34 = vsel %vm160_vm1, %v4863_v48, 0.0 }
0x2dcd   :  { %v4866_v9 = vsel %vm160_vm1, %v4862_v47, 0.0 }
0x2dce   :  { %4867 = vadd.xlane.f32.xlu1 %v4866_v9 }
0x2dd2   :  { %4870 = vadd.xlane.f32.xlu1 %v4869_v34 }
0x2e5b   :  { %v4868_v50 = vpop.xlane.xlu1 %4867 }
0x2e5c   :  { %v4872_v51 = vmul.f32 0.03125, %v4868_v50 }
0x2e5e   :  { %v4874_v52 = vsub.f32 %v4862_v47, %v4872_v51 }
0x2e5f   :  { %v4871_v53 = vpop.xlane.xlu1 %4870 }
0x2e60   :  { %v4873_v57 = vmul.f32 0.03125, %v4871_v53  ;;  %v4876_v49 = vmul.f32 %v4874_v52, %v4874_v52 }
0x2e62   :  { %v4875_v58 = vsub.f32 %v4863_v48, %v4873_v57  ;;  %v4878_v59 = vsel %vm160_vm1, %v4876_v49, 0.0 }
0x2e63   :  { %4879 = vadd.xlane.f32.xlu1 %v4878_v59 }
0x2e64   :  { %v4877_v60 = vmul.f32 %v4875_v58, %v4875_v58 }
0x2e66   :  { %v4881_v33 = vsel %vm160_vm1, %v4877_v60, 0.0 }
0x2e67   :  { %4882 = vadd.xlane.f32.xlu1 %v4881_v33 }
0x2ef0   :  { %v4880_v46 = vpop.xlane.xlu1 %4879 }
0x2ef1   :  { %v4884_v37 = vmul.f32 0.03125, %v4880_v46 }
0x2ef3   :  { %v4886_v61 = vadd.f32 1e-05, %v4884_v37 }
0x2ef4   :  { %v4883_v25 = vpop.xlane.xlu1 %4882 }
0x2ef5   :  { %5801 = vrsqrt.f32 %v4886_v61  ;;  %v4885_v62 = vmul.f32 0.03125, %v4883_v25 }
0x2ef7   :  { %v4887_v63 = vadd.f32 1e-05, %v4885_v62 }
0x2ef9   :  { %5803 = vrsqrt.f32 %v4887_v63 }
0x2eff   :  { %v5802_v0 = vpop.eup %5801 }
0x2f00   :  { %v4890_v2 = vmul.f32 %v5802_v0, %v4874_v52 }
0x2f02   :  { %v4898_v4 = vmul.f32 %v5054_v1, %v4890_v2 }
0x2f03   :  { %v5804_v7 = vpop.eup %5803 }
0x2f04   :  { %v4891_v56 = vmul.f32 %v5804_v7, %v4875_v58  ;;  %v4906_v8 = vadd.f32 %v5055_v3, %v4898_v4 }
0x2f06   :  { %v4899_v10 = vmul.f32 %v5054_v1, %v4891_v56  ;;  %4908 = vst.msk [vmem:[#allocation2] sm:$0xff] %vm160_vm1, %v4906_v8 }
0x2f08   :  { %v4907_v11 = vadd.f32 %v5055_v3, %v4899_v10 }
0x2f0a   :  { %4909 = vst.msk [vmem:[#allocation2 + $0x8] sm:$0xff] %vm160_vm1, %v4907_v11 }
0x2f0b   :  { %5816 = shalt.err (!%p5813_p4)
}
0x2f0c   :  { %s5817_s18 = scalar_lea.hbm %s6663_s17, 256 }
0x2f0d   :  { %p5818_p5 = scmp.ne.s32.totalorder %s6663_s17, %s5817_s18  ;;  %p5821_p6 = scmp.lt.u32.totalorder %s5817_s18, %s6663_s17 }
0x2f0f   :  { %p5823_p7 = pnand %p5821_p6, %p5818_p5 }
0x2f11   :  { %5826 = shalt.err (!%p5823_p7)
}
0x2f12   :  { %s5843_s27 = smov 128   ;;  %s5844_s9 = smov 8  }
0x2f13   :  { %4921 = dma.vmem_to_hbm [thread:$0]  %s4916_s8, 256, %s6663_s17, [#allocation3], %s5843_s27, %s5843_s27, %s5844_s9  }
0x2f14   :  { %5827 = dma.done.wait [#allocation3], 256  }
0x2f15   :  { %5828 = vsyncadd [#allocation3], 4294967040 }
0x2f16   :  { %4925 = vsyncpa [#allocation3], 1 }

</bundles_post_ra>
